<compile_context>
chip_gen: v7x
topology: tpu7x:2x2x1
jax: 0.10.0
libtpu: 0.0.40
codegen_flags: <defaults>
</compile_context>

<pallas_src>
import jax
import jax.numpy as jnp
from jax.experimental import pallas as pl
from jax.experimental.pallas import tpu as pltpu

# ----------------------------- model constants ------------------------------
C_IN = 7                 # in_type = trivial(1) + 2 x standard(3)
SA_OUT = (32, 48, 64)    # conv output channels of sa1 / sa2 / sa3
LIN_HID = 64             # hidden width inside each LinearLayer
SA4_OUT = 16             # GlobalEquivariantSetupAbstraction output (MLP input)
MLP_DIMS = (16, 288, 576, 10)
RATIO_STRIDE = 2         # set_abstraction_ratio = 0.5  -> keep every 2nd point
K_NBR = 8                # neighbors per sampled center
LANE = 128
NEG_INF = -1e30          # masks pad classes out of the fused log_softmax (kept in f32)


def _ceil_to(n, m=LANE):
    return ((n + m - 1) // m) * m


D1P = _ceil_to(MLP_DIMS[1])   # 384
D2P = _ceil_to(MLP_DIMS[2])   # 640
D3P = _ceil_to(MLP_DIMS[3])   # 128
SH_W = D2P                    # packed-shift width for the head kernel


def _pad2(w, rows, cols):
    return jnp.pad(w, ((0, rows - w.shape[0]), (0, cols - w.shape[1])))


def _pad_row(v, cols, fill=0.0):
    v = v.reshape(1, -1)
    return jnp.pad(v, ((0, 0), (0, cols - v.shape[1])), constant_values=fill)


# ------------------------------ Pallas kernels ------------------------------
def _stage_kernel(a_ref, f_ref, wc_ref, w1_ref, w2_ref, w3_ref, w4_ref, sh_ref, o_ref):
    """Fused neighbor-mean (one-hot matmul) + SetAbstraction conv + LinearLayer.

    a_ref : (TM, Np)   bf16  normalized one-hot averaging matrix
    f_ref : (Np, 128)  bf16  previous-stage features (VMEM-resident across the grid)
    w*    : (128, 128) bf16  weights with BN scale folded in
    sh_ref: (8, 128)   f32   packed shifts, rows 0..4 = conv, block1..block4
    o_ref : (TM, 128)  bf16
    """
    mean = jnp.dot(a_ref[...], f_ref[...], preferred_element_type=jnp.float32)
    y = mean.astype(jnp.bfloat16)

    def block(y_bf, w_ref, row, relu):
        z = jnp.dot(y_bf, w_ref[...], preferred_element_type=jnp.float32)
        z = z + sh_ref[row:row + 1, :]          # folded bias + BN shift (f32)
        return jnp.maximum(z, 0.0) if relu else z

    y = block(y, wc_ref, 0, True).astype(jnp.bfloat16)   # conv + IIDBatchNorm + act
    y = block(y, w1_ref, 1, True).astype(jnp.bfloat16)
    y = block(y, w2_ref, 2, True).astype(jnp.bfloat16)
    y = block(y, w3_ref, 3, True).astype(jnp.bfloat16)
    y = block(y, w4_ref, 4, False)                        # block4: plain linear
    o_ref[...] = y.astype(o_ref.dtype)


def _global_mlp_kernel(maskn_ref, x_ref, wc_ref, w1_ref, w2_ref, w3_ref, sh_ref, o_ref):
    """Fused global mean pool (mask matmul) + sa4 conv + MLP head + log_softmax."""
    pooled = jnp.dot(maskn_ref[...], x_ref[...], preferred_element_type=jnp.float32)
    y = jnp.dot(pooled.astype(jnp.bfloat16), wc_ref[...],
                preferred_element_type=jnp.float32)
    y = jnp.maximum(y + sh_ref[0:1, :LANE], 0.0)            # sa4 conv + BN + act
    y = jnp.dot(y.astype(jnp.bfloat16), w1_ref[...],
                preferred_element_type=jnp.float32)
    y = jnp.maximum(y + sh_ref[1:2, :D1P], 0.0)             # MLP layer1 + BN + ReLU
    y = jnp.dot(y.astype(jnp.bfloat16), w2_ref[...],
                preferred_element_type=jnp.float32)
    y = jnp.maximum(y + sh_ref[2:3, :D2P], 0.0)             # MLP layer2 + BN + ReLU
    # TODO(synk): dropout skipped (inference semantics).
    y = jnp.dot(y.astype(jnp.bfloat16), w3_ref[...],
                preferred_element_type=jnp.float32)
    y = y + sh_ref[3:4, :D3P]                               # pad classes carry -1e30
    # log_softmax in f32; pad lanes -> exp == 0, no effect on valid classes
    mx = jnp.max(y, axis=-1, keepdims=True)
    z = y - mx
    lse = jnp.log(jnp.sum(jnp.exp(z), axis=-1, keepdims=True))
    o_ref[...] = z - lse


# ------------------------------ kernel wrappers ------------------------------
def _choose_tm(m):
    mp8 = _ceil_to(m, 8)
    if mp8 <= 512:
        return mp8, mp8
    tm = 512
    return tm, _ceil_to(m, tm)


def fused_stage(avg, feats, sp):
    """avg: [M, Nprev] f32 normalized one-hot; feats: [Nprev, 128]."""
    m, n = avg.shape
    np_ = _ceil_to(n, LANE)
    tm, mp = _choose_tm(m)
    a_p = jnp.pad(avg, ((0, mp - m), (0, np_ - n))).astype(jnp.bfloat16)
    f_p = jnp.pad(feats, ((0, np_ - n), (0, 0))).astype(jnp.bfloat16)

    flops = 2 * mp * (np_ * LANE + 5 * LANE * LANE)
    bytes_acc = 2 * (mp * np_ + np_ * LANE + 5 * LANE * LANE + mp * LANE) + 4 * 8 * LANE

    weight_spec = pl.BlockSpec((LANE, LANE), lambda i: (0, 0))
    out = pl.pallas_call(
        _stage_kernel,
        out_shape=jax.ShapeDtypeStruct((mp, LANE), jnp.bfloat16),
        grid_spec=pltpu.PrefetchScalarGridSpec(
            num_scalar_prefetch=0,
            grid=(mp // tm,),
            in_specs=[
                pl.BlockSpec((tm, np_), lambda i: (i, 0)),     # averaging matrix tile
                pl.BlockSpec((np_, LANE), lambda i: (0, 0)),   # feats: VMEM-resident
                weight_spec, weight_spec, weight_spec, weight_spec, weight_spec,
                pl.BlockSpec((8, LANE), lambda i: (0, 0)),     # packed shifts
            ],
            out_specs=pl.BlockSpec((tm, LANE), lambda i: (i, 0)),
        ),
        compiler_params=pltpu.CompilerParams(
            dimension_semantics=("parallel",),
            vmem_limit_bytes=48 * 1024 * 1024,
        ),
        cost_estimate=pl.CostEstimate(flops=flops, transcendentals=0,
                                      bytes_accessed=bytes_acc),
    )(a_p, f_p, sp['wc'], sp['w1'], sp['w2'], sp['w3'], sp['w4'], sp['sh'])
    return out[:m]


def fused_global_mlp(x3, batch3, num_graphs, gp):
    m = x3.shape[0]
    mp = _ceil_to(m, 8)
    mask = (batch3[None, :] == jnp.arange(num_graphs)[:, None]).astype(jnp.float32)
    maskn = mask / jnp.maximum(jnp.sum(mask, axis=1, keepdims=True), 1.0)
    maskn = jnp.pad(maskn, ((0, 0), (0, mp - m))).astype(jnp.bfloat16)
    x3_p = jnp.pad(x3, ((0, mp - m), (0, 0))).astype(jnp.bfloat16)

    b = num_graphs
    flops = 2 * b * (mp * LANE + LANE * LANE + LANE * D1P + D1P * D2P + D2P * D3P)
    bytes_acc = 2 * (b * mp + mp * LANE + LANE * LANE + LANE * D1P + D1P * D2P
                     + D2P * D3P) + 4 * (8 * SH_W + b * D3P)

    out = pl.pallas_call(
        _global_mlp_kernel,
        out_shape=jax.ShapeDtypeStruct((num_graphs, D3P), jnp.float32),
        compiler_params=pltpu.CompilerParams(vmem_limit_bytes=48 * 1024 * 1024),
        cost_estimate=pl.CostEstimate(flops=flops, transcendentals=b * (D3P + 1),
                                      bytes_accessed=bytes_acc),
    )(maskn, x3_p, gp['wc'], gp['w1'], gp['w2'], gp['w3'], gp['sh'])
    return out[:, :MLP_DIMS[3]]


# ------------------------------ glue (plain JAX) ----------------------------
def knn_neighbors(pos_c, batch_c, pos, batch, k):
    # TODO(synk): torch_geometric radius-ball (max_num_neighbors=64) replaced by kNN.
    # Matmul form of pairwise distances: ||a||^2 + ||b||^2 - 2 a.b (MXU, no [M,N,3]).
    cross = pos_c @ pos.T
    d2 = (jnp.sum(pos_c * pos_c, axis=1, keepdims=True)
          + jnp.sum(pos * pos, axis=1)[None, :] - 2.0 * cross)
    same = batch_c[:, None] == batch[None, :]
    d2 = jnp.where(same, d2, jnp.inf)
    # NOTE: assumes every graph has >= K points (true for the test shapes).
    _, idx = jax.lax.top_k(-d2, k)
    return idx  # [M, K]


def neighbor_avg(pos_prev, batch_prev, stride, k):
    """Strided subsample + kNN; returns the normalized one-hot averaging matrix so the
    gather+mean itself runs inside the fused stage kernel as a matmul."""
    sel = jnp.arange(0, pos_prev.shape[0], stride)
    pos_c, batch_c = pos_prev[sel], batch_prev[sel]
    nidx = knn_neighbors(pos_c, batch_c, pos_prev, batch_prev, k)      # [M, K]
    avg = jnp.sum(jax.nn.one_hot(nidx, pos_prev.shape[0], dtype=jnp.float32),
                  axis=1) / float(k)                                   # [M, Nprev]
    return avg, pos_c, batch_c


def model2_forward(P, x, pos, batch, num_graphs):
    x_p = jnp.pad(x, ((0, 0), (0, LANE - x.shape[1])))        # [N, 128], 7 valid lanes

    # stage 1: neighbor mean + sa1 conv + linear1, one fused Pallas call
    a1, pos1, batch1 = neighbor_avg(pos, batch, RATIO_STRIDE, K_NBR)
    x1 = fused_stage(a1, x_p, P['stage1'])                     # [M1, 128], 32 valid

    # stage 2: coords written into the pad lanes right after the valid channels,
    # matching the padded conv-weight row layout (cin = C + 3)
    f1 = x1.at[:, SA_OUT[0]:SA_OUT[0] + 3].set(pos1.astype(x1.dtype))
    a2, pos2, batch2 = neighbor_avg(pos1, batch1, RATIO_STRIDE, K_NBR)
    x2 = fused_stage(a2, f1, P['stage2'])                      # [M2, 128], 48 valid

    # stage 3
    f2 = x2.at[:, SA_OUT[1]:SA_OUT[1] + 3].set(pos2.astype(x2.dtype))
    a3, pos3, batch3 = neighbor_avg(pos2, batch2, RATIO_STRIDE, K_NBR)
    x3 = fused_stage(a3, f2, P['stage3'])                      # [M3, 128], 64 valid

    # global abstraction + MLP head + log_softmax, one fused Pallas call
    return fused_global_mlp(x3, batch3, num_graphs, P['head'])


# ------------------------------ parameter init ------------------------------
def init_linear(key, cin, cout, with_bn=True):
    kw, kb, kg, ke = jax.random.split(key, 4)
    w = jax.random.normal(kw, (cin, cout), jnp.float32) / jnp.sqrt(float(cin))
    b = 0.01 * jax.random.normal(kb, (cout,), jnp.float32)
    if with_bn:
        gamma = 1.0 + 0.1 * jax.random.normal(kg, (cout,), jnp.float32)
        beta = 0.05 * jax.random.normal(ke, (cout,), jnp.float32)
    else:
        gamma = jnp.ones((cout,), jnp.float32)
        beta = jnp.zeros((cout,), jnp.float32)
    return dict(w=w, b=b, gamma=gamma, beta=beta)


def init_linear_layer(key, cin, hid, cout):
    k1, k2, k3, k4 = jax.random.split(key, 4)
    return dict(
        b1=init_linear(k1, cin, hid),
        b2=init_linear(k2, hid, hid),
        b3=init_linear(k3, hid, hid),
        b4=init_linear(k4, hid, cout, with_bn=False),
    )


def init_model_params(key):
    ks = jax.random.split(key, 10)
    p = {}
    p['sa1'] = init_linear(ks[0], C_IN, SA_OUT[0])
    p['lin1'] = init_linear_layer(ks[1], SA_OUT[0], LIN_HID, SA_OUT[0])
    p['sa2'] = init_linear(ks[2], SA_OUT[0] + 3, SA_OUT[1])
    p['lin2'] = init_linear_layer(ks[3], SA_OUT[1], LIN_HID, SA_OUT[1])
    p['sa3'] = init_linear(ks[4], SA_OUT[1] + 3, SA_OUT[2])
    p['lin3'] = init_linear_layer(ks[5], SA_OUT[2], LIN_HID, SA_OUT[2])
    p['sa4'] = init_linear(ks[6], SA_OUT[2], SA4_OUT)
    p['mlp'] = dict(
        l1=init_linear(ks[7], MLP_DIMS[0], MLP_DIMS[1]),
        l2=init_linear(ks[8], MLP_DIMS[1], MLP_DIMS[2]),
        l3=init_linear(ks[9], MLP_DIMS[2], MLP_DIMS[3], with_bn=False),
    )
    return p


def prepare_params(raw):
    """Fold BN scale into W (bf16), bias/shift into a f32 row, zero-pad to 128 lanes,
    and pack each call's shift rows into a single (8, width) operand."""
    def fold(p, cin_p=LANE, cout_p=LANE, shift_fill=0.0):
        w = p['w'] * p['gamma'][None, :]                       # fold BN scale into W
        wp = _pad2(w, cin_p, cout_p).astype(jnp.bfloat16)      # pad cols/rows stay zero
        sh = _pad_row(p['b'] * p['gamma'] + p['beta'], cout_p, shift_fill)  # f32
        return wp, sh

    P = {}
    for sa_k, lin_k, out_k in (('sa1', 'lin1', 'stage1'),
                               ('sa2', 'lin2', 'stage2'),
                               ('sa3', 'lin3', 'stage3')):
        wc, shc = fold(raw[sa_k])
        w1, sh1 = fold(raw[lin_k]['b1'])
        w2, sh2 = fold(raw[lin_k]['b2'])
        w3, sh3 = fold(raw[lin_k]['b3'])
        w4, sh4 = fold(raw[lin_k]['b4'])
        sh = jnp.concatenate([shc, sh1, sh2, sh3, sh4,
                              jnp.zeros((3, LANE), jnp.float32)], axis=0)   # (8, 128)
        P[out_k] = dict(wc=wc, w1=w1, w2=w2, w3=w3, w4=w4, sh=sh)

    wc4, shc4 = fold(raw['sa4'], LANE, LANE)
    wl1, shl1 = fold(raw['mlp']['l1'], LANE, D1P)
    wl2, shl2 = fold(raw['mlp']['l2'], D1P, D2P)
    wl3, shl3 = fold(raw['mlp']['l3'], D2P, D3P, shift_fill=NEG_INF)  # mask pad classes
    shm = jnp.concatenate([_pad_row(shc4[0], SH_W), _pad_row(shl1[0], SH_W),
                           _pad_row(shl2[0], SH_W), _pad_row(shl3[0], SH_W),
                           jnp.zeros((4, SH_W), jnp.float32)], axis=0)      # (8, 640)
    P['head'] = dict(wc=wc4, w1=wl1, w2=wl2, w3=wl3, sh=shm)
    return P


# ----------------------------------- main -----------------------------------
if __name__ == "__main__":
    B, N_PER = 2, 64
    key = jax.random.PRNGKey(0)
    kx, kp, kparam = jax.random.split(key, 3)

    x = jax.random.normal(kx, (B * N_PER, C_IN), jnp.float32)     # point features
    pos = jax.random.normal(kp, (B * N_PER, 3), jnp.float32)      # point coordinates
    batch = jnp.repeat(jnp.arange(B, dtype=jnp.int32), N_PER)     # graph ids

    params = prepare_params(init_model_params(kparam))

    fwd = jax.jit(model2_forward, static_argnames=('num_graphs',))
    log_probs = fwd(params, x, pos, batch, num_graphs=B)
    log_probs = jax.block_until_ready(log_probs)

    assert log_probs.shape == (B, MLP_DIMS[3])
    assert bool(jnp.all(jnp.isfinite(log_probs)))
    # rows of log_softmax must sum (in prob space) to ~1
    assert bool(jnp.allclose(jnp.sum(jnp.exp(log_probs), axis=-1), 1.0, atol=1e-4))
    print("KERNEL_OK")
</pallas_src>

<mosaic_0001>
module attributes {stable_mosaic.version = 11 : i64} {
  func.func @_stage_kernel(%arg0: i32, %arg1: memref<64x128xbf16, #tpu.memory_space<vmem>>, %arg2: memref<128x128xbf16, #tpu.memory_space<vmem>>, %arg3: memref<128x128xbf16, #tpu.memory_space<vmem>>, %arg4: memref<128x128xbf16, #tpu.memory_space<vmem>>, %arg5: memref<128x128xbf16, #tpu.memory_space<vmem>>, %arg6: memref<128x128xbf16, #tpu.memory_space<vmem>>, %arg7: memref<128x128xbf16, #tpu.memory_space<vmem>>, %arg8: memref<8x128xf32, #tpu.memory_space<vmem>>, %arg9: memref<64x128xbf16, #tpu.memory_space<vmem>>) attributes {dimension_semantics = [#tpu.dimension_semantics<parallel>], iteration_bounds = array<i64: 1>, scalar_prefetch = 0 : i64, scratch_operands = 0 : i64, tpu.core_type = #tpu.core_type<tc>, window_params = [{transform_indices = @transform_0, window_bounds = array<i64: 64, 128>}, {pipeline_mode = #tpu.pipeline_mode<synchronous>, transform_indices = @transform_1, window_bounds = array<i64: 128, 128>}, {pipeline_mode = #tpu.pipeline_mode<synchronous>, transform_indices = @transform_2, window_bounds = array<i64: 128, 128>}, {pipeline_mode = #tpu.pipeline_mode<synchronous>, transform_indices = @transform_3, window_bounds = array<i64: 128, 128>}, {pipeline_mode = #tpu.pipeline_mode<synchronous>, transform_indices = @transform_4, window_bounds = array<i64: 128, 128>}, {pipeline_mode = #tpu.pipeline_mode<synchronous>, transform_indices = @transform_5, window_bounds = array<i64: 128, 128>}, {pipeline_mode = #tpu.pipeline_mode<synchronous>, transform_indices = @transform_6, window_bounds = array<i64: 128, 128>}, {pipeline_mode = #tpu.pipeline_mode<synchronous>, transform_indices = @transform_7, window_bounds = array<i64: 8, 128>}, {transform_indices = @transform_8, window_bounds = array<i64: 64, 128>}]} {
    %c0 = arith.constant 0 : index
    %c0_0 = arith.constant 0 : index
    %0 = vector.load %arg1[%c0, %c0_0] : memref<64x128xbf16, #tpu.memory_space<vmem>>, vector<64x128xbf16>
    %c0_1 = arith.constant 0 : index
    %c0_2 = arith.constant 0 : index
    %1 = vector.load %arg2[%c0_1, %c0_2] : memref<128x128xbf16, #tpu.memory_space<vmem>>, vector<128x128xbf16>
    %cst = arith.constant dense<0.000000e+00> : vector<64x128xf32>
    %2 = tpu.matmul %0, %1, %cst {dimension_numbers = #tpu.dot_dimension_numbers<[1], [0], [0], [1], [0, 0, 1, 1], [], []>} : vector<64x128xbf16>, vector<128x128xbf16>, vector<64x128xf32> -> vector<64x128xf32>
    %3 = arith.truncf %2 : vector<64x128xf32> to vector<64x128xbf16>
    %c0_3 = arith.constant 0 : index
    %c0_4 = arith.constant 0 : index
    %4 = vector.load %arg3[%c0_3, %c0_4] : memref<128x128xbf16, #tpu.memory_space<vmem>>, vector<128x128xbf16>
    %cst_5 = arith.constant dense<0.000000e+00> : vector<64x128xf32>
    %5 = tpu.matmul %3, %4, %cst_5 {dimension_numbers = #tpu.dot_dimension_numbers<[1], [0], [0], [1], [0, 0, 1, 1], [], []>} : vector<64x128xbf16>, vector<128x128xbf16>, vector<64x128xf32> -> vector<64x128xf32>
    %c0_6 = arith.constant 0 : index
    %c0_7 = arith.constant 0 : index
    %6 = vector.load %arg8[%c0_6, %c0_7] : memref<8x128xf32, #tpu.memory_space<vmem>>, vector<1x128xf32>
    %7 = vector.broadcast %6 : vector<1x128xf32> to vector<64x128xf32>
    %8 = arith.addf %5, %7 : vector<64x128xf32>
    %cst_8 = arith.constant 0.000000e+00 : f32
    %9 = vector.broadcast %cst_8 : f32 to vector<64x128xf32>
    %10 = arith.maximumf %8, %9 : vector<64x128xf32>
    %11 = arith.truncf %10 : vector<64x128xf32> to vector<64x128xbf16>
    %c0_9 = arith.constant 0 : index
    %c0_10 = arith.constant 0 : index
    %12 = vector.load %arg4[%c0_9, %c0_10] : memref<128x128xbf16, #tpu.memory_space<vmem>>, vector<128x128xbf16>
    %cst_11 = arith.constant dense<0.000000e+00> : vector<64x128xf32>
    %13 = tpu.matmul %11, %12, %cst_11 {dimension_numbers = #tpu.dot_dimension_numbers<[1], [0], [0], [1], [0, 0, 1, 1], [], []>} : vector<64x128xbf16>, vector<128x128xbf16>, vector<64x128xf32> -> vector<64x128xf32>
    %c1 = arith.constant 1 : index
    %c0_12 = arith.constant 0 : index
    %14 = vector.load %arg8[%c1, %c0_12] : memref<8x128xf32, #tpu.memory_space<vmem>>, vector<1x128xf32>
    %15 = vector.broadcast %14 : vector<1x128xf32> to vector<64x128xf32>
    %16 = arith.addf %13, %15 : vector<64x128xf32>
    %cst_13 = arith.constant 0.000000e+00 : f32
    %17 = vector.broadcast %cst_13 : f32 to vector<64x128xf32>
    %18 = arith.maximumf %16, %17 : vector<64x128xf32>
    %19 = arith.truncf %18 : vector<64x128xf32> to vector<64x128xbf16>
    %c0_14 = arith.constant 0 : index
    %c0_15 = arith.constant 0 : index
    %20 = vector.load %arg5[%c0_14, %c0_15] : memref<128x128xbf16, #tpu.memory_space<vmem>>, vector<128x128xbf16>
    %cst_16 = arith.constant dense<0.000000e+00> : vector<64x128xf32>
    %21 = tpu.matmul %19, %20, %cst_16 {dimension_numbers = #tpu.dot_dimension_numbers<[1], [0], [0], [1], [0, 0, 1, 1], [], []>} : vector<64x128xbf16>, vector<128x128xbf16>, vector<64x128xf32> -> vector<64x128xf32>
    %c2 = arith.constant 2 : index
    %c0_17 = arith.constant 0 : index
    %22 = vector.load %arg8[%c2, %c0_17] : memref<8x128xf32, #tpu.memory_space<vmem>>, vector<1x128xf32>
    %23 = vector.broadcast %22 : vector<1x128xf32> to vector<64x128xf32>
    %24 = arith.addf %21, %23 : vector<64x128xf32>
    %cst_18 = arith.constant 0.000000e+00 : f32
    %25 = vector.broadcast %cst_18 : f32 to vector<64x128xf32>
    %26 = arith.maximumf %24, %25 : vector<64x128xf32>
    %27 = arith.truncf %26 : vector<64x128xf32> to vector<64x128xbf16>
    %c0_19 = arith.constant 0 : index
    %c0_20 = arith.constant 0 : index
    %28 = vector.load %arg6[%c0_19, %c0_20] : memref<128x128xbf16, #tpu.memory_space<vmem>>, vector<128x128xbf16>
    %cst_21 = arith.constant dense<0.000000e+00> : vector<64x128xf32>
    %29 = tpu.matmul %27, %28, %cst_21 {dimension_numbers = #tpu.dot_dimension_numbers<[1], [0], [0], [1], [0, 0, 1, 1], [], []>} : vector<64x128xbf16>, vector<128x128xbf16>, vector<64x128xf32> -> vector<64x128xf32>
    %c3 = arith.constant 3 : index
    %c0_22 = arith.constant 0 : index
    %30 = vector.load %arg8[%c3, %c0_22] : memref<8x128xf32, #tpu.memory_space<vmem>>, vector<1x128xf32>
    %31 = vector.broadcast %30 : vector<1x128xf32> to vector<64x128xf32>
    %32 = arith.addf %29, %31 : vector<64x128xf32>
    %cst_23 = arith.constant 0.000000e+00 : f32
    %33 = vector.broadcast %cst_23 : f32 to vector<64x128xf32>
    %34 = arith.maximumf %32, %33 : vector<64x128xf32>
    %35 = arith.truncf %34 : vector<64x128xf32> to vector<64x128xbf16>
    %c0_24 = arith.constant 0 : index
    %c0_25 = arith.constant 0 : index
    %36 = vector.load %arg7[%c0_24, %c0_25] : memref<128x128xbf16, #tpu.memory_space<vmem>>, vector<128x128xbf16>
    %cst_26 = arith.constant dense<0.000000e+00> : vector<64x128xf32>
    %37 = tpu.matmul %35, %36, %cst_26 {dimension_numbers = #tpu.dot_dimension_numbers<[1], [0], [0], [1], [0, 0, 1, 1], [], []>} : vector<64x128xbf16>, vector<128x128xbf16>, vector<64x128xf32> -> vector<64x128xf32>
    %c4 = arith.constant 4 : index
    %c0_27 = arith.constant 0 : index
    %38 = vector.load %arg8[%c4, %c0_27] : memref<8x128xf32, #tpu.memory_space<vmem>>, vector<1x128xf32>
    %39 = vector.broadcast %38 : vector<1x128xf32> to vector<64x128xf32>
    %40 = arith.addf %37, %39 : vector<64x128xf32>
    %41 = arith.truncf %40 : vector<64x128xf32> to vector<64x128xbf16>
    %c0_28 = arith.constant 0 : index
    %c0_29 = arith.constant 0 : index
    %42 = vector.load %arg9[%c0_28, %c0_29] : memref<64x128xbf16, #tpu.memory_space<vmem>>, vector<64x128xbf16>
    tpu.vector_store %arg9[%c0_28, %c0_29], %41 {strides = array<i32>} : memref<64x128xbf16, #tpu.memory_space<vmem>>, vector<64x128xbf16>,
    return
  }
  func.func @transform_0(%arg0: i32) -> (i32, i32) {
    %c0_i32 = arith.constant 0 : i32
    %c0_i32_0 = arith.constant 0 : i32
    return %arg0, %c0_i32 : i32, i32
  }
  func.func @transform_1(%arg0: i32) -> (i32, i32) {
    %c0_i32 = arith.constant 0 : i32
    %c0_i32_0 = arith.constant 0 : i32
    %c0_i32_1 = arith.constant 0 : i32
    return %c0_i32, %c0_i32_0 : i32, i32
  }
  func.func @transform_2(%arg0: i32) -> (i32, i32) {
    %c0_i32 = arith.constant 0 : i32
    %c0_i32_0 = arith.constant 0 : i32
    %c0_i32_1 = arith.constant 0 : i32
    return %c0_i32, %c0_i32_0 : i32, i32
  }
  func.func @transform_3(%arg0: i32) -> (i32, i32) {
    %c0_i32 = arith.constant 0 : i32
    %c0_i32_0 = arith.constant 0 : i32
    %c0_i32_1 = arith.constant 0 : i32
    return %c0_i32, %c0_i32_0 : i32, i32
  }
  func.func @transform_4(%arg0: i32) -> (i32, i32) {
    %c0_i32 = arith.constant 0 : i32
    %c0_i32_0 = arith.constant 0 : i32
    %c0_i32_1 = arith.constant 0 : i32
    return %c0_i32, %c0_i32_0 : i32, i32
  }
  func.func @transform_5(%arg0: i32) -> (i32, i32) {
    %c0_i32 = arith.constant 0 : i32
    %c0_i32_0 = arith.constant 0 : i32
    %c0_i32_1 = arith.constant 0 : i32
    return %c0_i32, %c0_i32_0 : i32, i32
  }
  func.func @transform_6(%arg0: i32) -> (i32, i32) {
    %c0_i32 = arith.constant 0 : i32
    %c0_i32_0 = arith.constant 0 : i32
    %c0_i32_1 = arith.constant 0 : i32
    return %c0_i32, %c0_i32_0 : i32, i32
  }
  func.func @transform_7(%arg0: i32) -> (i32, i32) {
    %c0_i32 = arith.constant 0 : i32
    %c0_i32_0 = arith.constant 0 : i32
    %c0_i32_1 = arith.constant 0 : i32
    return %c0_i32, %c0_i32_0 : i32, i32
  }
  func.func @transform_8(%arg0: i32) -> (i32, i32) {
    %c0_i32 = arith.constant 0 : i32
    %c0_i32_0 = arith.constant 0 : i32
    return %arg0, %c0_i32 : i32, i32
  }
}

module attributes {stable_mosaic.version = 11 : i64} {
  func.func @_stage_kernel(%arg0: i32, %arg1: memref<32x128xbf16, #tpu.memory_space<vmem>>, %arg2: memref<128x128xbf16, #tpu.memory_space<vmem>>, %arg3: memref<128x128xbf16, #tpu.memory_space<vmem>>, %arg4: memref<128x128xbf16, #tpu.memory_space<vmem>>, %arg5: memref<128x128xbf16, #tpu.memory_space<vmem>>, %arg6: memref<128x128xbf16, #tpu.memory_space<vmem>>, %arg7: memref<128x128xbf16, #tpu.memory_space<vmem>>, %arg8: memref<8x128xf32, #tpu.memory_space<vmem>>, %arg9: memref<32x128xbf16, #tpu.memory_space<vmem>>) attributes {dimension_semantics = [#tpu.dimension_semantics<parallel>], iteration_bounds = array<i64: 1>, scalar_prefetch = 0 : i64, scratch_operands = 0 : i64, tpu.core_type = #tpu.core_type<tc>, window_params = [{transform_indices = @transform_0, window_bounds = array<i64: 32, 128>}, {pipeline_mode = #tpu.pipeline_mode<synchronous>, transform_indices = @transform_1, window_bounds = array<i64: 128, 128>}, {pipeline_mode = #tpu.pipeline_mode<synchronous>, transform_indices = @transform_2, window_bounds = array<i64: 128, 128>}, {pipeline_mode = #tpu.pipeline_mode<synchronous>, transform_indices = @transform_3, window_bounds = array<i64: 128, 128>}, {pipeline_mode = #tpu.pipeline_mode<synchronous>, transform_indices = @transform_4, window_bounds = array<i64: 128, 128>}, {pipeline_mode = #tpu.pipeline_mode<synchronous>, transform_indices = @transform_5, window_bounds = array<i64: 128, 128>}, {pipeline_mode = #tpu.pipeline_mode<synchronous>, transform_indices = @transform_6, window_bounds = array<i64: 128, 128>}, {pipeline_mode = #tpu.pipeline_mode<synchronous>, transform_indices = @transform_7, window_bounds = array<i64: 8, 128>}, {transform_indices = @transform_8, window_bounds = array<i64: 32, 128>}]} {
    %c0 = arith.constant 0 : index
    %c0_0 = arith.constant 0 : index
    %0 = vector.load %arg1[%c0, %c0_0] : memref<32x128xbf16, #tpu.memory_space<vmem>>, vector<32x128xbf16>
    %c0_1 = arith.constant 0 : index
    %c0_2 = arith.constant 0 : index
    %1 = vector.load %arg2[%c0_1, %c0_2] : memref<128x128xbf16, #tpu.memory_space<vmem>>, vector<128x128xbf16>
    %cst = arith.constant dense<0.000000e+00> : vector<32x128xf32>
    %2 = tpu.matmul %0, %1, %cst {dimension_numbers = #tpu.dot_dimension_numbers<[1], [0], [0], [1], [0, 0, 1, 1], [], []>} : vector<32x128xbf16>, vector<128x128xbf16>, vector<32x128xf32> -> vector<32x128xf32>
    %3 = arith.truncf %2 : vector<32x128xf32> to vector<32x128xbf16>
    %c0_3 = arith.constant 0 : index
    %c0_4 = arith.constant 0 : index
    %4 = vector.load %arg3[%c0_3, %c0_4] : memref<128x128xbf16, #tpu.memory_space<vmem>>, vector<128x128xbf16>
    %cst_5 = arith.constant dense<0.000000e+00> : vector<32x128xf32>
    %5 = tpu.matmul %3, %4, %cst_5 {dimension_numbers = #tpu.dot_dimension_numbers<[1], [0], [0], [1], [0, 0, 1, 1], [], []>} : vector<32x128xbf16>, vector<128x128xbf16>, vector<32x128xf32> -> vector<32x128xf32>
    %c0_6 = arith.constant 0 : index
    %c0_7 = arith.constant 0 : index
    %6 = vector.load %arg8[%c0_6, %c0_7] : memref<8x128xf32, #tpu.memory_space<vmem>>, vector<1x128xf32>
    %7 = vector.broadcast %6 : vector<1x128xf32> to vector<32x128xf32>
    %8 = arith.addf %5, %7 : vector<32x128xf32>
    %cst_8 = arith.constant 0.000000e+00 : f32
    %9 = vector.broadcast %cst_8 : f32 to vector<32x128xf32>
    %10 = arith.maximumf %8, %9 : vector<32x128xf32>
    %11 = arith.truncf %10 : vector<32x128xf32> to vector<32x128xbf16>
    %c0_9 = arith.constant 0 : index
    %c0_10 = arith.constant 0 : index
    %12 = vector.load %arg4[%c0_9, %c0_10] : memref<128x128xbf16, #tpu.memory_space<vmem>>, vector<128x128xbf16>
    %cst_11 = arith.constant dense<0.000000e+00> : vector<32x128xf32>
    %13 = tpu.matmul %11, %12, %cst_11 {dimension_numbers = #tpu.dot_dimension_numbers<[1], [0], [0], [1], [0, 0, 1, 1], [], []>} : vector<32x128xbf16>, vector<128x128xbf16>, vector<32x128xf32> -> vector<32x128xf32>
    %c1 = arith.constant 1 : index
    %c0_12 = arith.constant 0 : index
    %14 = vector.load %arg8[%c1, %c0_12] : memref<8x128xf32, #tpu.memory_space<vmem>>, vector<1x128xf32>
    %15 = vector.broadcast %14 : vector<1x128xf32> to vector<32x128xf32>
    %16 = arith.addf %13, %15 : vector<32x128xf32>
    %cst_13 = arith.constant 0.000000e+00 : f32
    %17 = vector.broadcast %cst_13 : f32 to vector<32x128xf32>
    %18 = arith.maximumf %16, %17 : vector<32x128xf32>
    %19 = arith.truncf %18 : vector<32x128xf32> to vector<32x128xbf16>
    %c0_14 = arith.constant 0 : index
    %c0_15 = arith.constant 0 : index
    %20 = vector.load %arg5[%c0_14, %c0_15] : memref<128x128xbf16, #tpu.memory_space<vmem>>, vector<128x128xbf16>
    %cst_16 = arith.constant dense<0.000000e+00> : vector<32x128xf32>
    %21 = tpu.matmul %19, %20, %cst_16 {dimension_numbers = #tpu.dot_dimension_numbers<[1], [0], [0], [1], [0, 0, 1, 1], [], []>} : vector<32x128xbf16>, vector<128x128xbf16>, vector<32x128xf32> -> vector<32x128xf32>
    %c2 = arith.constant 2 : index
    %c0_17 = arith.constant 0 : index
    %22 = vector.load %arg8[%c2, %c0_17] : memref<8x128xf32, #tpu.memory_space<vmem>>, vector<1x128xf32>
    %23 = vector.broadcast %22 : vector<1x128xf32> to vector<32x128xf32>
    %24 = arith.addf %21, %23 : vector<32x128xf32>
    %cst_18 = arith.constant 0.000000e+00 : f32
    %25 = vector.broadcast %cst_18 : f32 to vector<32x128xf32>
    %26 = arith.maximumf %24, %25 : vector<32x128xf32>
    %27 = arith.truncf %26 : vector<32x128xf32> to vector<32x128xbf16>
    %c0_19 = arith.constant 0 : index
    %c0_20 = arith.constant 0 : index
    %28 = vector.load %arg6[%c0_19, %c0_20] : memref<128x128xbf16, #tpu.memory_space<vmem>>, vector<128x128xbf16>
    %cst_21 = arith.constant dense<0.000000e+00> : vector<32x128xf32>
    %29 = tpu.matmul %27, %28, %cst_21 {dimension_numbers = #tpu.dot_dimension_numbers<[1], [0], [0], [1], [0, 0, 1, 1], [], []>} : vector<32x128xbf16>, vector<128x128xbf16>, vector<32x128xf32> -> vector<32x128xf32>
    %c3 = arith.constant 3 : index
    %c0_22 = arith.constant 0 : index
    %30 = vector.load %arg8[%c3, %c0_22] : memref<8x128xf32, #tpu.memory_space<vmem>>, vector<1x128xf32>
    %31 = vector.broadcast %30 : vector<1x128xf32> to vector<32x128xf32>
    %32 = arith.addf %29, %31 : vector<32x128xf32>
    %cst_23 = arith.constant 0.000000e+00 : f32
    %33 = vector.broadcast %cst_23 : f32 to vector<32x128xf32>
    %34 = arith.maximumf %32, %33 : vector<32x128xf32>
    %35 = arith.truncf %34 : vector<32x128xf32> to vector<32x128xbf16>
    %c0_24 = arith.constant 0 : index
    %c0_25 = arith.constant 0 : index
    %36 = vector.load %arg7[%c0_24, %c0_25] : memref<128x128xbf16, #tpu.memory_space<vmem>>, vector<128x128xbf16>
    %cst_26 = arith.constant dense<0.000000e+00> : vector<32x128xf32>
    %37 = tpu.matmul %35, %36, %cst_26 {dimension_numbers = #tpu.dot_dimension_numbers<[1], [0], [0], [1], [0, 0, 1, 1], [], []>} : vector<32x128xbf16>, vector<128x128xbf16>, vector<32x128xf32> -> vector<32x128xf32>
    %c4 = arith.constant 4 : index
    %c0_27 = arith.constant 0 : index
    %38 = vector.load %arg8[%c4, %c0_27] : memref<8x128xf32, #tpu.memory_space<vmem>>, vector<1x128xf32>
    %39 = vector.broadcast %38 : vector<1x128xf32> to vector<32x128xf32>
    %40 = arith.addf %37, %39 : vector<32x128xf32>
    %41 = arith.truncf %40 : vector<32x128xf32> to vector<32x128xbf16>
    %c0_28 = arith.constant 0 : index
    %c0_29 = arith.constant 0 : index
    %42 = vector.load %arg9[%c0_28, %c0_29] : memref<32x128xbf16, #tpu.memory_space<vmem>>, vector<32x128xbf16>
    tpu.vector_store %arg9[%c0_28, %c0_29], %41 {strides = array<i32>} : memref<32x128xbf16, #tpu.memory_space<vmem>>, vector<32x128xbf16>,
    return
  }
  func.func @transform_0(%arg0: i32) -> (i32, i32) {
    %c0_i32 = arith.constant 0 : i32
    %c0_i32_0 = arith.constant 0 : i32
    return %arg0, %c0_i32 : i32, i32
  }
  func.func @transform_1(%arg0: i32) -> (i32, i32) {
    %c0_i32 = arith.constant 0 : i32
    %c0_i32_0 = arith.constant 0 : i32
    %c0_i32_1 = arith.constant 0 : i32
    return %c0_i32, %c0_i32_0 : i32, i32
  }
  func.func @transform_2(%arg0: i32) -> (i32, i32) {
    %c0_i32 = arith.constant 0 : i32
    %c0_i32_0 = arith.constant 0 : i32
    %c0_i32_1 = arith.constant 0 : i32
    return %c0_i32, %c0_i32_0 : i32, i32
  }
  func.func @transform_3(%arg0: i32) -> (i32, i32) {
    %c0_i32 = arith.constant 0 : i32
    %c0_i32_0 = arith.constant 0 : i32
    %c0_i32_1 = arith.constant 0 : i32
    return %c0_i32, %c0_i32_0 : i32, i32
  }
  func.func @transform_4(%arg0: i32) -> (i32, i32) {
    %c0_i32 = arith.constant 0 : i32
    %c0_i32_0 = arith.constant 0 : i32
    %c0_i32_1 = arith.constant 0 : i32
    return %c0_i32, %c0_i32_0 : i32, i32
  }
  func.func @transform_5(%arg0: i32) -> (i32, i32) {
    %c0_i32 = arith.constant 0 : i32
    %c0_i32_0 = arith.constant 0 : i32
    %c0_i32_1 = arith.constant 0 : i32
    return %c0_i32, %c0_i32_0 : i32, i32
  }
  func.func @transform_6(%arg0: i32) -> (i32, i32) {
    %c0_i32 = arith.constant 0 : i32
    %c0_i32_0 = arith.constant 0 : i32
    %c0_i32_1 = arith.constant 0 : i32
    return %c0_i32, %c0_i32_0 : i32, i32
  }
  func.func @transform_7(%arg0: i32) -> (i32, i32) {
    %c0_i32 = arith.constant 0 : i32
    %c0_i32_0 = arith.constant 0 : i32
    %c0_i32_1 = arith.constant 0 : i32
    return %c0_i32, %c0_i32_0 : i32, i32
  }
  func.func @transform_8(%arg0: i32) -> (i32, i32) {
    %c0_i32 = arith.constant 0 : i32
    %c0_i32_0 = arith.constant 0 : i32
    return %arg0, %c0_i32 : i32, i32
  }
}

module attributes {stable_mosaic.version = 11 : i64} {
  func.func @_global_mlp_kernel(%arg0: memref<2x16xbf16, #tpu.memory_space<vmem>>, %arg1: memref<16x128xbf16, #tpu.memory_space<vmem>>, %arg2: memref<128x128xbf16, #tpu.memory_space<vmem>>, %arg3: memref<128x384xbf16, #tpu.memory_space<vmem>>, %arg4: memref<384x640xbf16, #tpu.memory_space<vmem>>, %arg5: memref<640x128xbf16, #tpu.memory_space<vmem>>, %arg6: memref<8x640xf32, #tpu.memory_space<vmem>>, %arg7: memref<2x128xf32, #tpu.memory_space<vmem>>) attributes {dimension_semantics = [], scalar_prefetch = 0 : i64, scratch_operands = 0 : i64, tpu.core_type = #tpu.core_type<tc>} {
    %c0 = arith.constant 0 : index
    %c0_0 = arith.constant 0 : index
    %0 = vector.load %arg0[%c0, %c0_0] : memref<2x16xbf16, #tpu.memory_space<vmem>>, vector<2x16xbf16>
    %c0_1 = arith.constant 0 : index
    %c0_2 = arith.constant 0 : index
    %1 = vector.load %arg1[%c0_1, %c0_2] : memref<16x128xbf16, #tpu.memory_space<vmem>>, vector<16x128xbf16>
    %cst = arith.constant dense<0.000000e+00> : vector<2x128xf32>
    %2 = tpu.matmul %0, %1, %cst {dimension_numbers = #tpu.dot_dimension_numbers<[1], [0], [0], [1], [0, 0, 1, 1], [], []>} : vector<2x16xbf16>, vector<16x128xbf16>, vector<2x128xf32> -> vector<2x128xf32>
    %3 = arith.truncf %2 : vector<2x128xf32> to vector<2x128xbf16>
    %c0_3 = arith.constant 0 : index
    %c0_4 = arith.constant 0 : index
    %4 = vector.load %arg2[%c0_3, %c0_4] : memref<128x128xbf16, #tpu.memory_space<vmem>>, vector<128x128xbf16>
    %cst_5 = arith.constant dense<0.000000e+00> : vector<2x128xf32>
    %5 = tpu.matmul %3, %4, %cst_5 {dimension_numbers = #tpu.dot_dimension_numbers<[1], [0], [0], [1], [0, 0, 1, 1], [], []>} : vector<2x128xbf16>, vector<128x128xbf16>, vector<2x128xf32> -> vector<2x128xf32>
    %c0_6 = arith.constant 0 : index
    %c0_7 = arith.constant 0 : index
    %6 = vector.load %arg6[%c0_6, %c0_7] : memref<8x640xf32, #tpu.memory_space<vmem>>, vector<1x128xf32>
    %7 = vector.broadcast %6 : vector<1x128xf32> to vector<2x128xf32>
    %8 = arith.addf %5, %7 : vector<2x128xf32>
    %cst_8 = arith.constant 0.000000e+00 : f32
    %9 = vector.broadcast %cst_8 : f32 to vector<2x128xf32>
    %10 = arith.maximumf %8, %9 : vector<2x128xf32>
    %11 = arith.truncf %10 : vector<2x128xf32> to vector<2x128xbf16>
    %c0_9 = arith.constant 0 : index
    %c0_10 = arith.constant 0 : index
    %12 = vector.load %arg3[%c0_9, %c0_10] : memref<128x384xbf16, #tpu.memory_space<vmem>>, vector<128x384xbf16>
    %cst_11 = arith.constant dense<0.000000e+00> : vector<2x384xf32>
    %13 = tpu.matmul %11, %12, %cst_11 {dimension_numbers = #tpu.dot_dimension_numbers<[1], [0], [0], [1], [0, 0, 1, 1], [], []>} : vector<2x128xbf16>, vector<128x384xbf16>, vector<2x384xf32> -> vector<2x384xf32>
    %c1 = arith.constant 1 : index
    %c0_12 = arith.constant 0 : index
    %14 = vector.load %arg6[%c1, %c0_12] : memref<8x640xf32, #tpu.memory_space<vmem>>, vector<1x384xf32>
    %15 = vector.broadcast %14 : vector<1x384xf32> to vector<2x384xf32>
    %16 = arith.addf %13, %15 : vector<2x384xf32>
    %cst_13 = arith.constant 0.000000e+00 : f32
    %17 = vector.broadcast %cst_13 : f32 to vector<2x384xf32>
    %18 = arith.maximumf %16, %17 : vector<2x384xf32>
    %19 = arith.truncf %18 : vector<2x384xf32> to vector<2x384xbf16>
    %c0_14 = arith.constant 0 : index
    %c0_15 = arith.constant 0 : index
    %20 = vector.load %arg4[%c0_14, %c0_15] : memref<384x640xbf16, #tpu.memory_space<vmem>>, vector<384x640xbf16>
    %cst_16 = arith.constant dense<0.000000e+00> : vector<2x640xf32>
    %21 = tpu.matmul %19, %20, %cst_16 {dimension_numbers = #tpu.dot_dimension_numbers<[1], [0], [0], [1], [0, 0, 1, 1], [], []>} : vector<2x384xbf16>, vector<384x640xbf16>, vector<2x640xf32> -> vector<2x640xf32>
    %c2 = arith.constant 2 : index
    %c0_17 = arith.constant 0 : index
    %22 = vector.load %arg6[%c2, %c0_17] : memref<8x640xf32, #tpu.memory_space<vmem>>, vector<1x640xf32>
    %23 = vector.broadcast %22 : vector<1x640xf32> to vector<2x640xf32>
    %24 = arith.addf %21, %23 : vector<2x640xf32>
    %cst_18 = arith.constant 0.000000e+00 : f32
    %25 = vector.broadcast %cst_18 : f32 to vector<2x640xf32>
    %26 = arith.maximumf %24, %25 : vector<2x640xf32>
    %27 = arith.truncf %26 : vector<2x640xf32> to vector<2x640xbf16>
    %c0_19 = arith.constant 0 : index
    %c0_20 = arith.constant 0 : index
    %28 = vector.load %arg5[%c0_19, %c0_20] : memref<640x128xbf16, #tpu.memory_space<vmem>>, vector<640x128xbf16>
    %cst_21 = arith.constant dense<0.000000e+00> : vector<2x128xf32>
    %29 = tpu.matmul %27, %28, %cst_21 {dimension_numbers = #tpu.dot_dimension_numbers<[1], [0], [0], [1], [0, 0, 1, 1], [], []>} : vector<2x640xbf16>, vector<640x128xbf16>, vector<2x128xf32> -> vector<2x128xf32>
    %c3 = arith.constant 3 : index
    %c0_22 = arith.constant 0 : index
    %30 = vector.load %arg6[%c3, %c0_22] : memref<8x640xf32, #tpu.memory_space<vmem>>, vector<1x128xf32>
    %31 = vector.broadcast %30 : vector<1x128xf32> to vector<2x128xf32>
    %32 = arith.addf %29, %31 : vector<2x128xf32>
    %cst_23 = arith.constant dense<0xFF800000> : vector<2xf32>
    %33 = vector.multi_reduction <maximumf>, %32, %cst_23 [1] : vector<2x128xf32> to vector<2xf32>
    %34 = vector.shape_cast %33 : vector<2xf32> to vector<2x1xf32>
    %35 = vector.broadcast %34 : vector<2x1xf32> to vector<2x128xf32>
    %36 = arith.subf %32, %35 : vector<2x128xf32>
    %37 = math.exp %36 : vector<2x128xf32>
    %cst_24 = arith.constant dense<0.000000e+00> : vector<2xf32>
    %38 = vector.multi_reduction <add>, %37, %cst_24 [1] : vector<2x128xf32> to vector<2xf32>
    %39 = vector.shape_cast %38 : vector<2xf32> to vector<2x1xf32>
    %40 = math.log %39 : vector<2x1xf32>
    %41 = vector.broadcast %40 : vector<2x1xf32> to vector<2x128xf32>
    %42 = arith.subf %36, %41 : vector<2x128xf32>
    %c0_25 = arith.constant 0 : index
    %c0_26 = arith.constant 0 : index
    %43 = vector.load %arg7[%c0_25, %c0_26] : memref<2x128xf32, #tpu.memory_space<vmem>>, vector<2x128xf32>
    tpu.vector_store %arg7[%c0_25, %c0_26], %42 {strides = array<i32>} : memref<2x128xf32, #tpu.memory_space<vmem>>, vector<2x128xf32>,
    return
  }
}

module attributes {stable_mosaic.version = 11 : i64} {
  func.func @_stage_kernel(%arg0: i32, %arg1: memref<16x128xbf16, #tpu.memory_space<vmem>>, %arg2: memref<128x128xbf16, #tpu.memory_space<vmem>>, %arg3: memref<128x128xbf16, #tpu.memory_space<vmem>>, %arg4: memref<128x128xbf16, #tpu.memory_space<vmem>>, %arg5: memref<128x128xbf16, #tpu.memory_space<vmem>>, %arg6: memref<128x128xbf16, #tpu.memory_space<vmem>>, %arg7: memref<128x128xbf16, #tpu.memory_space<vmem>>, %arg8: memref<8x128xf32, #tpu.memory_space<vmem>>, %arg9: memref<16x128xbf16, #tpu.memory_space<vmem>>) attributes {dimension_semantics = [#tpu.dimension_semantics<parallel>], iteration_bounds = array<i64: 1>, scalar_prefetch = 0 : i64, scratch_operands = 0 : i64, tpu.core_type = #tpu.core_type<tc>, window_params = [{transform_indices = @transform_0, window_bounds = array<i64: 16, 128>}, {pipeline_mode = #tpu.pipeline_mode<synchronous>, transform_indices = @transform_1, window_bounds = array<i64: 128, 128>}, {pipeline_mode = #tpu.pipeline_mode<synchronous>, transform_indices = @transform_2, window_bounds = array<i64: 128, 128>}, {pipeline_mode = #tpu.pipeline_mode<synchronous>, transform_indices = @transform_3, window_bounds = array<i64: 128, 128>}, {pipeline_mode = #tpu.pipeline_mode<synchronous>, transform_indices = @transform_4, window_bounds = array<i64: 128, 128>}, {pipeline_mode = #tpu.pipeline_mode<synchronous>, transform_indices = @transform_5, window_bounds = array<i64: 128, 128>}, {pipeline_mode = #tpu.pipeline_mode<synchronous>, transform_indices = @transform_6, window_bounds = array<i64: 128, 128>}, {pipeline_mode = #tpu.pipeline_mode<synchronous>, transform_indices = @transform_7, window_bounds = array<i64: 8, 128>}, {transform_indices = @transform_8, window_bounds = array<i64: 16, 128>}]} {
    %c0 = arith.constant 0 : index
    %c0_0 = arith.constant 0 : index
    %0 = vector.load %arg1[%c0, %c0_0] : memref<16x128xbf16, #tpu.memory_space<vmem>>, vector<16x128xbf16>
    %c0_1 = arith.constant 0 : index
    %c0_2 = arith.constant 0 : index
    %1 = vector.load %arg2[%c0_1, %c0_2] : memref<128x128xbf16, #tpu.memory_space<vmem>>, vector<128x128xbf16>
    %cst = arith.constant dense<0.000000e+00> : vector<16x128xf32>
    %2 = tpu.matmul %0, %1, %cst {dimension_numbers = #tpu.dot_dimension_numbers<[1], [0], [0], [1], [0, 0, 1, 1], [], []>} : vector<16x128xbf16>, vector<128x128xbf16>, vector<16x128xf32> -> vector<16x128xf32>
    %3 = arith.truncf %2 : vector<16x128xf32> to vector<16x128xbf16>
    %c0_3 = arith.constant 0 : index
    %c0_4 = arith.constant 0 : index
    %4 = vector.load %arg3[%c0_3, %c0_4] : memref<128x128xbf16, #tpu.memory_space<vmem>>, vector<128x128xbf16>
    %cst_5 = arith.constant dense<0.000000e+00> : vector<16x128xf32>
    %5 = tpu.matmul %3, %4, %cst_5 {dimension_numbers = #tpu.dot_dimension_numbers<[1], [0], [0], [1], [0, 0, 1, 1], [], []>} : vector<16x128xbf16>, vector<128x128xbf16>, vector<16x128xf32> -> vector<16x128xf32>
    %c0_6 = arith.constant 0 : index
    %c0_7 = arith.constant 0 : index
    %6 = vector.load %arg8[%c0_6, %c0_7] : memref<8x128xf32, #tpu.memory_space<vmem>>, vector<1x128xf32>
    %7 = vector.broadcast %6 : vector<1x128xf32> to vector<16x128xf32>
    %8 = arith.addf %5, %7 : vector<16x128xf32>
    %cst_8 = arith.constant 0.000000e+00 : f32
    %9 = vector.broadcast %cst_8 : f32 to vector<16x128xf32>
    %10 = arith.maximumf %8, %9 : vector<16x128xf32>
    %11 = arith.truncf %10 : vector<16x128xf32> to vector<16x128xbf16>
    %c0_9 = arith.constant 0 : index
    %c0_10 = arith.constant 0 : index
    %12 = vector.load %arg4[%c0_9, %c0_10] : memref<128x128xbf16, #tpu.memory_space<vmem>>, vector<128x128xbf16>
    %cst_11 = arith.constant dense<0.000000e+00> : vector<16x128xf32>
    %13 = tpu.matmul %11, %12, %cst_11 {dimension_numbers = #tpu.dot_dimension_numbers<[1], [0], [0], [1], [0, 0, 1, 1], [], []>} : vector<16x128xbf16>, vector<128x128xbf16>, vector<16x128xf32> -> vector<16x128xf32>
    %c1 = arith.constant 1 : index
    %c0_12 = arith.constant 0 : index
    %14 = vector.load %arg8[%c1, %c0_12] : memref<8x128xf32, #tpu.memory_space<vmem>>, vector<1x128xf32>
    %15 = vector.broadcast %14 : vector<1x128xf32> to vector<16x128xf32>
    %16 = arith.addf %13, %15 : vector<16x128xf32>
    %cst_13 = arith.constant 0.000000e+00 : f32
    %17 = vector.broadcast %cst_13 : f32 to vector<16x128xf32>
    %18 = arith.maximumf %16, %17 : vector<16x128xf32>
    %19 = arith.truncf %18 : vector<16x128xf32> to vector<16x128xbf16>
    %c0_14 = arith.constant 0 : index
    %c0_15 = arith.constant 0 : index
    %20 = vector.load %arg5[%c0_14, %c0_15] : memref<128x128xbf16, #tpu.memory_space<vmem>>, vector<128x128xbf16>
    %cst_16 = arith.constant dense<0.000000e+00> : vector<16x128xf32>
    %21 = tpu.matmul %19, %20, %cst_16 {dimension_numbers = #tpu.dot_dimension_numbers<[1], [0], [0], [1], [0, 0, 1, 1], [], []>} : vector<16x128xbf16>, vector<128x128xbf16>, vector<16x128xf32> -> vector<16x128xf32>
    %c2 = arith.constant 2 : index
    %c0_17 = arith.constant 0 : index
    %22 = vector.load %arg8[%c2, %c0_17] : memref<8x128xf32, #tpu.memory_space<vmem>>, vector<1x128xf32>
    %23 = vector.broadcast %22 : vector<1x128xf32> to vector<16x128xf32>
    %24 = arith.addf %21, %23 : vector<16x128xf32>
    %cst_18 = arith.constant 0.000000e+00 : f32
    %25 = vector.broadcast %cst_18 : f32 to vector<16x128xf32>
    %26 = arith.maximumf %24, %25 : vector<16x128xf32>
    %27 = arith.truncf %26 : vector<16x128xf32> to vector<16x128xbf16>
    %c0_19 = arith.constant 0 : index
    %c0_20 = arith.constant 0 : index
    %28 = vector.load %arg6[%c0_19, %c0_20] : memref<128x128xbf16, #tpu.memory_space<vmem>>, vector<128x128xbf16>
    %cst_21 = arith.constant dense<0.000000e+00> : vector<16x128xf32>
    %29 = tpu.matmul %27, %28, %cst_21 {dimension_numbers = #tpu.dot_dimension_numbers<[1], [0], [0], [1], [0, 0, 1, 1], [], []>} : vector<16x128xbf16>, vector<128x128xbf16>, vector<16x128xf32> -> vector<16x128xf32>
    %c3 = arith.constant 3 : index
    %c0_22 = arith.constant 0 : index
    %30 = vector.load %arg8[%c3, %c0_22] : memref<8x128xf32, #tpu.memory_space<vmem>>, vector<1x128xf32>
    %31 = vector.broadcast %30 : vector<1x128xf32> to vector<16x128xf32>
    %32 = arith.addf %29, %31 : vector<16x128xf32>
    %cst_23 = arith.constant 0.000000e+00 : f32
    %33 = vector.broadcast %cst_23 : f32 to vector<16x128xf32>
    %34 = arith.maximumf %32, %33 : vector<16x128xf32>
    %35 = arith.truncf %34 : vector<16x128xf32> to vector<16x128xbf16>
    %c0_24 = arith.constant 0 : index
    %c0_25 = arith.constant 0 : index
    %36 = vector.load %arg7[%c0_24, %c0_25] : memref<128x128xbf16, #tpu.memory_space<vmem>>, vector<128x128xbf16>
    %cst_26 = arith.constant dense<0.000000e+00> : vector<16x128xf32>
    %37 = tpu.matmul %35, %36, %cst_26 {dimension_numbers = #tpu.dot_dimension_numbers<[1], [0], [0], [1], [0, 0, 1, 1], [], []>} : vector<16x128xbf16>, vector<128x128xbf16>, vector<16x128xf32> -> vector<16x128xf32>
    %c4 = arith.constant 4 : index
    %c0_27 = arith.constant 0 : index
    %38 = vector.load %arg8[%c4, %c0_27] : memref<8x128xf32, #tpu.memory_space<vmem>>, vector<1x128xf32>
    %39 = vector.broadcast %38 : vector<1x128xf32> to vector<16x128xf32>
    %40 = arith.addf %37, %39 : vector<16x128xf32>
    %41 = arith.truncf %40 : vector<16x128xf32> to vector<16x128xbf16>
    %c0_28 = arith.constant 0 : index
    %c0_29 = arith.constant 0 : index
    %42 = vector.load %arg9[%c0_28, %c0_29] : memref<16x128xbf16, #tpu.memory_space<vmem>>, vector<16x128xbf16>
    tpu.vector_store %arg9[%c0_28, %c0_29], %41 {strides = array<i32>} : memref<16x128xbf16, #tpu.memory_space<vmem>>, vector<16x128xbf16>,
    return
  }
  func.func @transform_0(%arg0: i32) -> (i32, i32) {
    %c0_i32 = arith.constant 0 : i32
    %c0_i32_0 = arith.constant 0 : i32
    return %arg0, %c0_i32 : i32, i32
  }
  func.func @transform_1(%arg0: i32) -> (i32, i32) {
    %c0_i32 = arith.constant 0 : i32
    %c0_i32_0 = arith.constant 0 : i32
    %c0_i32_1 = arith.constant 0 : i32
    return %c0_i32, %c0_i32_0 : i32, i32
  }
  func.func @transform_2(%arg0: i32) -> (i32, i32) {
    %c0_i32 = arith.constant 0 : i32
    %c0_i32_0 = arith.constant 0 : i32
    %c0_i32_1 = arith.constant 0 : i32
    return %c0_i32, %c0_i32_0 : i32, i32
  }
  func.func @transform_3(%arg0: i32) -> (i32, i32) {
    %c0_i32 = arith.constant 0 : i32
    %c0_i32_0 = arith.constant 0 : i32
    %c0_i32_1 = arith.constant 0 : i32
    return %c0_i32, %c0_i32_0 : i32, i32
  }
  func.func @transform_4(%arg0: i32) -> (i32, i32) {
    %c0_i32 = arith.constant 0 : i32
    %c0_i32_0 = arith.constant 0 : i32
    %c0_i32_1 = arith.constant 0 : i32
    return %c0_i32, %c0_i32_0 : i32, i32
  }
  func.func @transform_5(%arg0: i32) -> (i32, i32) {
    %c0_i32 = arith.constant 0 : i32
    %c0_i32_0 = arith.constant 0 : i32
    %c0_i32_1 = arith.constant 0 : i32
    return %c0_i32, %c0_i32_0 : i32, i32
  }
  func.func @transform_6(%arg0: i32) -> (i32, i32) {
    %c0_i32 = arith.constant 0 : i32
    %c0_i32_0 = arith.constant 0 : i32
    %c0_i32_1 = arith.constant 0 : i32
    return %c0_i32, %c0_i32_0 : i32, i32
  }
  func.func @transform_7(%arg0: i32) -> (i32, i32) {
    %c0_i32 = arith.constant 0 : i32
    %c0_i32_0 = arith.constant 0 : i32
    %c0_i32_1 = arith.constant 0 : i32
    return %c0_i32, %c0_i32_0 : i32, i32
  }
  func.func @transform_8(%arg0: i32) -> (i32, i32) {
    %c0_i32 = arith.constant 0 : i32
    %c0_i32_0 = arith.constant 0 : i32
    return %arg0, %c0_i32 : i32, i32
  }
}

</mosaic_0001>

<bundles_post_ra>
// kernel: model2_forward.4
= control target key start
LH: loop header
LB: loop body
LE: loop exit
PB: predicated region body
PF: predicated region fallthrough
CT: control target
= control target key end

     0   :  { %s1549_s1 = inlined_call_operand.vmem [shape: bf16[128,128], index: 1, kind: input, shape index: {}]   ;;  %s1550_s0 = inlined_call_operand.vmem [shape: bf16[64,128], index: 0, kind: input, shape index: {}]   ;;  %s1551_s2 = inlined_call_operand.vmem [shape: bf16[128,128], index: 2, kind: input, shape index: {}]   ;;  %s1552_s3 = inlined_call_operand.vmem [shape: bf16[128,128], index: 3, kind: input, shape index: {}]   ;;  %s1553_s4 = inlined_call_operand.vmem [shape: bf16[128,128], index: 4, kind: input, shape index: {}]   ;;  %s1554_s7 = inlined_call_operand.vmem [shape: f32[8,128], index: 7, kind: input, shape index: {}]   ;;  %s1555_s5 = inlined_call_operand.vmem [shape: bf16[128,128], index: 5, kind: input, shape index: {}]   ;;  %s1556_s6 = inlined_call_operand.vmem [shape: bf16[128,128], index: 6, kind: input, shape index: {}]   ;;  %s1557_s8 = inlined_call_operand.vmem [shape: bf16[64,128], index: 8, kind: output, shape index: {}]  }
   0x1   :  { %v1269_v0 = vld [vmem:[%s1549_s1] sm:$0xff]   ;;  %v1270_v1 = vld [vmem:[%s1549_s1 + $0x8] sm:$0xff]   ;;  %v1271_v2 = vld [vmem:[%s1549_s1 + $0x10] sm:$0xff]  }
   0x2   :  { %1125 = vmatprep.subr.bf16.mxu0 %v1269_v0  ;;  %v1272_v3 = vld [vmem:[%s1549_s1 + $0x18] sm:$0xff]   ;;  %v1277_v4 = vld [vmem:[%s1550_s0] sm:$0xff]   ;;  %v1282_v7 = vld [vmem:[%s1551_s2 + $0x8] sm:$0xff]  }
   0x3   :  { %1126 = vmatpush3.bf16.msra.mxu0 %v1269_v0  ;;  %1141 = vmatprep.mubr.bf16.mxu0 %v1277_v4  ;;  %v1273_v5 = vld [vmem:[%s1549_s1 + $0x20] sm:$0xff]   ;;  %v1274_v8 = vld [vmem:[%s1549_s1 + $0x28] sm:$0xff]   ;;  %v1283_v9 = vld [vmem:[%s1551_s2 + $0x10] sm:$0xff]  }
   0x4   :  { %1127 = vmatprep.subr.bf16.mxu0 %v1270_v1  ;;  %v1281_v6 = vld [vmem:[%s1551_s2] sm:$0xff]   ;;  %v1275_v10 = vld [vmem:[%s1549_s1 + $0x30] sm:$0xff]   ;;  %v1284_v11 = vld [vmem:[%s1551_s2 + $0x18] sm:$0xff]  }
   0x5   :  { %1149 = vmatprep.subr.bf16.mxu1 %v1281_v6  ;;  %v1276_v12 = vld [vmem:[%s1549_s1 + $0x38] sm:$0xff]   ;;  %v1285_v13 = vld [vmem:[%s1551_s2 + $0x20] sm:$0xff]   ;;  %v1286_v14 = vld [vmem:[%s1551_s2 + $0x28] sm:$0xff]  }
   0x6   :  { %1150 = vmatpush3.bf16.msra.mxu1 %v1281_v6  ;;  %v1278_v15 = vld [vmem:[%s1550_s0 + $0x8] sm:$0xff]   ;;  %v1279_v16 = vld [vmem:[%s1550_s0 + $0x10] sm:$0xff]   ;;  %v1280_v18 = vld [vmem:[%s1550_s0 + $0x18] sm:$0xff]  }
   0x7   :  { %1128 = vmatpush3.bf16.msra.mxu0 %v1270_v1  ;;  %1151 = vmatprep.subr.bf16.mxu1 %v1282_v7  ;;  %v1287_v17 = vld [vmem:[%s1551_s2 + $0x30] sm:$0xff]   ;;  %v1288_v19 = vld [vmem:[%s1551_s2 + $0x38] sm:$0xff]   ;;  %v1289_v20 = vld [vmem:[%s1552_s3] sm:$0xff]  }
   0x8   :  { %1129 = vmatprep.subr.bf16.mxu0 %v1271_v2  ;;  %v1290_v21 = vld [vmem:[%s1552_s3 + $0x8] sm:$0xff]   ;;  %v1291_v22 = vld [vmem:[%s1552_s3 + $0x10] sm:$0xff]   ;;  %v1292_v23 = vld [vmem:[%s1552_s3 + $0x18] sm:$0xff]  }
   0x9   :  { %v1293_v24 = vld [vmem:[%s1552_s3 + $0x20] sm:$0xff]   ;;  %v1294_v25 = vld [vmem:[%s1552_s3 + $0x28] sm:$0xff]   ;;  %v1295_v38 = vld [vmem:[%s1552_s3 + $0x30] sm:$0xff]  }
   0xa   :  { %1152 = vmatpush3.bf16.msra.mxu1 %v1282_v7  ;;  %v1296_v39 = vld [vmem:[%s1552_s3 + $0x38] sm:$0xff]   ;;  %v1297_v40 = vld [vmem:[%s1553_s4] sm:$0xff]   ;;  %v1298_v41 = vld [vmem:[%s1553_s4 + $0x8] sm:$0xff]  }
   0xb   :  { %1130 = vmatpush3.bf16.msra.mxu0 %v1271_v2  ;;  %1153 = vmatprep.subr.bf16.mxu1 %v1283_v9  ;;  %v1299_v42 = vld [vmem:[%s1553_s4 + $0x10] sm:$0xff]   ;;  %v1300_v43 = vld [vmem:[%s1553_s4 + $0x18] sm:$0xff]   ;;  %v1301_v44 = vld [vmem:[%s1553_s4 + $0x20] sm:$0xff]  }
   0xc   :  { %1131 = vmatprep.subr.bf16.mxu0 %v1272_v3  ;;  %v1302_v45 = vld [vmem:[%s1553_s4 + $0x28] sm:$0xff]   ;;  %v969_v46 = vld [vmem:[%s1554_s7] ss:$0 sm:$0xff] }
   0xe   :  { %1154 = vmatpush3.bf16.msra.mxu1 %v1283_v9 }
   0xf   :  { %1132 = vmatpush3.bf16.msra.mxu0 %v1272_v3  ;;  %1155 = vmatprep.subr.bf16.mxu1 %v1284_v11 }
  0x10   :  { %1133 = vmatprep.subr.bf16.mxu0 %v1273_v5 }
  0x12   :  { %1156 = vmatpush3.bf16.msra.mxu1 %v1284_v11  ;;  %v1303_v11 = vld [vmem:[%s1553_s4 + $0x30] sm:$0xff]  }
  0x13   :  { %1134 = vmatpush3.bf16.msra.mxu0 %v1273_v5  ;;  %1157 = vmatprep.subr.bf16.mxu1 %v1285_v13 }
  0x14   :  { %1135 = vmatprep.subr.bf16.mxu0 %v1274_v8 }
  0x16   :  { %1158 = vmatpush3.bf16.msra.mxu1 %v1285_v13  ;;  %v1305_v13 = vld [vmem:[%s1555_s5] sm:$0xff]  }
  0x17   :  { %1136 = vmatpush3.bf16.msra.mxu0 %v1274_v8  ;;  %1159 = vmatprep.subr.bf16.mxu1 %v1286_v14 }
  0x18   :  { %1137 = vmatprep.subr.bf16.mxu0 %v1275_v10 }
  0x1a   :  { %1160 = vmatpush3.bf16.msra.mxu1 %v1286_v14  ;;  %v1306_v14 = vld [vmem:[%s1555_s5 + $0x8] sm:$0xff]  }
  0x1b   :  { %1138 = vmatpush3.bf16.msra.mxu0 %v1275_v10  ;;  %1161 = vmatprep.subr.bf16.mxu1 %v1287_v17 }
  0x1c   :  { %1139 = vmatprep.subr.bf16.mxu0 %v1276_v12 }
  0x1e   :  { %1162 = vmatpush3.bf16.msra.mxu1 %v1287_v17  ;;  %v1309_v17 = vld [vmem:[%s1555_s5 + $0x20] sm:$0xff]  }
  0x1f   :  { %1140 = vmatpush3.bf16.msra.mxu0 %v1276_v12  ;;  %1163 = vmatprep.subr.bf16.mxu1 %v1288_v19  ;;  %v1304_v12 = vld [vmem:[%s1553_s4 + $0x38] sm:$0xff]  }
  0x20   :  { %1173 = vmatprep.subr.bf16.mxu0 %v1289_v20 }
  0x22   :  { %1142 = vmatmul.mubr.bf16.vlgmr.msra.gmra.mrb[0].mxu0 %v1278_v15  ;;  %1164 = vmatpush3.bf16.msra.mxu1 %v1288_v19  ;;  %v1307_v15 = vld [vmem:[%s1555_s5 + $0x10] sm:$0xff]   ;;  %v978_v19 = vld [vmem:[%s1554_s7 + $0x1] ss:$0 sm:$0xff] }
  0x23   :  { %1145 = vmatprep.mubr.bf16.mxu0 %v1279_v16  ;;  %1174 = vmatpush3.bf16.msra.mxu0 %v1289_v20  ;;  %v1308_v16 = vld [vmem:[%s1555_s5 + $0x18] sm:$0xff]  }
  0x24   :  { %1175 = vmatprep.subr.bf16.mxu0 %v1290_v21  ;;  %1197 = vmatprep.subr.bf16.mxu1 %v1297_v40 }
  0x27   :  { %1176 = vmatpush3.bf16.msra.mxu0 %v1290_v21 }
  0x28   :  { %1177 = vmatprep.subr.bf16.mxu0 %v1291_v22 }
  0x2a   :  { %1146 = vmatmul.mubr.bf16.gmra.mrb[4].mxu0 %v1280_v18  ;;  %v1310_v18 = vld [vmem:[%s1555_s5 + $0x28] sm:$0xff]  }
  0x2b   :  { %1178 = vmatpush3.bf16.msra.mxu0 %v1291_v22 }
  0x2c   :  { %1179 = vmatprep.subr.bf16.mxu0 %v1292_v23 }
  0x2f   :  { %1180 = vmatpush3.bf16.msra.mxu0 %v1292_v23 }
  0x30   :  { %1181 = vmatprep.subr.bf16.mxu0 %v1293_v24 }
  0x33   :  { %1182 = vmatpush3.bf16.msra.mxu0 %v1293_v24 }
  0x34   :  { %1183 = vmatprep.subr.bf16.mxu0 %v1294_v25 }
  0x37   :  { %1184 = vmatpush3.bf16.msra.mxu0 %v1294_v25 }
  0x38   :  { %1185 = vmatprep.subr.bf16.mxu0 %v1295_v38 }
  0x3b   :  { %1186 = vmatpush3.bf16.msra.mxu0 %v1295_v38 }
  0x3c   :  { %1187 = vmatprep.subr.bf16.mxu0 %v1296_v39 }
  0x3f   :  { %1188 = vmatpush3.bf16.msra.mxu0 %v1296_v39 }
  0x40   :  { %1221 = vmatprep.subr.bf16.mxu0 %v1305_v13 }
  0xf5   :  { %v1143_v26 = vpop.f32.mrb[0].mxu0 }
  0xf6   :  { %v160_v27 = vpop.f32.mrb[1].mxu0 }
  0xf7   :  { %v1144_v28 = vpop.f32.mrb[2].mxu0 }
  0xf8   :  { %v192_v29 = vpack.c.bf16 %v1144_v28, %v1143_v26  ;;  %v163_v30 = vpop.f32.mrb[3].mxu0 }
  0xf9   :  { %v191_v31 = vpack.c.bf16 %v163_v30, %v160_v27 }
  0xfb   :  { %1165 = vmatprep.mubr.bf16.mxu1 %v191_v31 }
  0xfc   :  { %1166 = vmatmul.mubr.bf16.vlgmr.msra.gmra.mrb[0].mxu1 %v192_v29 }
  0xfd   :  { %v1147_v32 = vpop.f32.mrb[4].mxu0  ;;  %1198 = vmatpush3.bf16.msra.mxu1 %v1297_v40 }
  0xfe   :  { %v176_v33 = vpop.f32.mrb[5].mxu0  ;;  %1199 = vmatprep.subr.bf16.mxu1 %v1298_v41 }
  0xff   :  { %v1148_v34 = vpop.f32.mrb[6].mxu0 }
 0x100   :  { %v194_v35 = vpack.c.bf16 %v1148_v34, %v1147_v32  ;;  %v179_v36 = vpop.f32.mrb[7].mxu0 }
 0x101   :  { %v193_v37 = vpack.c.bf16 %v179_v36, %v176_v33  ;;  %1200 = vmatpush3.bf16.msra.mxu1 %v1298_v41 }
 0x102   :  { %1201 = vmatprep.subr.bf16.mxu1 %v1299_v42 }
 0x103   :  { %1169 = vmatprep.mubr.bf16.mxu1 %v193_v37 }
 0x104   :  { %1170 = vmatmul.mubr.bf16.gmra.mrb[4].mxu1 %v194_v35 }
 0x105   :  { %1202 = vmatpush3.bf16.msra.mxu1 %v1299_v42 }
 0x106   :  { %1203 = vmatprep.subr.bf16.mxu1 %v1300_v43 }
 0x109   :  { %1204 = vmatpush3.bf16.msra.mxu1 %v1300_v43 }
 0x10a   :  { %1205 = vmatprep.subr.bf16.mxu1 %v1301_v44 }
 0x10d   :  { %1206 = vmatpush3.bf16.msra.mxu1 %v1301_v44 }
 0x10e   :  { %1207 = vmatprep.subr.bf16.mxu1 %v1302_v45 }
 0x111   :  { %1208 = vmatpush3.bf16.msra.mxu1 %v1302_v45 }
 0x112   :  { %1209 = vmatprep.subr.bf16.mxu1 %v1303_v11 }
 0x115   :  { %1210 = vmatpush3.bf16.msra.mxu1 %v1303_v11 }
 0x116   :  { %1211 = vmatprep.subr.bf16.mxu1 %v1304_v12 }
 0x119   :  { %1212 = vmatpush3.bf16.msra.mxu1 %v1304_v12 }
 0x1cf   :  { %v1167_v47 = vpop.f32.mrb[0].mxu1 }
 0x1d0   :  { %v307_v48 = vadd.f32 %v1167_v47, %v969_v46  ;;  %v298_v49 = vpop.f32.mrb[1].mxu1 }
 0x1d1   :  { %v299_v50 = vadd.f32 %v969_v46, %v298_v49  ;;  %v1168_v51 = vpop.f32.mrb[2].mxu1  ;;  %v1312_v49 = vld [vmem:[%s1555_s5 + $0x38] sm:$0xff]  }
 0x1d2   :  { %v310_v52 = vadd.f32 %v1168_v51, %v969_v46  ;;  %v301_v53 = vpop.f32.mrb[3].mxu1  ;;  %v331_v55 = vmax.f32 %v307_v48, 0.0  ;;  %v1311_v48 = vld [vmem:[%s1555_s5 + $0x30] sm:$0xff]   ;;  %v1314_v51 = vld [vmem:[%s1556_s6 + $0x8] sm:$0xff]  }
 0x1d3   :  { %v302_v54 = vadd.f32 %v969_v46, %v301_v53  ;;  %v329_v57 = vmax.f32 %v299_v50, 0.0  ;;  %v1313_v50 = vld [vmem:[%s1556_s6] sm:$0xff]   ;;  %v1316_v53 = vld [vmem:[%s1556_s6 + $0x18] sm:$0xff]  }
 0x1d4   :  { %v332_v56 = vmax.f32 %v310_v52, 0.0  ;;  %1245 = vmatprep.subr.bf16.mxu1 %v1313_v50  ;;  %v1315_v52 = vld [vmem:[%s1556_s6 + $0x10] sm:$0xff]  }
 0x1d5   :  { %v330_v58 = vmax.f32 %v302_v54, 0.0  ;;  %v1317_v54 = vld [vmem:[%s1556_s6 + $0x20] sm:$0xff]  }
 0x1d6   :  { %v338_v59 = vpack.c.bf16 %v332_v56, %v331_v55  ;;  %v1318_v55 = vld [vmem:[%s1556_s6 + $0x28] sm:$0xff]   ;;  %v987_v56 = vld [vmem:[%s1554_s7 + $0x2] ss:$0 sm:$0xff] }
 0x1d7   :  { %v337_v60 = vpack.c.bf16 %v330_v58, %v329_v57  ;;  %v1171_v61 = vpop.f32.mrb[4].mxu1 }
 0x1d8   :  { %v323_v62 = vadd.f32 %v1171_v61, %v969_v46  ;;  %v314_v63 = vpop.f32.mrb[5].mxu1 }
 0x1d9   :  { %v315_v0 = vadd.f32 %v969_v46, %v314_v63  ;;  %v1172_v1 = vpop.f32.mrb[6].mxu1  ;;  %1189 = vmatprep.mubr.bf16.mxu0 %v337_v60 }
 0x1da   :  { %v326_v2 = vadd.f32 %v1172_v1, %v969_v46  ;;  %v317_v3 = vpop.f32.mrb[7].mxu1  ;;  %1190 = vmatmul.mubr.bf16.vlgmr.msra.gmra.mrb[8].mxu0 %v338_v59  ;;  %v335_v5 = vmax.f32 %v323_v62, 0.0 }
 0x1db   :  { %v318_v4 = vadd.f32 %v969_v46, %v317_v3  ;;  %v333_v7 = vmax.f32 %v315_v0, 0.0  ;;  %1222 = vmatpush3.bf16.msra.mxu0 %v1305_v13 }
 0x1dc   :  { %v336_v6 = vmax.f32 %v326_v2, 0.0  ;;  %1223 = vmatprep.subr.bf16.mxu0 %v1306_v14 }
 0x1dd   :  { %v334_v8 = vmax.f32 %v318_v4, 0.0 }
 0x1de   :  { %v340_v9 = vpack.c.bf16 %v336_v6, %v335_v5 }
 0x1df   :  { %v339_v10 = vpack.c.bf16 %v334_v8, %v333_v7  ;;  %1224 = vmatpush3.bf16.msra.mxu0 %v1306_v14 }
 0x1e0   :  { %1225 = vmatprep.subr.bf16.mxu0 %v1307_v15 }
 0x1e1   :  { %1193 = vmatprep.mubr.bf16.mxu0 %v339_v10 }
 0x1e2   :  { %1194 = vmatmul.mubr.bf16.gmra.mrb[12].mxu0 %v340_v9 }
 0x1e3   :  { %1226 = vmatpush3.bf16.msra.mxu0 %v1307_v15 }
 0x1e4   :  { %1227 = vmatprep.subr.bf16.mxu0 %v1308_v16 }
 0x1e7   :  { %1228 = vmatpush3.bf16.msra.mxu0 %v1308_v16 }
 0x1e8   :  { %1229 = vmatprep.subr.bf16.mxu0 %v1309_v17 }
 0x1eb   :  { %1230 = vmatpush3.bf16.msra.mxu0 %v1309_v17 }
 0x1ec   :  { %1231 = vmatprep.subr.bf16.mxu0 %v1310_v18 }
 0x1ef   :  { %1232 = vmatpush3.bf16.msra.mxu0 %v1310_v18 }
 0x1f0   :  { %1233 = vmatprep.subr.bf16.mxu0 %v1311_v48 }
 0x1f3   :  { %1234 = vmatpush3.bf16.msra.mxu0 %v1311_v48 }
 0x1f4   :  { %1235 = vmatprep.subr.bf16.mxu0 %v1312_v49 }
 0x1f7   :  { %1236 = vmatpush3.bf16.msra.mxu0 %v1312_v49 }
 0x2ad   :  { %v1191_v20 = vpop.f32.mrb[8].mxu0 }
 0x2ae   :  { %v453_v21 = vadd.f32 %v1191_v20, %v978_v19  ;;  %v444_v22 = vpop.f32.mrb[9].mxu0 }
 0x2af   :  { %v445_v23 = vadd.f32 %v978_v19, %v444_v22  ;;  %v1192_v24 = vpop.f32.mrb[10].mxu0  ;;  %v1320_v22 = vld [vmem:[%s1556_s6 + $0x38] sm:$0xff]  }
 0x2b0   :  { %v456_v25 = vadd.f32 %v1192_v24, %v978_v19  ;;  %v447_v26 = vpop.f32.mrb[11].mxu0  ;;  %v477_v28 = vmax.f32 %v453_v21, 0.0  ;;  %v1319_v21 = vld [vmem:[%s1556_s6 + $0x30] sm:$0xff]  }
 0x2b1   :  { %v448_v27 = vadd.f32 %v978_v19, %v447_v26  ;;  %v475_v30 = vmax.f32 %v445_v23, 0.0  ;;  %v996_v23 = vld [vmem:[%s1554_s7 + $0x3] ss:$0 sm:$0xff] }
 0x2b2   :  { %v478_v29 = vmax.f32 %v456_v25, 0.0 }
 0x2b3   :  { %v476_v31 = vmax.f32 %v448_v27, 0.0 }
 0x2b4   :  { %v484_v32 = vpack.c.bf16 %v478_v29, %v477_v28 }
 0x2b5   :  { %v483_v33 = vpack.c.bf16 %v476_v31, %v475_v30  ;;  %v1195_v34 = vpop.f32.mrb[12].mxu0 }
 0x2b6   :  { %v469_v35 = vadd.f32 %v1195_v34, %v978_v19  ;;  %v460_v36 = vpop.f32.mrb[13].mxu0 }
 0x2b7   :  { %v461_v37 = vadd.f32 %v978_v19, %v460_v36  ;;  %v1196_v38 = vpop.f32.mrb[14].mxu0  ;;  %1213 = vmatprep.mubr.bf16.mxu1 %v483_v33 }
 0x2b8   :  { %v472_v39 = vadd.f32 %v1196_v38, %v978_v19  ;;  %v463_v40 = vpop.f32.mrb[15].mxu0  ;;  %1214 = vmatmul.mubr.bf16.vlgmr.msra.gmra.mrb[8].mxu1 %v484_v32  ;;  %v481_v42 = vmax.f32 %v469_v35, 0.0 }
 0x2b9   :  { %v464_v41 = vadd.f32 %v978_v19, %v463_v40  ;;  %v479_v44 = vmax.f32 %v461_v37, 0.0  ;;  %1246 = vmatpush3.bf16.msra.mxu1 %v1313_v50 }
 0x2ba   :  { %v482_v43 = vmax.f32 %v472_v39, 0.0  ;;  %1247 = vmatprep.subr.bf16.mxu1 %v1314_v51 }
 0x2bb   :  { %v480_v45 = vmax.f32 %v464_v41, 0.0 }
 0x2bc   :  { %v486_v46 = vpack.c.bf16 %v482_v43, %v481_v42 }
 0x2bd   :  { %v485_v47 = vpack.c.bf16 %v480_v45, %v479_v44  ;;  %1248 = vmatpush3.bf16.msra.mxu1 %v1314_v51 }
 0x2be   :  { %1249 = vmatprep.subr.bf16.mxu1 %v1315_v52 }
 0x2bf   :  { %1217 = vmatprep.mubr.bf16.mxu1 %v485_v47 }
 0x2c0   :  { %1218 = vmatmul.mubr.bf16.gmra.mrb[12].mxu1 %v486_v46 }
 0x2c1   :  { %1250 = vmatpush3.bf16.msra.mxu1 %v1315_v52 }
 0x2c2   :  { %1251 = vmatprep.subr.bf16.mxu1 %v1316_v53 }
 0x2c5   :  { %1252 = vmatpush3.bf16.msra.mxu1 %v1316_v53  ;;  %v1005_v53 = vld [vmem:[%s1554_s7 + $0x4] ss:$0 sm:$0xff] }
 0x2c6   :  { %1253 = vmatprep.subr.bf16.mxu1 %v1317_v54 }
 0x2c9   :  { %1254 = vmatpush3.bf16.msra.mxu1 %v1317_v54 }
 0x2ca   :  { %1255 = vmatprep.subr.bf16.mxu1 %v1318_v55 }
 0x2cd   :  { %1256 = vmatpush3.bf16.msra.mxu1 %v1318_v55 }
 0x2ce   :  { %1257 = vmatprep.subr.bf16.mxu1 %v1319_v21 }
 0x2d1   :  { %1258 = vmatpush3.bf16.msra.mxu1 %v1319_v21 }
 0x2d2   :  { %1259 = vmatprep.subr.bf16.mxu1 %v1320_v22 }
 0x2d5   :  { %1260 = vmatpush3.bf16.msra.mxu1 %v1320_v22 }
 0x38b   :  { %v1215_v57 = vpop.f32.mrb[8].mxu1 }
 0x38c   :  { %v599_v58 = vadd.f32 %v1215_v57, %v987_v56  ;;  %v590_v59 = vpop.f32.mrb[9].mxu1 }
 0x38d   :  { %v591_v60 = vadd.f32 %v987_v56, %v590_v59  ;;  %v1216_v61 = vpop.f32.mrb[10].mxu1 }
 0x38e   :  { %v602_v62 = vadd.f32 %v1216_v61, %v987_v56  ;;  %v593_v63 = vpop.f32.mrb[11].mxu1  ;;  %v623_v1 = vmax.f32 %v599_v58, 0.0 }
 0x38f   :  { %v594_v0 = vadd.f32 %v987_v56, %v593_v63  ;;  %v621_v3 = vmax.f32 %v591_v60, 0.0 }
 0x390   :  { %v624_v2 = vmax.f32 %v602_v62, 0.0 }
 0x391   :  { %v622_v4 = vmax.f32 %v594_v0, 0.0 }
 0x392   :  { %v630_v5 = vpack.c.bf16 %v624_v2, %v623_v1 }
 0x393   :  { %v629_v6 = vpack.c.bf16 %v622_v4, %v621_v3  ;;  %v1219_v7 = vpop.f32.mrb[12].mxu1 }
 0x394   :  { %v615_v8 = vadd.f32 %v1219_v7, %v987_v56  ;;  %v606_v9 = vpop.f32.mrb[13].mxu1 }
 0x395   :  { %v607_v10 = vadd.f32 %v987_v56, %v606_v9  ;;  %v1220_v11 = vpop.f32.mrb[14].mxu1  ;;  %1237 = vmatprep.mubr.bf16.mxu0 %v629_v6 }
 0x396   :  { %v618_v12 = vadd.f32 %v1220_v11, %v987_v56  ;;  %v609_v13 = vpop.f32.mrb[15].mxu1  ;;  %1238 = vmatmul.mubr.bf16.vlgmr.msra.gmra.mrb[16].mxu0 %v630_v5  ;;  %v627_v15 = vmax.f32 %v615_v8, 0.0 }
 0x397   :  { %v610_v14 = vadd.f32 %v987_v56, %v609_v13  ;;  %v625_v17 = vmax.f32 %v607_v10, 0.0 }
 0x398   :  { %v628_v16 = vmax.f32 %v618_v12, 0.0 }
 0x399   :  { %v626_v18 = vmax.f32 %v610_v14, 0.0 }
 0x39a   :  { %v632_v19 = vpack.c.bf16 %v628_v16, %v627_v15 }
 0x39b   :  { %v631_v20 = vpack.c.bf16 %v626_v18, %v625_v17 }
 0x39d   :  { %1241 = vmatprep.mubr.bf16.mxu0 %v631_v20 }
 0x39e   :  { %1242 = vmatmul.mubr.bf16.gmra.mrb[20].mxu0 %v632_v19 }
 0x469   :  { %v1239_v24 = vpop.f32.mrb[16].mxu0 }
 0x46a   :  { %v745_v25 = vadd.f32 %v1239_v24, %v996_v23  ;;  %v736_v26 = vpop.f32.mrb[17].mxu0 }
 0x46b   :  { %v737_v27 = vadd.f32 %v996_v23, %v736_v26  ;;  %v1240_v28 = vpop.f32.mrb[18].mxu0 }
 0x46c   :  { %v748_v29 = vadd.f32 %v1240_v28, %v996_v23  ;;  %v739_v30 = vpop.f32.mrb[19].mxu0  ;;  %v769_v32 = vmax.f32 %v745_v25, 0.0 }
 0x46d   :  { %v740_v31 = vadd.f32 %v996_v23, %v739_v30  ;;  %v767_v34 = vmax.f32 %v737_v27, 0.0 }
 0x46e   :  { %v770_v33 = vmax.f32 %v748_v29, 0.0 }
 0x46f   :  { %v768_v35 = vmax.f32 %v740_v31, 0.0 }
 0x470   :  { %v776_v36 = vpack.c.bf16 %v770_v33, %v769_v32 }
 0x471   :  { %v775_v37 = vpack.c.bf16 %v768_v35, %v767_v34  ;;  %v1243_v38 = vpop.f32.mrb[20].mxu0 }
 0x472   :  { %v761_v39 = vadd.f32 %v1243_v38, %v996_v23  ;;  %v752_v40 = vpop.f32.mrb[21].mxu0 }
 0x473   :  { %v753_v41 = vadd.f32 %v996_v23, %v752_v40  ;;  %v1244_v42 = vpop.f32.mrb[22].mxu0  ;;  %1261 = vmatprep.mubr.bf16.mxu1 %v775_v37 }
 0x474   :  { %v764_v43 = vadd.f32 %v1244_v42, %v996_v23  ;;  %v755_v44 = vpop.f32.mrb[23].mxu0  ;;  %1262 = vmatmul.mubr.bf16.vlgmr.msra.gmra.mrb[16].mxu1 %v776_v36  ;;  %v773_v46 = vmax.f32 %v761_v39, 0.0 }
 0x475   :  { %v756_v45 = vadd.f32 %v996_v23, %v755_v44  ;;  %v771_v48 = vmax.f32 %v753_v41, 0.0 }
 0x476   :  { %v774_v47 = vmax.f32 %v764_v43, 0.0 }
 0x477   :  { %v772_v49 = vmax.f32 %v756_v45, 0.0 }
 0x478   :  { %v778_v50 = vpack.c.bf16 %v774_v47, %v773_v46 }
 0x479   :  { %v777_v51 = vpack.c.bf16 %v772_v49, %v771_v48 }
 0x47b   :  { %1265 = vmatprep.mubr.bf16.mxu1 %v777_v51 }
 0x47c   :  { %1266 = vmatmul.mubr.bf16.gmra.mrb[20].mxu1 %v778_v50 }
 0x547   :  { %v1263_v52 = vpop.f32.mrb[16].mxu1 }
 0x548   :  { %v882_v54 = vpop.f32.mrb[17].mxu1  ;;  %v891_v56 = vadd.f32 %v1263_v52, %v1005_v53 }
 0x549   :  { %v1264_v55 = vpop.f32.mrb[18].mxu1  ;;  %v883_v59 = vadd.f32 %v1005_v53, %v882_v54 }
 0x54a   :  { %v894_v57 = vadd.f32 %v1264_v55, %v1005_v53  ;;  %v885_v58 = vpop.f32.mrb[19].mxu1 }
 0x54b   :  { %v886_v60 = vadd.f32 %v1005_v53, %v885_v58 }
 0x54c   :  { %v1038_v61 = vpack.c.bf16 %v894_v57, %v891_v56 }
 0x54d   :  { %v1033_v62 = vpack.c.bf16 %v886_v60, %v883_v59 }
 0x54e   :  { %1050 = vst [vmem:[%s1557_s8 + $0x8] sm:$0xff] %v1038_v61  }
 0x54f   :  { %1034 = vst [vmem:[%s1557_s8] sm:$0xff] %v1033_v62   ;;  %v1267_v63 = vpop.f32.mrb[20].mxu1 }
 0x550   :  { %v898_v0 = vpop.f32.mrb[21].mxu1  ;;  %v907_v2 = vadd.f32 %v1267_v63, %v1005_v53 }
 0x551   :  { %v1268_v1 = vpop.f32.mrb[22].mxu1  ;;  %v899_v5 = vadd.f32 %v1005_v53, %v898_v0 }
 0x552   :  { %v910_v3 = vadd.f32 %v1268_v1, %v1005_v53  ;;  %v901_v4 = vpop.f32.mrb[23].mxu1 }
 0x553   :  { %v902_v6 = vadd.f32 %v1005_v53, %v901_v4 }
 0x554   :  { %v1048_v7 = vpack.c.bf16 %v910_v3, %v907_v2 }
 0x555   :  { %v1043_v8 = vpack.c.bf16 %v902_v6, %v899_v5 }
 0x556   :  { %1052 = vst [vmem:[%s1557_s8 + $0x18] sm:$0xff] %v1048_v7  }
 0x557   :  { %1051 = vst [vmem:[%s1557_s8 + $0x10] sm:$0xff] %v1043_v8  }

// kernel: model2_forward.5
= control target key start
LH: loop header
LB: loop body
LE: loop exit
PB: predicated region body
PF: predicated region fallthrough
CT: control target
= control target key end

     0   :  { %s1319_s1 = inlined_call_operand.vmem [shape: bf16[128,128], index: 1, kind: input, shape index: {}]   ;;  %s1320_s0 = inlined_call_operand.vmem [shape: bf16[32,128], index: 0, kind: input, shape index: {}]   ;;  %s1321_s2 = inlined_call_operand.vmem [shape: bf16[128,128], index: 2, kind: input, shape index: {}]   ;;  %s1322_s3 = inlined_call_operand.vmem [shape: bf16[128,128], index: 3, kind: input, shape index: {}]   ;;  %s1323_s4 = inlined_call_operand.vmem [shape: bf16[128,128], index: 4, kind: input, shape index: {}]   ;;  %s1324_s7 = inlined_call_operand.vmem [shape: f32[8,128], index: 7, kind: input, shape index: {}]   ;;  %s1325_s5 = inlined_call_operand.vmem [shape: bf16[128,128], index: 5, kind: input, shape index: {}]   ;;  %s1326_s6 = inlined_call_operand.vmem [shape: bf16[128,128], index: 6, kind: input, shape index: {}]   ;;  %s1327_s8 = inlined_call_operand.vmem [shape: bf16[32,128], index: 8, kind: output, shape index: {}]  }
   0x1   :  { %v1053_v0 = vld [vmem:[%s1319_s1] sm:$0xff]   ;;  %v1054_v1 = vld [vmem:[%s1319_s1 + $0x8] sm:$0xff]   ;;  %v1055_v2 = vld [vmem:[%s1319_s1 + $0x10] sm:$0xff]  }
   0x2   :  { %933 = vmatprep.subr.bf16.mxu0 %v1053_v0  ;;  %v1056_v3 = vld [vmem:[%s1319_s1 + $0x18] sm:$0xff]   ;;  %v1061_v4 = vld [vmem:[%s1320_s0] sm:$0xff]   ;;  %v1064_v6 = vld [vmem:[%s1321_s2 + $0x8] sm:$0xff]  }
   0x3   :  { %934 = vmatpush3.bf16.msra.mxu0 %v1053_v0  ;;  %949 = vmatprep.mubr.bf16.mxu0 %v1061_v4  ;;  %v1063_v5 = vld [vmem:[%s1321_s2] sm:$0xff]   ;;  %v1065_v8 = vld [vmem:[%s1321_s2 + $0x10] sm:$0xff]   ;;  %v1058_v9 = vld [vmem:[%s1319_s1 + $0x28] sm:$0xff]  }
   0x4   :  { %935 = vmatprep.subr.bf16.mxu0 %v1054_v1  ;;  %v1057_v7 = vld [vmem:[%s1319_s1 + $0x20] sm:$0xff]   ;;  %953 = vmatprep.subr.bf16.mxu1 %v1063_v5  ;;  %v1066_v10 = vld [vmem:[%s1321_s2 + $0x18] sm:$0xff]   ;;  %v1059_v11 = vld [vmem:[%s1319_s1 + $0x30] sm:$0xff]  }
   0x5   :  { %954 = vmatpush3.bf16.msra.mxu1 %v1063_v5  ;;  %v1067_v12 = vld [vmem:[%s1321_s2 + $0x20] sm:$0xff]   ;;  %v1060_v13 = vld [vmem:[%s1319_s1 + $0x38] sm:$0xff]   ;;  %v1068_v14 = vld [vmem:[%s1321_s2 + $0x28] sm:$0xff]  }
   0x6   :  { %955 = vmatprep.subr.bf16.mxu1 %v1064_v6  ;;  %v1062_v15 = vld [vmem:[%s1320_s0 + $0x8] sm:$0xff]   ;;  %v1069_v16 = vld [vmem:[%s1321_s2 + $0x30] sm:$0xff]   ;;  %v1070_v17 = vld [vmem:[%s1321_s2 + $0x38] sm:$0xff]  }
   0x7   :  { %936 = vmatpush3.bf16.msra.mxu0 %v1054_v1  ;;  %v1071_v18 = vld [vmem:[%s1322_s3] sm:$0xff]   ;;  %v1072_v19 = vld [vmem:[%s1322_s3 + $0x8] sm:$0xff]   ;;  %v1073_v20 = vld [vmem:[%s1322_s3 + $0x10] sm:$0xff]  }
   0x8   :  { %937 = vmatprep.subr.bf16.mxu0 %v1055_v2  ;;  %v1074_v21 = vld [vmem:[%s1322_s3 + $0x18] sm:$0xff]   ;;  %v1075_v22 = vld [vmem:[%s1322_s3 + $0x20] sm:$0xff]   ;;  %v1076_v23 = vld [vmem:[%s1322_s3 + $0x28] sm:$0xff]  }
   0x9   :  { %956 = vmatpush3.bf16.msra.mxu1 %v1064_v6  ;;  %v1077_v30 = vld [vmem:[%s1322_s3 + $0x30] sm:$0xff]   ;;  %v1078_v31 = vld [vmem:[%s1322_s3 + $0x38] sm:$0xff]   ;;  %v1079_v32 = vld [vmem:[%s1323_s4] sm:$0xff]  }
   0xa   :  { %957 = vmatprep.subr.bf16.mxu1 %v1065_v8  ;;  %v1080_v33 = vld [vmem:[%s1323_s4 + $0x8] sm:$0xff]   ;;  %v1081_v34 = vld [vmem:[%s1323_s4 + $0x10] sm:$0xff]   ;;  %v1082_v35 = vld [vmem:[%s1323_s4 + $0x18] sm:$0xff]  }
   0xb   :  { %938 = vmatpush3.bf16.msra.mxu0 %v1055_v2  ;;  %v1083_v36 = vld [vmem:[%s1323_s4 + $0x20] sm:$0xff]   ;;  %v1084_v37 = vld [vmem:[%s1323_s4 + $0x28] sm:$0xff]   ;;  %v1085_v53 = vld [vmem:[%s1323_s4 + $0x30] sm:$0xff]  }
   0xc   :  { %939 = vmatprep.subr.bf16.mxu0 %v1056_v3  ;;  %v809_v38 = vld [vmem:[%s1324_s7] ss:$0 sm:$0xff]  ;;  %v1086_v54 = vld [vmem:[%s1323_s4 + $0x38] sm:$0xff]   ;;  %v1088_v56 = vld [vmem:[%s1325_s5 + $0x8] sm:$0xff]  }
   0xd   :  { %958 = vmatpush3.bf16.msra.mxu1 %v1065_v8  ;;  %v1087_v55 = vld [vmem:[%s1325_s5] sm:$0xff]   ;;  %v1089_v57 = vld [vmem:[%s1325_s5 + $0x10] sm:$0xff]   ;;  %v1090_v58 = vld [vmem:[%s1325_s5 + $0x18] sm:$0xff]  }
   0xe   :  { %959 = vmatprep.subr.bf16.mxu1 %v1066_v10  ;;  %v1091_v59 = vld [vmem:[%s1325_s5 + $0x20] sm:$0xff]   ;;  %v1092_v60 = vld [vmem:[%s1325_s5 + $0x28] sm:$0xff]  }
   0xf   :  { %940 = vmatpush3.bf16.msra.mxu0 %v1056_v3  ;;  %v818_v61 = vld [vmem:[%s1324_s7 + $0x1] ss:$0 sm:$0xff] }
  0x10   :  { %941 = vmatprep.subr.bf16.mxu0 %v1057_v7 }
  0x11   :  { %960 = vmatpush3.bf16.msra.mxu1 %v1066_v10 }
  0x12   :  { %961 = vmatprep.subr.bf16.mxu1 %v1067_v12 }
  0x13   :  { %942 = vmatpush3.bf16.msra.mxu0 %v1057_v7 }
  0x14   :  { %943 = vmatprep.subr.bf16.mxu0 %v1058_v9 }
  0x15   :  { %962 = vmatpush3.bf16.msra.mxu1 %v1067_v12  ;;  %v1093_v12 = vld [vmem:[%s1325_s5 + $0x30] sm:$0xff]  }
  0x16   :  { %963 = vmatprep.subr.bf16.mxu1 %v1068_v14 }
  0x17   :  { %944 = vmatpush3.bf16.msra.mxu0 %v1058_v9 }
  0x18   :  { %945 = vmatprep.subr.bf16.mxu0 %v1059_v11 }
  0x19   :  { %964 = vmatpush3.bf16.msra.mxu1 %v1068_v14  ;;  %v1095_v14 = vld [vmem:[%s1326_s6] sm:$0xff]  }
  0x1a   :  { %965 = vmatprep.subr.bf16.mxu1 %v1069_v16 }
  0x1b   :  { %946 = vmatpush3.bf16.msra.mxu0 %v1059_v11 }
  0x1c   :  { %947 = vmatprep.subr.bf16.mxu0 %v1060_v13 }
  0x1d   :  { %966 = vmatpush3.bf16.msra.mxu1 %v1069_v16  ;;  %v1097_v16 = vld [vmem:[%s1326_s6 + $0x10] sm:$0xff]  }
  0x1e   :  { %967 = vmatprep.subr.bf16.mxu1 %v1070_v17 }
  0x1f   :  { %948 = vmatpush3.bf16.msra.mxu0 %v1060_v13  ;;  %v1094_v13 = vld [vmem:[%s1325_s5 + $0x38] sm:$0xff]  }
  0x20   :  { %973 = vmatprep.subr.bf16.mxu0 %v1071_v18 }
  0x21   :  { %968 = vmatpush3.bf16.msra.mxu1 %v1070_v17  ;;  %v1098_v17 = vld [vmem:[%s1326_s6 + $0x18] sm:$0xff]  }
  0x22   :  { %950 = vmatmul.mubr.bf16.vlgmr.msra.gmra.mrb[0].mxu0 %v1062_v15  ;;  %993 = vmatprep.subr.bf16.mxu1 %v1079_v32  ;;  %v1096_v15 = vld [vmem:[%s1326_s6 + $0x8] sm:$0xff]  }
  0x23   :  { %974 = vmatpush3.bf16.msra.mxu0 %v1071_v18  ;;  %v1099_v18 = vld [vmem:[%s1326_s6 + $0x20] sm:$0xff]  }
  0x24   :  { %975 = vmatprep.subr.bf16.mxu0 %v1072_v19 }
  0x27   :  { %976 = vmatpush3.bf16.msra.mxu0 %v1072_v19  ;;  %v1100_v19 = vld [vmem:[%s1326_s6 + $0x28] sm:$0xff]  }
  0x28   :  { %977 = vmatprep.subr.bf16.mxu0 %v1073_v20 }
  0x2b   :  { %978 = vmatpush3.bf16.msra.mxu0 %v1073_v20  ;;  %v827_v20 = vld [vmem:[%s1324_s7 + $0x2] ss:$0 sm:$0xff] }
  0x2c   :  { %979 = vmatprep.subr.bf16.mxu0 %v1074_v21 }
  0x2f   :  { %980 = vmatpush3.bf16.msra.mxu0 %v1074_v21 }
  0x30   :  { %981 = vmatprep.subr.bf16.mxu0 %v1075_v22 }
  0x33   :  { %982 = vmatpush3.bf16.msra.mxu0 %v1075_v22 }
  0x34   :  { %983 = vmatprep.subr.bf16.mxu0 %v1076_v23 }
  0x37   :  { %984 = vmatpush3.bf16.msra.mxu0 %v1076_v23 }
  0x38   :  { %985 = vmatprep.subr.bf16.mxu0 %v1077_v30 }
  0x3b   :  { %986 = vmatpush3.bf16.msra.mxu0 %v1077_v30 }
  0x3c   :  { %987 = vmatprep.subr.bf16.mxu0 %v1078_v31 }
  0x3f   :  { %988 = vmatpush3.bf16.msra.mxu0 %v1078_v31 }
  0x40   :  { %1013 = vmatprep.subr.bf16.mxu0 %v1087_v55 }
  0xf5   :  { %v951_v24 = vpop.f32.mrb[0].mxu0 }
  0xf6   :  { %v144_v25 = vpop.f32.mrb[1].mxu0 }
  0xf7   :  { %v952_v26 = vpop.f32.mrb[2].mxu0 }
  0xf8   :  { %v160_v27 = vpack.c.bf16 %v952_v26, %v951_v24  ;;  %v147_v28 = vpop.f32.mrb[3].mxu0 }
  0xf9   :  { %v159_v29 = vpack.c.bf16 %v147_v28, %v144_v25 }
  0xfb   :  { %969 = vmatprep.mubr.bf16.mxu1 %v159_v29 }
  0xfc   :  { %970 = vmatmul.mubr.bf16.vlgmr.msra.gmra.mrb[0].mxu1 %v160_v27 }
  0xfd   :  { %994 = vmatpush3.bf16.msra.mxu1 %v1079_v32 }
  0xfe   :  { %995 = vmatprep.subr.bf16.mxu1 %v1080_v33 }
 0x101   :  { %996 = vmatpush3.bf16.msra.mxu1 %v1080_v33 }
 0x102   :  { %997 = vmatprep.subr.bf16.mxu1 %v1081_v34 }
 0x105   :  { %998 = vmatpush3.bf16.msra.mxu1 %v1081_v34 }
 0x106   :  { %999 = vmatprep.subr.bf16.mxu1 %v1082_v35 }
 0x109   :  { %1000 = vmatpush3.bf16.msra.mxu1 %v1082_v35  ;;  %v1101_v35 = vld [vmem:[%s1326_s6 + $0x30] sm:$0xff]  }
 0x10a   :  { %1001 = vmatprep.subr.bf16.mxu1 %v1083_v36 }
 0x10d   :  { %1002 = vmatpush3.bf16.msra.mxu1 %v1083_v36  ;;  %v1102_v36 = vld [vmem:[%s1326_s6 + $0x38] sm:$0xff]  }
 0x10e   :  { %1003 = vmatprep.subr.bf16.mxu1 %v1084_v37 }
 0x111   :  { %1004 = vmatpush3.bf16.msra.mxu1 %v1084_v37  ;;  %v836_v37 = vld [vmem:[%s1324_s7 + $0x3] ss:$0 sm:$0xff] }
 0x112   :  { %1005 = vmatprep.subr.bf16.mxu1 %v1085_v53 }
 0x115   :  { %1006 = vmatpush3.bf16.msra.mxu1 %v1085_v53  ;;  %v845_v53 = vld [vmem:[%s1324_s7 + $0x4] ss:$0 sm:$0xff] }
 0x116   :  { %1007 = vmatprep.subr.bf16.mxu1 %v1086_v54 }
 0x119   :  { %1008 = vmatpush3.bf16.msra.mxu1 %v1086_v54 }
 0x11a   :  { %1033 = vmatprep.subr.bf16.mxu1 %v1095_v14 }
 0x1cf   :  { %v971_v39 = vpop.f32.mrb[0].mxu1 }
 0x1d0   :  { %v273_v40 = vadd.f32 %v971_v39, %v809_v38  ;;  %v264_v41 = vpop.f32.mrb[1].mxu1 }
 0x1d1   :  { %v265_v42 = vadd.f32 %v809_v38, %v264_v41  ;;  %v972_v43 = vpop.f32.mrb[2].mxu1 }
 0x1d2   :  { %v276_v44 = vadd.f32 %v972_v43, %v809_v38  ;;  %v267_v45 = vpop.f32.mrb[3].mxu1  ;;  %v281_v47 = vmax.f32 %v273_v40, 0.0 }
 0x1d3   :  { %v268_v46 = vadd.f32 %v809_v38, %v267_v45  ;;  %v279_v49 = vmax.f32 %v265_v42, 0.0 }
 0x1d4   :  { %v282_v48 = vmax.f32 %v276_v44, 0.0 }
 0x1d5   :  { %v280_v50 = vmax.f32 %v268_v46, 0.0 }
 0x1d6   :  { %v284_v51 = vpack.c.bf16 %v282_v48, %v281_v47 }
 0x1d7   :  { %v283_v52 = vpack.c.bf16 %v280_v50, %v279_v49 }
 0x1d9   :  { %989 = vmatprep.mubr.bf16.mxu0 %v283_v52 }
 0x1da   :  { %990 = vmatmul.mubr.bf16.vlgmr.msra.gmra.mrb[4].mxu0 %v284_v51 }
 0x1db   :  { %1014 = vmatpush3.bf16.msra.mxu0 %v1087_v55 }
 0x1dc   :  { %1015 = vmatprep.subr.bf16.mxu0 %v1088_v56 }
 0x1df   :  { %1016 = vmatpush3.bf16.msra.mxu0 %v1088_v56 }
 0x1e0   :  { %1017 = vmatprep.subr.bf16.mxu0 %v1089_v57 }
 0x1e3   :  { %1018 = vmatpush3.bf16.msra.mxu0 %v1089_v57 }
 0x1e4   :  { %1019 = vmatprep.subr.bf16.mxu0 %v1090_v58 }
 0x1e7   :  { %1020 = vmatpush3.bf16.msra.mxu0 %v1090_v58 }
 0x1e8   :  { %1021 = vmatprep.subr.bf16.mxu0 %v1091_v59 }
 0x1eb   :  { %1022 = vmatpush3.bf16.msra.mxu0 %v1091_v59 }
 0x1ec   :  { %1023 = vmatprep.subr.bf16.mxu0 %v1092_v60 }
 0x1ef   :  { %1024 = vmatpush3.bf16.msra.mxu0 %v1092_v60 }
 0x1f0   :  { %1025 = vmatprep.subr.bf16.mxu0 %v1093_v12 }
 0x1f3   :  { %1026 = vmatpush3.bf16.msra.mxu0 %v1093_v12 }
 0x1f4   :  { %1027 = vmatprep.subr.bf16.mxu0 %v1094_v13 }
 0x1f7   :  { %1028 = vmatpush3.bf16.msra.mxu0 %v1094_v13 }
 0x2ad   :  { %v991_v62 = vpop.f32.mrb[4].mxu0 }
 0x2ae   :  { %v397_v63 = vadd.f32 %v991_v62, %v818_v61  ;;  %v388_v0 = vpop.f32.mrb[5].mxu0 }
 0x2af   :  { %v389_v1 = vadd.f32 %v818_v61, %v388_v0  ;;  %v992_v2 = vpop.f32.mrb[6].mxu0 }
 0x2b0   :  { %v400_v3 = vadd.f32 %v992_v2, %v818_v61  ;;  %v391_v4 = vpop.f32.mrb[7].mxu0  ;;  %v405_v6 = vmax.f32 %v397_v63, 0.0 }
 0x2b1   :  { %v392_v5 = vadd.f32 %v818_v61, %v391_v4  ;;  %v403_v8 = vmax.f32 %v389_v1, 0.0 }
 0x2b2   :  { %v406_v7 = vmax.f32 %v400_v3, 0.0 }
 0x2b3   :  { %v404_v9 = vmax.f32 %v392_v5, 0.0 }
 0x2b4   :  { %v408_v10 = vpack.c.bf16 %v406_v7, %v405_v6 }
 0x2b5   :  { %v407_v11 = vpack.c.bf16 %v404_v9, %v403_v8 }
 0x2b7   :  { %1009 = vmatprep.mubr.bf16.mxu1 %v407_v11 }
 0x2b8   :  { %1010 = vmatmul.mubr.bf16.vlgmr.msra.gmra.mrb[4].mxu1 %v408_v10 }
 0x2b9   :  { %1034 = vmatpush3.bf16.msra.mxu1 %v1095_v14 }
 0x2ba   :  { %1035 = vmatprep.subr.bf16.mxu1 %v1096_v15 }
 0x2bd   :  { %1036 = vmatpush3.bf16.msra.mxu1 %v1096_v15 }
 0x2be   :  { %1037 = vmatprep.subr.bf16.mxu1 %v1097_v16 }
 0x2c1   :  { %1038 = vmatpush3.bf16.msra.mxu1 %v1097_v16 }
 0x2c2   :  { %1039 = vmatprep.subr.bf16.mxu1 %v1098_v17 }
 0x2c5   :  { %1040 = vmatpush3.bf16.msra.mxu1 %v1098_v17 }
 0x2c6   :  { %1041 = vmatprep.subr.bf16.mxu1 %v1099_v18 }
 0x2c9   :  { %1042 = vmatpush3.bf16.msra.mxu1 %v1099_v18 }
 0x2ca   :  { %1043 = vmatprep.subr.bf16.mxu1 %v1100_v19 }
 0x2cd   :  { %1044 = vmatpush3.bf16.msra.mxu1 %v1100_v19 }
 0x2ce   :  { %1045 = vmatprep.subr.bf16.mxu1 %v1101_v35 }
 0x2d1   :  { %1046 = vmatpush3.bf16.msra.mxu1 %v1101_v35 }
 0x2d2   :  { %1047 = vmatprep.subr.bf16.mxu1 %v1102_v36 }
 0x2d5   :  { %1048 = vmatpush3.bf16.msra.mxu1 %v1102_v36 }
 0x38b   :  { %v1011_v21 = vpop.f32.mrb[4].mxu1 }
 0x38c   :  { %v521_v22 = vadd.f32 %v1011_v21, %v827_v20  ;;  %v512_v23 = vpop.f32.mrb[5].mxu1 }
 0x38d   :  { %v513_v24 = vadd.f32 %v827_v20, %v512_v23  ;;  %v1012_v25 = vpop.f32.mrb[6].mxu1 }
 0x38e   :  { %v524_v26 = vadd.f32 %v1012_v25, %v827_v20  ;;  %v515_v27 = vpop.f32.mrb[7].mxu1  ;;  %v529_v29 = vmax.f32 %v521_v22, 0.0 }
 0x38f   :  { %v516_v28 = vadd.f32 %v827_v20, %v515_v27  ;;  %v527_v31 = vmax.f32 %v513_v24, 0.0 }
 0x390   :  { %v530_v30 = vmax.f32 %v524_v26, 0.0 }
 0x391   :  { %v528_v32 = vmax.f32 %v516_v28, 0.0 }
 0x392   :  { %v532_v33 = vpack.c.bf16 %v530_v30, %v529_v29 }
 0x393   :  { %v531_v34 = vpack.c.bf16 %v528_v32, %v527_v31 }
 0x395   :  { %1029 = vmatprep.mubr.bf16.mxu0 %v531_v34 }
 0x396   :  { %1030 = vmatmul.mubr.bf16.vlgmr.msra.gmra.mrb[8].mxu0 %v532_v33 }
 0x469   :  { %v1031_v38 = vpop.f32.mrb[8].mxu0 }
 0x46a   :  { %v645_v39 = vadd.f32 %v1031_v38, %v836_v37  ;;  %v636_v40 = vpop.f32.mrb[9].mxu0 }
 0x46b   :  { %v637_v41 = vadd.f32 %v836_v37, %v636_v40  ;;  %v1032_v42 = vpop.f32.mrb[10].mxu0 }
 0x46c   :  { %v648_v43 = vadd.f32 %v1032_v42, %v836_v37  ;;  %v639_v44 = vpop.f32.mrb[11].mxu0  ;;  %v653_v46 = vmax.f32 %v645_v39, 0.0 }
 0x46d   :  { %v640_v45 = vadd.f32 %v836_v37, %v639_v44  ;;  %v651_v48 = vmax.f32 %v637_v41, 0.0 }
 0x46e   :  { %v654_v47 = vmax.f32 %v648_v43, 0.0 }
 0x46f   :  { %v652_v49 = vmax.f32 %v640_v45, 0.0 }
 0x470   :  { %v656_v50 = vpack.c.bf16 %v654_v47, %v653_v46 }
 0x471   :  { %v655_v51 = vpack.c.bf16 %v652_v49, %v651_v48 }
 0x473   :  { %1049 = vmatprep.mubr.bf16.mxu1 %v655_v51 }
 0x474   :  { %1050 = vmatmul.mubr.bf16.vlgmr.msra.gmra.mrb[8].mxu1 %v656_v50 }
 0x547   :  { %v1051_v52 = vpop.f32.mrb[8].mxu1 }
 0x548   :  { %v760_v54 = vpop.f32.mrb[9].mxu1  ;;  %v769_v56 = vadd.f32 %v1051_v52, %v845_v53 }
 0x549   :  { %v1052_v55 = vpop.f32.mrb[10].mxu1  ;;  %v761_v59 = vadd.f32 %v845_v53, %v760_v54 }
 0x54a   :  { %v772_v57 = vadd.f32 %v1052_v55, %v845_v53  ;;  %v763_v58 = vpop.f32.mrb[11].mxu1 }
 0x54b   :  { %v764_v60 = vadd.f32 %v845_v53, %v763_v58 }
 0x54c   :  { %v870_v61 = vpack.c.bf16 %v772_v57, %v769_v56 }
 0x54d   :  { %v865_v62 = vpack.c.bf16 %v764_v60, %v761_v59 }
 0x54e   :  { %872 = vst [vmem:[%s1327_s8 + $0x8] sm:$0xff] %v870_v61  }
 0x54f   :  { %866 = vst [vmem:[%s1327_s8] sm:$0xff] %v865_v62  }

// kernel: model2_forward.6
= control target key start
LH: loop header
LB: loop body
LE: loop exit
PB: predicated region body
PF: predicated region fallthrough
CT: control target
= control target key end

     0   :  { %v1008_v0 = vmov 0.0   ;;  %vm1009_vm0 = vmmov 0   ;;  %s1280_s1 = inlined_call_operand.vmem [shape: bf16[128,128], index: 1, kind: input, shape index: {}]   ;;  %s1281_s2 = inlined_call_operand.vmem [shape: bf16[128,128], index: 2, kind: input, shape index: {}]   ;;  %s1282_s0 = inlined_call_operand.vmem [shape: bf16[16,128], index: 0, kind: input, shape index: {}]   ;;  %s1283_s3 = inlined_call_operand.vmem [shape: bf16[128,128], index: 3, kind: input, shape index: {}]   ;;  %s1284_s4 = inlined_call_operand.vmem [shape: bf16[128,128], index: 4, kind: input, shape index: {}]   ;;  %s1285_s7 = inlined_call_operand.vmem [shape: f32[8,128], index: 7, kind: input, shape index: {}]   ;;  %s1286_s5 = inlined_call_operand.vmem [shape: bf16[128,128], index: 5, kind: input, shape index: {}]   ;;  %s1287_s6 = inlined_call_operand.vmem [shape: bf16[128,128], index: 6, kind: input, shape index: {}]   ;;  %s1288_s8 = inlined_call_operand.vmem [shape: bf16[16,128], index: 8, kind: output, shape index: {}]  }
   0x1   :  { %837 = vmatprep.subr.bf16.mxu0 %v1008_v0  ;;  %v959_v1 = vld [vmem:[%s1280_s1] sm:$0xff]   ;;  %853 = vmatprep.mubr.msk.bf16.mxu0 %vm1009_vm0, %v1008_v0  ;;  %v960_v2 = vld [vmem:[%s1280_s1 + $0x8] sm:$0xff]   ;;  %v961_v3 = vld [vmem:[%s1280_s1 + $0x10] sm:$0xff]  }
   0x2   :  { %857 = vmatprep.subr.bf16.mxu1 %v1008_v0  ;;  %873 = vmatprep.mubr.msk.bf16.mxu1 %vm1009_vm0, %v1008_v0  ;;  %v968_v4 = vld [vmem:[%s1281_s2] sm:$0xff]   ;;  %v962_v5 = vld [vmem:[%s1280_s1 + $0x18] sm:$0xff]   ;;  %v969_v6 = vld [vmem:[%s1281_s2 + $0x8] sm:$0xff]  }
   0x3   :  { %838 = vmatpush3.bf16.msra.mxu0 %v959_v1  ;;  %858 = vmatpush3.bf16.msra.mxu1 %v968_v4  ;;  %v963_v7 = vld [vmem:[%s1280_s1 + $0x20] sm:$0xff]   ;;  %v970_v8 = vld [vmem:[%s1281_s2 + $0x10] sm:$0xff]   ;;  %v964_v9 = vld [vmem:[%s1280_s1 + $0x28] sm:$0xff]  }
   0x4   :  { %839 = vmatprep.subr.bf16.mxu0 %v1008_v0  ;;  %859 = vmatprep.subr.bf16.mxu1 %v1008_v0  ;;  %v971_v10 = vld [vmem:[%s1281_s2 + $0x18] sm:$0xff]   ;;  %v965_v11 = vld [vmem:[%s1280_s1 + $0x30] sm:$0xff]   ;;  %v972_v12 = vld [vmem:[%s1281_s2 + $0x20] sm:$0xff]  }
   0x5   :  { %v966_v13 = vld [vmem:[%s1280_s1 + $0x38] sm:$0xff]   ;;  %v973_v14 = vld [vmem:[%s1281_s2 + $0x28] sm:$0xff]   ;;  %v967_v15 = vld [vmem:[%s1282_s0] sm:$0xff]  }
   0x6   :  { %v974_v16 = vld [vmem:[%s1281_s2 + $0x30] sm:$0xff]   ;;  %v975_v17 = vld [vmem:[%s1281_s2 + $0x38] sm:$0xff]   ;;  %v976_v18 = vld [vmem:[%s1283_s3] sm:$0xff]  }
   0x7   :  { %840 = vmatpush3.bf16.msra.mxu0 %v960_v2  ;;  %860 = vmatpush3.bf16.msra.mxu1 %v969_v6  ;;  %v977_v19 = vld [vmem:[%s1283_s3 + $0x8] sm:$0xff]   ;;  %v978_v20 = vld [vmem:[%s1283_s3 + $0x10] sm:$0xff]   ;;  %v979_v21 = vld [vmem:[%s1283_s3 + $0x18] sm:$0xff]  }
   0x8   :  { %841 = vmatprep.subr.bf16.mxu0 %v1008_v0  ;;  %861 = vmatprep.subr.bf16.mxu1 %v1008_v0  ;;  %v980_v22 = vld [vmem:[%s1283_s3 + $0x20] sm:$0xff]   ;;  %v981_v23 = vld [vmem:[%s1283_s3 + $0x28] sm:$0xff]   ;;  %v982_v29 = vld [vmem:[%s1283_s3 + $0x30] sm:$0xff]  }
   0x9   :  { %v983_v30 = vld [vmem:[%s1283_s3 + $0x38] sm:$0xff]   ;;  %v984_v31 = vld [vmem:[%s1284_s4] sm:$0xff]   ;;  %v985_v32 = vld [vmem:[%s1284_s4 + $0x8] sm:$0xff]  }
   0xa   :  { %v986_v33 = vld [vmem:[%s1284_s4 + $0x10] sm:$0xff]   ;;  %v987_v34 = vld [vmem:[%s1284_s4 + $0x18] sm:$0xff]   ;;  %v988_v35 = vld [vmem:[%s1284_s4 + $0x20] sm:$0xff]  }
   0xb   :  { %842 = vmatpush3.bf16.msra.mxu0 %v961_v3  ;;  %862 = vmatpush3.bf16.msra.mxu1 %v970_v8  ;;  %v989_v36 = vld [vmem:[%s1284_s4 + $0x28] sm:$0xff]   ;;  %v729_v37 = vld [vmem:[%s1285_s7] ss:$0 sm:$0xff]  ;;  %v990_v47 = vld [vmem:[%s1284_s4 + $0x30] sm:$0xff]  }
   0xc   :  { %843 = vmatprep.subr.bf16.mxu0 %v1008_v0  ;;  %863 = vmatprep.subr.bf16.mxu1 %v1008_v0  ;;  %v991_v48 = vld [vmem:[%s1284_s4 + $0x38] sm:$0xff]   ;;  %v992_v49 = vld [vmem:[%s1286_s5] sm:$0xff]   ;;  %v993_v50 = vld [vmem:[%s1286_s5 + $0x8] sm:$0xff]  }
   0xd   :  { %v994_v51 = vld [vmem:[%s1286_s5 + $0x10] sm:$0xff]   ;;  %v995_v52 = vld [vmem:[%s1286_s5 + $0x18] sm:$0xff]   ;;  %v996_v53 = vld [vmem:[%s1286_s5 + $0x20] sm:$0xff]  }
   0xe   :  { %v997_v54 = vld [vmem:[%s1286_s5 + $0x28] sm:$0xff]   ;;  %v738_v55 = vld [vmem:[%s1285_s7 + $0x1] ss:$0 sm:$0xff]  ;;  %v998_v2 = vld [vmem:[%s1286_s5 + $0x30] sm:$0xff]  }
   0xf   :  { %844 = vmatpush3.bf16.msra.mxu0 %v962_v5  ;;  %864 = vmatpush3.bf16.msra.mxu1 %v971_v10  ;;  %v999_v3 = vld [vmem:[%s1286_s5 + $0x38] sm:$0xff]   ;;  %v1000_v4 = vld [vmem:[%s1287_s6] sm:$0xff]   ;;  %v1001_v5 = vld [vmem:[%s1287_s6 + $0x8] sm:$0xff]  }
  0x10   :  { %845 = vmatprep.subr.bf16.mxu0 %v1008_v0  ;;  %865 = vmatprep.subr.bf16.mxu1 %v1008_v0  ;;  %v1002_v6 = vld [vmem:[%s1287_s6 + $0x10] sm:$0xff]   ;;  %v1004_v8 = vld [vmem:[%s1287_s6 + $0x20] sm:$0xff]  }
  0x11   :  { %v747_v10 = vld [vmem:[%s1285_s7 + $0x2] ss:$0 sm:$0xff] }
  0x13   :  { %846 = vmatpush3.bf16.msra.mxu0 %v963_v7  ;;  %866 = vmatpush3.bf16.msra.mxu1 %v972_v12  ;;  %v1003_v7 = vld [vmem:[%s1287_s6 + $0x18] sm:$0xff]  }
  0x14   :  { %847 = vmatprep.subr.bf16.mxu0 %v1008_v0  ;;  %867 = vmatprep.subr.bf16.mxu1 %v1008_v0 }
  0x17   :  { %848 = vmatpush3.bf16.msra.mxu0 %v964_v9  ;;  %868 = vmatpush3.bf16.msra.mxu1 %v973_v14  ;;  %v1005_v9 = vld [vmem:[%s1287_s6 + $0x28] sm:$0xff]  }
  0x18   :  { %849 = vmatprep.subr.bf16.mxu0 %v1008_v0  ;;  %869 = vmatprep.subr.bf16.mxu1 %v1008_v0 }
  0x1b   :  { %850 = vmatpush3.bf16.msra.mxu0 %v965_v11  ;;  %870 = vmatpush3.bf16.msra.mxu1 %v974_v16 }
  0x1c   :  { %851 = vmatprep.subr.bf16.mxu0 %v1008_v0  ;;  %871 = vmatprep.subr.bf16.mxu1 %v1008_v0 }
  0x1f   :  { %852 = vmatpush3.bf16.msra.mxu0 %v966_v13  ;;  %872 = vmatpush3.bf16.msra.mxu1 %v975_v17 }
  0x20   :  { %877 = vmatprep.subr.bf16.mxu0 %v1008_v0  ;;  %897 = vmatprep.subr.bf16.mxu1 %v1008_v0 }
  0x22   :  { %854 = vmatmul.mubr.bf16.vlgmr.msra.gmra.mrb[0].mxu0 %v967_v15 }
  0x23   :  { %893 = vmatprep.mubr.msk.bf16.mxu0 %vm1009_vm0, %v1008_v0  ;;  %878 = vmatpush3.bf16.msra.mxu0 %v976_v18 }
  0x24   :  { %879 = vmatprep.subr.bf16.mxu0 %v1008_v0 }
  0x27   :  { %880 = vmatpush3.bf16.msra.mxu0 %v977_v19 }
  0x28   :  { %881 = vmatprep.subr.bf16.mxu0 %v1008_v0 }
  0x2b   :  { %882 = vmatpush3.bf16.msra.mxu0 %v978_v20  ;;  %v1006_v20 = vld [vmem:[%s1287_s6 + $0x30] sm:$0xff]  }
  0x2c   :  { %883 = vmatprep.subr.bf16.mxu0 %v1008_v0 }
  0x2f   :  { %884 = vmatpush3.bf16.msra.mxu0 %v979_v21  ;;  %v1007_v21 = vld [vmem:[%s1287_s6 + $0x38] sm:$0xff]  }
  0x30   :  { %885 = vmatprep.subr.bf16.mxu0 %v1008_v0 }
  0x33   :  { %886 = vmatpush3.bf16.msra.mxu0 %v980_v22  ;;  %v756_v22 = vld [vmem:[%s1285_s7 + $0x3] ss:$0 sm:$0xff] }
  0x34   :  { %887 = vmatprep.subr.bf16.mxu0 %v1008_v0 }
  0x37   :  { %888 = vmatpush3.bf16.msra.mxu0 %v981_v23 }
  0x38   :  { %889 = vmatprep.subr.bf16.mxu0 %v1008_v0 }
  0x3b   :  { %890 = vmatpush3.bf16.msra.mxu0 %v982_v29 }
  0x3c   :  { %891 = vmatprep.subr.bf16.mxu0 %v1008_v0 }
  0x3f   :  { %892 = vmatpush3.bf16.msra.mxu0 %v983_v30 }
  0x40   :  { %917 = vmatprep.subr.bf16.mxu0 %v1008_v0 }
  0xf5   :  { %v136_v24 = vpop.f32.mrb[0].mxu0 }
  0xf6   :  { %v855_v25 = vpop.f32.mrb[1].mxu0 }
  0xf7   :  { %v139_v26 = vpop.f32.mrb[2].mxu0 }
  0xf8   :  { %v143_v27 = vpack.c.bf16 %v139_v26, %v136_v24  ;;  %v856_v28 = vpop.f32.mrb[3].mxu0 }
  0xfa   :  { %874 = vmatmul.mubr.bf16.vlgmr.msra.gmra.mrb[0].mxu1 %v143_v27 }
  0xfb   :  { %913 = vmatprep.mubr.msk.bf16.mxu1 %vm1009_vm0, %v1008_v0  ;;  %898 = vmatpush3.bf16.msra.mxu1 %v984_v31 }
  0xfc   :  { %899 = vmatprep.subr.bf16.mxu1 %v1008_v0 }
  0xff   :  { %900 = vmatpush3.bf16.msra.mxu1 %v985_v32 }
 0x100   :  { %901 = vmatprep.subr.bf16.mxu1 %v1008_v0 }
 0x103   :  { %902 = vmatpush3.bf16.msra.mxu1 %v986_v33 }
 0x104   :  { %903 = vmatprep.subr.bf16.mxu1 %v1008_v0 }
 0x107   :  { %904 = vmatpush3.bf16.msra.mxu1 %v987_v34 }
 0x108   :  { %905 = vmatprep.subr.bf16.mxu1 %v1008_v0 }
 0x10b   :  { %906 = vmatpush3.bf16.msra.mxu1 %v988_v35 }
 0x10c   :  { %907 = vmatprep.subr.bf16.mxu1 %v1008_v0 }
 0x10f   :  { %908 = vmatpush3.bf16.msra.mxu1 %v989_v36 }
 0x110   :  { %909 = vmatprep.subr.bf16.mxu1 %v1008_v0 }
 0x113   :  { %910 = vmatpush3.bf16.msra.mxu1 %v990_v47 }
 0x114   :  { %911 = vmatprep.subr.bf16.mxu1 %v1008_v0 }
 0x117   :  { %912 = vmatpush3.bf16.msra.mxu1 %v991_v48 }
 0x118   :  { %937 = vmatprep.subr.bf16.mxu1 %v1008_v0 }
 0x1cd   :  { %v247_v38 = vpop.f32.mrb[0].mxu1 }
 0x1ce   :  { %v248_v39 = vadd.f32 %v729_v37, %v247_v38  ;;  %v875_v40 = vpop.f32.mrb[1].mxu1 }
 0x1cf   :  { %v250_v41 = vpop.f32.mrb[2].mxu1 }
 0x1d0   :  { %v251_v42 = vadd.f32 %v729_v37, %v250_v41  ;;  %v876_v43 = vpop.f32.mrb[3].mxu1  ;;  %v254_v44 = vmax.f32 %v248_v39, 0.0 }
 0x1d2   :  { %v255_v45 = vmax.f32 %v251_v42, 0.0 }
 0x1d4   :  { %v256_v46 = vpack.c.bf16 %v255_v45, %v254_v44 }
 0x1d6   :  { %894 = vmatmul.mubr.bf16.vlgmr.msra.gmra.mrb[4].mxu0 %v256_v46 }
 0x1d7   :  { %933 = vmatprep.mubr.msk.bf16.mxu0 %vm1009_vm0, %v1008_v0  ;;  %918 = vmatpush3.bf16.msra.mxu0 %v992_v49 }
 0x1d8   :  { %919 = vmatprep.subr.bf16.mxu0 %v1008_v0 }
 0x1db   :  { %920 = vmatpush3.bf16.msra.mxu0 %v993_v50 }
 0x1dc   :  { %921 = vmatprep.subr.bf16.mxu0 %v1008_v0 }
 0x1df   :  { %922 = vmatpush3.bf16.msra.mxu0 %v994_v51 }
 0x1e0   :  { %923 = vmatprep.subr.bf16.mxu0 %v1008_v0 }
 0x1e3   :  { %924 = vmatpush3.bf16.msra.mxu0 %v995_v52 }
 0x1e4   :  { %925 = vmatprep.subr.bf16.mxu0 %v1008_v0 }
 0x1e7   :  { %926 = vmatpush3.bf16.msra.mxu0 %v996_v53 }
 0x1e8   :  { %927 = vmatprep.subr.bf16.mxu0 %v1008_v0 }
 0x1eb   :  { %928 = vmatpush3.bf16.msra.mxu0 %v997_v54 }
 0x1ec   :  { %929 = vmatprep.subr.bf16.mxu0 %v1008_v0 }
 0x1ef   :  { %930 = vmatpush3.bf16.msra.mxu0 %v998_v2 }
 0x1f0   :  { %931 = vmatprep.subr.bf16.mxu0 %v1008_v0 }
 0x1f3   :  { %932 = vmatpush3.bf16.msra.mxu0 %v999_v3 }
 0x2a9   :  { %v360_v56 = vpop.f32.mrb[4].mxu0 }
 0x2aa   :  { %v361_v57 = vadd.f32 %v738_v55, %v360_v56  ;;  %v895_v58 = vpop.f32.mrb[5].mxu0 }
 0x2ab   :  { %v363_v59 = vpop.f32.mrb[6].mxu0 }
 0x2ac   :  { %v364_v60 = vadd.f32 %v738_v55, %v363_v59  ;;  %v896_v61 = vpop.f32.mrb[7].mxu0  ;;  %v367_v62 = vmax.f32 %v361_v57, 0.0 }
 0x2ae   :  { %v368_v63 = vmax.f32 %v364_v60, 0.0 }
 0x2b0   :  { %v369_v1 = vpack.c.bf16 %v368_v63, %v367_v62 }
 0x2b2   :  { %914 = vmatmul.mubr.bf16.vlgmr.msra.gmra.mrb[4].mxu1 %v369_v1 }
 0x2b3   :  { %953 = vmatprep.mubr.msk.bf16.mxu1 %vm1009_vm0, %v1008_v0  ;;  %938 = vmatpush3.bf16.msra.mxu1 %v1000_v4 }
 0x2b4   :  { %939 = vmatprep.subr.bf16.mxu1 %v1008_v0 }
 0x2b7   :  { %940 = vmatpush3.bf16.msra.mxu1 %v1001_v5 }
 0x2b8   :  { %941 = vmatprep.subr.bf16.mxu1 %v1008_v0 }
 0x2bb   :  { %942 = vmatpush3.bf16.msra.mxu1 %v1002_v6 }
 0x2bc   :  { %943 = vmatprep.subr.bf16.mxu1 %v1008_v0 }
 0x2bf   :  { %944 = vmatpush3.bf16.msra.mxu1 %v1003_v7 }
 0x2c0   :  { %945 = vmatprep.subr.bf16.mxu1 %v1008_v0 }
 0x2c3   :  { %946 = vmatpush3.bf16.msra.mxu1 %v1004_v8 }
 0x2c4   :  { %947 = vmatprep.subr.bf16.mxu1 %v1008_v0 }
 0x2c7   :  { %948 = vmatpush3.bf16.msra.mxu1 %v1005_v9 }
 0x2c8   :  { %949 = vmatprep.subr.bf16.mxu1 %v1008_v0 }
 0x2cb   :  { %950 = vmatpush3.bf16.msra.mxu1 %v1006_v20 }
 0x2cc   :  { %951 = vmatprep.subr.bf16.mxu1 %v1008_v0  ;;  %v765_v0 = vld [vmem:[%s1285_s7 + $0x4] ss:$0 sm:$0xff] }
 0x2cf   :  { %952 = vmatpush3.bf16.msra.mxu1 %v1007_v21 }
 0x385   :  { %v473_v11 = vpop.f32.mrb[4].mxu1 }
 0x386   :  { %v474_v12 = vadd.f32 %v747_v10, %v473_v11  ;;  %v915_v13 = vpop.f32.mrb[5].mxu1 }
 0x387   :  { %v476_v14 = vpop.f32.mrb[6].mxu1 }
 0x388   :  { %v477_v15 = vadd.f32 %v747_v10, %v476_v14  ;;  %v916_v16 = vpop.f32.mrb[7].mxu1  ;;  %v480_v17 = vmax.f32 %v474_v12, 0.0 }
 0x38a   :  { %v481_v18 = vmax.f32 %v477_v15, 0.0 }
 0x38c   :  { %v482_v19 = vpack.c.bf16 %v481_v18, %v480_v17 }
 0x38e   :  { %934 = vmatmul.mubr.bf16.vlgmr.msra.gmra.mrb[8].mxu0 %v482_v19 }
 0x461   :  { %v586_v23 = vpop.f32.mrb[8].mxu0 }
 0x462   :  { %v587_v24 = vadd.f32 %v756_v22, %v586_v23  ;;  %v935_v25 = vpop.f32.mrb[9].mxu0 }
 0x463   :  { %v589_v26 = vpop.f32.mrb[10].mxu0 }
 0x464   :  { %v590_v27 = vadd.f32 %v756_v22, %v589_v26  ;;  %v936_v28 = vpop.f32.mrb[11].mxu0  ;;  %v593_v29 = vmax.f32 %v587_v24, 0.0 }
 0x466   :  { %v594_v30 = vmax.f32 %v590_v27, 0.0 }
 0x468   :  { %v595_v31 = vpack.c.bf16 %v594_v30, %v593_v29 }
 0x46a   :  { %954 = vmatmul.mubr.bf16.vlgmr.msra.gmra.mrb[8].mxu1 %v595_v31 }
 0x53d   :  { %v699_v32 = vpop.f32.mrb[8].mxu1 }
 0x53e   :  { %v955_v33 = vpop.f32.mrb[9].mxu1  ;;  %v700_v35 = vadd.f32 %v765_v0, %v699_v32 }
 0x53f   :  { %v702_v34 = vpop.f32.mrb[10].mxu1 }
 0x540   :  { %v703_v36 = vadd.f32 %v765_v0, %v702_v34  ;;  %v956_v37 = vpop.f32.mrb[11].mxu1 }
 0x542   :  { %v781_v38 = vpack.c.bf16 %v703_v36, %v700_v35 }
 0x544   :  { %782 = vst [vmem:[%s1288_s8] sm:$0xff] %v781_v38  }

// kernel: model2_forward.7
= control target key start
LH: loop header
LB: loop body
LE: loop exit
PB: predicated region body
PF: predicated region fallthrough
CT: control target
= control target key end

     0   :  { %v2655_v1 = vmov 0.0   ;;  %vm2656_vm0 = vmmov 0   ;;  %vm37_vm1 = vcmask 130048   ;;  %s3396_s0 = inlined_call_operand.vmem [shape: bf16[2,16], index: 0, kind: input, shape index: {}]   ;;  %s3397_s1 = inlined_call_operand.vmem [shape: bf16[16,128], index: 1, kind: input, shape index: {}]   ;;  %s3398_s2 = inlined_call_operand.vmem [shape: bf16[128,128], index: 2, kind: input, shape index: {}]   ;;  %s3399_s3 = inlined_call_operand.vmem [shape: bf16[128,384], index: 3, kind: input, shape index: {}]   ;;  %s3400_s4 = inlined_call_operand.vmem [shape: bf16[384,640], index: 4, kind: input, shape index: {}]   ;;  %s3401_s5 = inlined_call_operand.vmem [shape: bf16[640,128], index: 5, kind: input, shape index: {}]   ;;  %s3402_s6 = inlined_call_operand.vmem [shape: f32[8,640], index: 6, kind: input, shape index: {}]   ;;  %s3403_s7 = inlined_call_operand.hbm [shape: f32[2,128], index: 7, kind: output, shape index: {}]  }
   0x1   :  { %v2378_v0 = vld [vmem:[%s3397_s1] sm:$0xff]   ;;  %2276 = vmatprep.subr.bf16.mxu0 %v2655_v1  ;;  %2282 = vmatprep.subr.bf16.mxu1 %v2655_v1  ;;  %v2380_v4 = vld [vmem:[%s3398_s2 + $0x8] sm:$0xff]   ;;  %v2381_v5 = vld [vmem:[%s3398_s2 + $0x10] sm:$0xff]  }
   0x2   :  { %v28_v2 = vld [vmem:[%s3396_s0] sm:$0x1]  ;;  %2277 = vmatpush3.bf16.msra.mxu0 %v2378_v0  ;;  %2278 = vmatprep.mubr.msk.bf16.mxu0 %vm2656_vm0, %v2655_v1  ;;  %v2382_v6 = vld [vmem:[%s3398_s2 + $0x18] sm:$0xff]   ;;  %v2384_v8 = vld [vmem:[%s3398_s2 + $0x28] sm:$0xff]  }
   0x3   :  { %v2379_v3 = vld [vmem:[%s3398_s2] sm:$0xff]   ;;  %2298 = vmatprep.mubr.msk.bf16.mxu1 %vm2656_vm0, %v2655_v1  ;;  %v2385_v9 = vld [vmem:[%s3398_s2 + $0x30] sm:$0xff]   ;;  %v2386_v10 = vld [vmem:[%s3398_s2 + $0x38] sm:$0xff]  }
   0x4   :  { %2283 = vmatpush3.bf16.msra.mxu1 %v2379_v3  ;;  %v2383_v7 = vld [vmem:[%s3398_s2 + $0x20] sm:$0xff]   ;;  %v2393_v13 = vld [vmem:[%s3399_s3 + $0x1c] ss:$12 sps:$4 sm:$0xff]  }
   0x5   :  { %2279 = vmatmul.mubr.msk.bf16.vlgmr.msra.gmra.mrb[0].mxu0 %vm37_vm1, %v28_v2  ;;  %2284 = vmatprep.subr.bf16.mxu1 %v2655_v1  ;;  %v2387_v11 = vld [vmem:[%s3399_s3] ss:$12 sps:$4 sm:$0xff]   ;;  %v2389_v12 = vld [vmem:[%s3399_s3 + $0x4] ss:$12 sps:$4 sm:$0xff]  }
   0x6   :  { %367 = vmatprep.subr.bf16.mxu0 %v2389_v12  ;;  %v2391_v14 = vld [vmem:[%s3399_s3 + $0x18] ss:$12 sps:$4 sm:$0xff]   ;;  %v2397_v15 = vld [vmem:[%s3399_s3 + $0x34] ss:$12 sps:$4 sm:$0xff]   ;;  %v2395_v16 = vld [vmem:[%s3399_s3 + $0x30] ss:$12 sps:$4 sm:$0xff]  }
   0x7   :  { %368 = vmatpush1.bf16.msra.mxu0 %v2387_v11 }
   0x8   :  { %2285 = vmatpush3.bf16.msra.mxu1 %v2380_v4  ;;  %369 = vmatprep.subr.bf16.mxu0 %v2393_v13 }
   0x9   :  { %2286 = vmatprep.subr.bf16.mxu1 %v2655_v1 }
   0xb   :  { %370 = vmatpush1.bf16.msra.mxu0 %v2391_v14 }
   0xc   :  { %2287 = vmatpush3.bf16.msra.mxu1 %v2381_v5 }
   0xd   :  { %2288 = vmatprep.subr.bf16.mxu1 %v2655_v1 }
  0x10   :  { %2289 = vmatpush3.bf16.msra.mxu1 %v2382_v6 }
  0x11   :  { %2290 = vmatprep.subr.bf16.mxu1 %v2655_v1 }
  0x14   :  { %2291 = vmatpush3.bf16.msra.mxu1 %v2383_v7 }
  0x15   :  { %2292 = vmatprep.subr.bf16.mxu1 %v2655_v1 }
  0x18   :  { %2293 = vmatpush3.bf16.msra.mxu1 %v2384_v8 }
  0x19   :  { %2294 = vmatprep.subr.bf16.mxu1 %v2655_v1 }
  0x1c   :  { %2295 = vmatpush3.bf16.msra.mxu1 %v2385_v9 }
  0x1d   :  { %2296 = vmatprep.subr.bf16.mxu1 %v2655_v1 }
  0x20   :  { %2297 = vmatpush3.bf16.msra.mxu1 %v2386_v10 }
  0x21   :  { %2302 = vmatprep.subr.bf16.mxu1 %v2655_v1 }
  0x22   :  { %12 = vsyncpa [#allocation3], 0  ;;  %371 = vmatprep.subr.bf16.mxu0 %v2397_v15  ;;  %v2401_v17 = vld [vmem:[%s3399_s3 + $0x4c] ss:$12 sps:$4 sm:$0xff]   ;;  %v2399_v18 = vld [vmem:[%s3399_s3 + $0x48] ss:$12 sps:$4 sm:$0xff]  }
  0x23   :  { %372 = vmatpush1.bf16.msra.mxu0 %v2395_v16  ;;  %v2405_v19 = vld [vmem:[%s3399_s3 + $0x64] ss:$12 sps:$4 sm:$0xff]   ;;  %v2403_v20 = vld [vmem:[%s3399_s3 + $0x60] ss:$12 sps:$4 sm:$0xff]   ;;  %v2409_v21 = vld [vmem:[%s3399_s3 + $0x7c] ss:$12 sps:$4 sm:$0xff]  }
  0x24   :  { %373 = vmatprep.subr.bf16.mxu0 %v2401_v17  ;;  %v2407_v22 = vld [vmem:[%s3399_s3 + $0x78] ss:$12 sps:$4 sm:$0xff]   ;;  %v2413_v23 = vld [vmem:[%s3399_s3 + $0x94] ss:$12 sps:$4 sm:$0xff]   ;;  %v2411_v24 = vld [vmem:[%s3399_s3 + $0x90] ss:$12 sps:$4 sm:$0xff]  }
  0x25   :  { %v2390_v26 = vld [vmem:[%s3399_s3 + $0x8] ss:$12 sps:$4 sm:$0xff]   ;;  %v2394_v31 = vld [vmem:[%s3399_s3 + $0x20] ss:$12 sps:$4 sm:$0xff]   ;;  %v2398_v32 = vld [vmem:[%s3399_s3 + $0x38] ss:$12 sps:$4 sm:$0xff]  }
  0x26   :  { %v2402_v33 = vld [vmem:[%s3399_s3 + $0x50] ss:$12 sps:$4 sm:$0xff]   ;;  %v2406_v34 = vld [vmem:[%s3399_s3 + $0x68] ss:$12 sps:$4 sm:$0xff]   ;;  %v2410_v35 = vld [vmem:[%s3399_s3 + $0x80] ss:$12 sps:$4 sm:$0xff]  }
  0x27   :  { %374 = vmatpush1.bf16.msra.mxu0 %v2399_v18  ;;  %v2414_v36 = vld [vmem:[%s3399_s3 + $0x98] ss:$12 sps:$4 sm:$0xff]   ;;  %v2415_v38 = vld [vmem:[%s3399_s3 + $0xa8] ss:$12 sps:$4 sm:$0xff]   ;;  %v2418_v39 = vld [vmem:[%s3399_s3 + $0xb0] ss:$12 sps:$4 sm:$0xff]  }
  0x28   :  { %375 = vmatprep.subr.bf16.mxu0 %v2405_v19  ;;  %v2417_v37 = vld [vmem:[%s3399_s3 + $0xac] ss:$12 sps:$4 sm:$0xff]   ;;  %v2657_v40 = vmov 0   ;;  %v98_v43 = vld [vmem:[%s3402_s6] ss:$0 sm:$0xff]  ;;  %vm1947_vm2 = vcmask 1041408  }
  0x29   :  { %399 = vmatprep.mubr.bf16.mxu0 %v2657_v40  ;;  %v2421_v41 = vld [vmem:[%s3400_s4 + $0x4] ss:$20 sps:$4 sm:$0xff]   ;;  %v2424_v42 = vld [vmem:[%s3400_s4 + $0xc] ss:$20 sps:$4 sm:$0xff]   ;;  %v2422_v51 = vld [vmem:[%s3400_s4 + $0x8] ss:$20 sps:$4 sm:$0xff]  }
  0x2a   :  { %v2419_v50 = vld [vmem:[%s3400_s4] ss:$20 sps:$4 sm:$0xff]   ;;  %v2425_v55 = vld [vmem:[%s3400_s4 + $0x28] ss:$20 sps:$4 sm:$0xff]   ;;  %v2428_v56 = vld [vmem:[%s3400_s4 + $0x30] ss:$20 sps:$4 sm:$0xff]  }
  0x2b   :  { %376 = vmatpush1.bf16.msra.mxu0 %v2403_v20  ;;  %v2427_v53 = vld [vmem:[%s3400_s4 + $0x2c] ss:$20 sps:$4 sm:$0xff]   ;;  %v2430_v54 = vld [vmem:[%s3400_s4 + $0x34] ss:$20 sps:$4 sm:$0xff]   ;;  %v2436_v58 = vld [vmem:[%s3400_s4 + $0x5c] ss:$20 sps:$4 sm:$0xff]  }
  0x2c   :  { %377 = vmatprep.subr.bf16.mxu0 %v2409_v21  ;;  %v2433_v57 = vld [vmem:[%s3400_s4 + $0x54] ss:$20 sps:$4 sm:$0xff]   ;;  %v2431_v59 = vld [vmem:[%s3400_s4 + $0x50] ss:$20 sps:$4 sm:$0xff]   ;;  %v2434_v60 = vld [vmem:[%s3400_s4 + $0x58] ss:$20 sps:$4 sm:$0xff]  }
  0x2d   :  { %v2439_v61 = vld [vmem:[%s3400_s4 + $0x7c] ss:$20 sps:$4 sm:$0xff]   ;;  %v2442_v62 = vld [vmem:[%s3400_s4 + $0x84] ss:$20 sps:$4 sm:$0xff]   ;;  %v2440_v0 = vld [vmem:[%s3400_s4 + $0x80] ss:$20 sps:$4 sm:$0xff]  }
  0x2e   :  { %v2437_v63 = vld [vmem:[%s3400_s4 + $0x78] ss:$20 sps:$4 sm:$0xff]   ;;  %v2443_v4 = vld [vmem:[%s3400_s4 + $0xa0] ss:$20 sps:$4 sm:$0xff]   ;;  %v2446_v5 = vld [vmem:[%s3400_s4 + $0xa8] ss:$20 sps:$4 sm:$0xff]  }
  0x2f   :  { %378 = vmatpush1.bf16.msra.mxu0 %v2407_v22  ;;  %v2445_v2 = vld [vmem:[%s3400_s4 + $0xa4] ss:$20 sps:$4 sm:$0xff]   ;;  %v2448_v3 = vld [vmem:[%s3400_s4 + $0xac] ss:$20 sps:$4 sm:$0xff]   ;;  %v2454_v7 = vld [vmem:[%s3400_s4 + $0xd4] ss:$20 sps:$4 sm:$0xff]  }
  0x30   :  { %379 = vmatprep.subr.bf16.mxu0 %v2413_v23  ;;  %v2451_v6 = vld [vmem:[%s3400_s4 + $0xcc] ss:$20 sps:$4 sm:$0xff]   ;;  %v2449_v8 = vld [vmem:[%s3400_s4 + $0xc8] ss:$20 sps:$4 sm:$0xff]   ;;  %v2452_v9 = vld [vmem:[%s3400_s4 + $0xd0] ss:$20 sps:$4 sm:$0xff]  }
  0x31   :  { %v2457_v10 = vld [vmem:[%s3400_s4 + $0xf4] ss:$20 sps:$4 sm:$0xff]   ;;  %v2460_v11 = vld [vmem:[%s3400_s4 + $0xfc] ss:$20 sps:$4 sm:$0xff]   ;;  %v2458_v13 = vld [vmem:[%s3400_s4 + $0xf8] ss:$20 sps:$4 sm:$0xff]  }
  0x32   :  { %v2455_v12 = vld [vmem:[%s3400_s4 + $0xf0] ss:$20 sps:$4 sm:$0xff]   ;;  %v2461_v16 = vld [vmem:[%s3400_s4 + $0x118] ss:$20 sps:$4 sm:$0xff]   ;;  %v2464_v17 = vld [vmem:[%s3400_s4 + $0x120] ss:$20 sps:$4 sm:$0xff]  }
  0x33   :  { %380 = vmatpush1.bf16.msra.mxu0 %v2411_v24  ;;  %v2463_v14 = vld [vmem:[%s3400_s4 + $0x11c] ss:$20 sps:$4 sm:$0xff]   ;;  %v2466_v15 = vld [vmem:[%s3400_s4 + $0x124] ss:$20 sps:$4 sm:$0xff]   ;;  %v2472_v19 = vld [vmem:[%s3400_s4 + $0x14c] ss:$20 sps:$4 sm:$0xff]  }
  0x34   :  { %381 = vmatprep.subr.bf16.mxu0 %v2417_v37  ;;  %v2469_v18 = vld [vmem:[%s3400_s4 + $0x144] ss:$20 sps:$4 sm:$0xff]   ;;  %v2467_v20 = vld [vmem:[%s3400_s4 + $0x140] ss:$20 sps:$4 sm:$0xff]   ;;  %v2470_v21 = vld [vmem:[%s3400_s4 + $0x148] ss:$20 sps:$4 sm:$0xff]  }
  0x35   :  { %v2475_v22 = vld [vmem:[%s3400_s4 + $0x16c] ss:$20 sps:$4 sm:$0xff]   ;;  %v2478_v23 = vld [vmem:[%s3400_s4 + $0x174] ss:$20 sps:$4 sm:$0xff]  }
  0x36   :  { %v2473_v24 = vld [vmem:[%s3400_s4 + $0x168] ss:$20 sps:$4 sm:$0xff]  }
  0x37   :  { %382 = vmatpush1.bf16.msra.mxu0 %v2415_v38  ;;  %v2494_v37 = vld [vmem:[%s3400_s4 + $0x1e8] ss:$20 sps:$4 sm:$0xff]   ;;  %v2499_v38 = vld [vmem:[%s3400_s4 + $0x20c] ss:$20 sps:$4 sm:$0xff]  }
  0x38   :  { %1252 = vmatprep.subr.bf16.mxu0 %v2421_v41  ;;  %v2497_v41 = vld [vmem:[%s3400_s4 + $0x208] ss:$20 sps:$4 sm:$0xff]  }
  0xd8   :  { %v75_v25 = vpop.f32.mrb[0].mxu0 }
  0xd9   :  { %v81_v27 = vpack.c.bf16 %v75_v25, %v75_v25  ;;  %v2280_v28 = vpop.f32.mrb[1].mxu0  ;;  %v2476_v25 = vld [vmem:[%s3400_s4 + $0x170] ss:$20 sps:$4 sm:$0xff]  }
  0xda   :  { %v78_v29 = vpop.f32.mrb[2].mxu0  ;;  %v2479_v28 = vld [vmem:[%s3400_s4 + $0x190] ss:$20 sps:$4 sm:$0xff]  }
  0xdb   :  { %v2281_v30 = vpop.f32.mrb[3].mxu0  ;;  %2299 = vmatmul.mubr.bf16.vlgmr.msra.gmra.mrb[0].mxu1 %v81_v27  ;;  %v2484_v27 = vld [vmem:[%s3400_s4 + $0x19c] ss:$20 sps:$4 sm:$0xff]   ;;  %v2482_v29 = vld [vmem:[%s3400_s4 + $0x198] ss:$20 sps:$4 sm:$0xff]  }
  0xdc   :  { %2303 = vmatpush3.bf16.msra.mxu1 %v2390_v26  ;;  %2318 = vmatprep.mubr.msk.bf16.mxu1 %vm2656_vm0, %v2655_v1  ;;  %v2481_v26 = vld [vmem:[%s3400_s4 + $0x194] ss:$20 sps:$4 sm:$0xff]   ;;  %v2487_v30 = vld [vmem:[%s3400_s4 + $0x1bc] ss:$20 sps:$4 sm:$0xff]  }
  0xdd   :  { %2304 = vmatprep.subr.bf16.mxu1 %v2655_v1 }
  0xe0   :  { %2305 = vmatpush3.bf16.msra.mxu1 %v2394_v31  ;;  %v2490_v31 = vld [vmem:[%s3400_s4 + $0x1c4] ss:$20 sps:$4 sm:$0xff]  }
  0xe1   :  { %2306 = vmatprep.subr.bf16.mxu1 %v2655_v1 }
  0xe4   :  { %2307 = vmatpush3.bf16.msra.mxu1 %v2398_v32  ;;  %v2485_v32 = vld [vmem:[%s3400_s4 + $0x1b8] ss:$20 sps:$4 sm:$0xff]  }
  0xe5   :  { %2308 = vmatprep.subr.bf16.mxu1 %v2655_v1 }
  0xe8   :  { %2309 = vmatpush3.bf16.msra.mxu1 %v2402_v33  ;;  %v2488_v33 = vld [vmem:[%s3400_s4 + $0x1c0] ss:$20 sps:$4 sm:$0xff]  }
  0xe9   :  { %2310 = vmatprep.subr.bf16.mxu1 %v2655_v1 }
  0xec   :  { %2311 = vmatpush3.bf16.msra.mxu1 %v2406_v34  ;;  %v2493_v34 = vld [vmem:[%s3400_s4 + $0x1e4] ss:$20 sps:$4 sm:$0xff]  }
  0xed   :  { %2312 = vmatprep.subr.bf16.mxu1 %v2655_v1 }
  0xf0   :  { %2313 = vmatpush3.bf16.msra.mxu1 %v2410_v35  ;;  %v2496_v35 = vld [vmem:[%s3400_s4 + $0x1ec] ss:$20 sps:$4 sm:$0xff]  }
  0xf1   :  { %2314 = vmatprep.subr.bf16.mxu1 %v2655_v1 }
  0xf4   :  { %2315 = vmatpush3.bf16.msra.mxu1 %v2414_v36  ;;  %v2491_v36 = vld [vmem:[%s3400_s4 + $0x1e0] ss:$20 sps:$4 sm:$0xff]  }
  0xf5   :  { %2316 = vmatprep.subr.bf16.mxu1 %v2655_v1 }
  0xf8   :  { %2317 = vmatpush3.bf16.msra.mxu1 %v2418_v39  ;;  %v2502_v39 = vld [vmem:[%s3400_s4 + $0x214] ss:$20 sps:$4 sm:$0xff]  }
  0xf9   :  { %1334 = vmatprep.subr.bf16.mxu1 %v2424_v42  ;;  %v2500_v42 = vld [vmem:[%s3400_s4 + $0x210] ss:$20 sps:$4 sm:$0xff]  }
 0x1ae   :  { %v181_v44 = vpop.f32.mrb[0].mxu1 }
 0x1af   :  { %v182_v45 = vadd.f32 %v181_v44, %v98_v43  ;;  %v2300_v46 = vpop.f32.mrb[1].mxu1  ;;  %v2505_v43 = vld [vmem:[%s3400_s4 + $0x234] ss:$20 sps:$4 sm:$0xff]   ;;  %v2508_v44 = vld [vmem:[%s3400_s4 + $0x23c] ss:$20 sps:$4 sm:$0xff]  }
 0x1b0   :  { %v184_v47 = vpop.f32.mrb[2].mxu1  ;;  %v2506_v46 = vld [vmem:[%s3400_s4 + $0x238] ss:$20 sps:$4 sm:$0xff]  }
 0x1b1   :  { %v187_v48 = vmax.f32 %v182_v45, 0.0  ;;  %v2301_v49 = vpop.f32.mrb[3].mxu1  ;;  %v2503_v45 = vld [vmem:[%s3400_s4 + $0x230] ss:$20 sps:$4 sm:$0xff]  }
 0x1b2   :  { %v2511_v47 = vld [vmem:[%s3400_s4 + $0x25c] ss:$20 sps:$4 sm:$0xff]   ;;  %v2509_v49 = vld [vmem:[%s3400_s4 + $0x258] ss:$20 sps:$4 sm:$0xff]  }
 0x1b3   :  { %v188_v52 = vpack.c.bf16 %v187_v48, %v187_v48  ;;  %v2514_v48 = vld [vmem:[%s3400_s4 + $0x264] ss:$20 sps:$4 sm:$0xff]  }
 0x1b5   :  { %400 = vmatmul.mubr.bf16.vlgmr.msra.gmra.mrb[4].mxu0 %v188_v52  ;;  %2319 = vmatmul.mubr.bf16.vlgmr.msra.gmra.mrb[4].mxu1 %v188_v52  ;;  %v2520_v52 = vld [vmem:[%s3400_s4 + $0x28c] ss:$20 sps:$4 sm:$0xff]  }
 0x1b6   :  { %1253 = vmatpush1.bf16.msra.mxu0 %v2419_v50  ;;  %1335 = vmatpush1.bf16.msra.mxu1 %v2422_v51  ;;  %v2512_v50 = vld [vmem:[%s3400_s4 + $0x260] ss:$20 sps:$4 sm:$0xff]   ;;  %v2517_v51 = vld [vmem:[%s3400_s4 + $0x284] ss:$20 sps:$4 sm:$0xff]  }
 0x1b7   :  { %1254 = vmatprep.subr.bf16.mxu0 %v2427_v53  ;;  %1336 = vmatprep.subr.bf16.mxu1 %v2430_v54  ;;  %v224_v53 = vlaneseq }
 0x1b9   :  { %v3026_v54 = vshrl.u32 %v224_v53, 7  ;;  %v2570_v53 = vld [vmem:[%s3400_s4 + $0x60] ss:$20 sps:$4 sm:$0xff]  }
 0x1ba   :  { %1255 = vmatpush1.bf16.msra.mxu0 %v2425_v55  ;;  %1337 = vmatpush1.bf16.msra.mxu1 %v2428_v56  ;;  %v3032_v56 = vld [vmem:[%s3402_s6 + $0x1] ss:$8 sm:$0x7] }
 0x1bb   :  { %1256 = vmatprep.subr.bf16.mxu0 %v2433_v57  ;;  %1338 = vmatprep.subr.bf16.mxu1 %v2436_v58  ;;  %v226_v55 = vsub.s32 0, %v3026_v54  ;;  %v230_v57 = vsub.s32 1, %v3026_v54 }
 0x1bd   :  { %v227_v58 = vrot.slane %v3032_v56, %v226_v55 }
 0x1be   :  { %1257 = vmatpush1.bf16.msra.mxu0 %v2431_v59  ;;  %1339 = vmatpush1.bf16.msra.mxu1 %v2434_v60  ;;  %v231_v59 = vrot.slane %v3032_v56, %v230_v57 }
 0x1bf   :  { %1258 = vmatprep.subr.bf16.mxu0 %v2439_v61  ;;  %1340 = vmatprep.subr.bf16.mxu1 %v2442_v62 }
 0x1c2   :  { %1259 = vmatpush1.bf16.msra.mxu0 %v2437_v63  ;;  %1341 = vmatpush1.bf16.msra.mxu1 %v2440_v0 }
 0x1c3   :  { %1260 = vmatprep.subr.bf16.mxu0 %v2445_v2  ;;  %1342 = vmatprep.subr.bf16.mxu1 %v2448_v3 }
 0x1c6   :  { %1261 = vmatpush1.bf16.msra.mxu0 %v2443_v4  ;;  %1343 = vmatpush1.bf16.msra.mxu1 %v2446_v5 }
 0x1c7   :  { %1262 = vmatprep.subr.bf16.mxu0 %v2451_v6  ;;  %1344 = vmatprep.subr.bf16.mxu1 %v2454_v7 }
 0x1ca   :  { %1263 = vmatpush1.bf16.msra.mxu0 %v2449_v8  ;;  %1345 = vmatpush1.bf16.msra.mxu1 %v2452_v9 }
 0x1cb   :  { %1264 = vmatprep.subr.bf16.mxu0 %v2457_v10  ;;  %1346 = vmatprep.subr.bf16.mxu1 %v2460_v11  ;;  %v2515_v10 = vld [vmem:[%s3400_s4 + $0x280] ss:$20 sps:$4 sm:$0xff]   ;;  %v2518_v11 = vld [vmem:[%s3400_s4 + $0x288] ss:$20 sps:$4 sm:$0xff]  }
 0x1ce   :  { %1265 = vmatpush1.bf16.msra.mxu0 %v2455_v12  ;;  %1347 = vmatpush1.bf16.msra.mxu1 %v2458_v13  ;;  %v2523_v13 = vld [vmem:[%s3400_s4 + $0x2ac] ss:$20 sps:$4 sm:$0xff]  }
 0x1cf   :  { %1266 = vmatprep.subr.bf16.mxu0 %v2463_v14  ;;  %1348 = vmatprep.subr.bf16.mxu1 %v2466_v15  ;;  %v2526_v14 = vld [vmem:[%s3400_s4 + $0x2b4] ss:$20 sps:$4 sm:$0xff]  }
 0x1d0   :  { %v2521_v15 = vld [vmem:[%s3400_s4 + $0x2a8] ss:$20 sps:$4 sm:$0xff]  }
 0x1d2   :  { %1267 = vmatpush1.bf16.msra.mxu0 %v2461_v16  ;;  %1349 = vmatpush1.bf16.msra.mxu1 %v2464_v17  ;;  %v2524_v16 = vld [vmem:[%s3400_s4 + $0x2b0] ss:$20 sps:$4 sm:$0xff]   ;;  %v2529_v17 = vld [vmem:[%s3400_s4 + $0x2d4] ss:$20 sps:$4 sm:$0xff]  }
 0x1d3   :  { %1268 = vmatprep.subr.bf16.mxu0 %v2469_v18  ;;  %1350 = vmatprep.subr.bf16.mxu1 %v2472_v19  ;;  %v2532_v18 = vld [vmem:[%s3400_s4 + $0x2dc] ss:$20 sps:$4 sm:$0xff]  }
 0x1d4   :  { %v2527_v19 = vld [vmem:[%s3400_s4 + $0x2d0] ss:$20 sps:$4 sm:$0xff]  }
 0x1d6   :  { %1269 = vmatpush1.bf16.msra.mxu0 %v2467_v20  ;;  %1351 = vmatpush1.bf16.msra.mxu1 %v2470_v21  ;;  %v2530_v20 = vld [vmem:[%s3400_s4 + $0x2d8] ss:$20 sps:$4 sm:$0xff]   ;;  %v2535_v21 = vld [vmem:[%s3400_s4 + $0x2fc] ss:$20 sps:$4 sm:$0xff]  }
 0x1d7   :  { %1270 = vmatprep.subr.bf16.mxu0 %v2475_v22  ;;  %1352 = vmatprep.subr.bf16.mxu1 %v2478_v23  ;;  %v2533_v22 = vld [vmem:[%s3400_s4 + $0x2f8] ss:$20 sps:$4 sm:$0xff]   ;;  %v2536_v23 = vld [vmem:[%s3400_s4 + $0x300] ss:$20 sps:$4 sm:$0xff]  }
 0x1da   :  { %1271 = vmatpush1.bf16.msra.mxu0 %v2473_v24  ;;  %1353 = vmatpush1.bf16.msra.mxu1 %v2476_v25  ;;  %v2541_v24 = vld [vmem:[%s3400_s4 + $0x324] ss:$20 sps:$4 sm:$0xff]   ;;  %v2544_v25 = vld [vmem:[%s3400_s4 + $0x32c] ss:$20 sps:$4 sm:$0xff]  }
 0x1db   :  { %1272 = vmatprep.subr.bf16.mxu0 %v2481_v26  ;;  %1354 = vmatprep.subr.bf16.mxu1 %v2484_v27  ;;  %v2539_v26 = vld [vmem:[%s3400_s4 + $0x320] ss:$20 sps:$4 sm:$0xff]   ;;  %v2542_v27 = vld [vmem:[%s3400_s4 + $0x328] ss:$20 sps:$4 sm:$0xff]  }
 0x1de   :  { %1273 = vmatpush1.bf16.msra.mxu0 %v2479_v28  ;;  %1355 = vmatpush1.bf16.msra.mxu1 %v2482_v29  ;;  %v234_v28 = vsub.s32 2, %v3026_v54  ;;  %v2547_v29 = vld [vmem:[%s3400_s4 + $0x34c] ss:$20 sps:$4 sm:$0xff]  }
 0x1df   :  { %1274 = vmatprep.subr.bf16.mxu0 %v2487_v30  ;;  %1356 = vmatprep.subr.bf16.mxu1 %v2490_v31  ;;  %v2550_v30 = vld [vmem:[%s3400_s4 + $0x354] ss:$20 sps:$4 sm:$0xff]  }
 0x1e0   :  { %v2545_v31 = vld [vmem:[%s3400_s4 + $0x348] ss:$20 sps:$4 sm:$0xff]  }
 0x1e2   :  { %1275 = vmatpush1.bf16.msra.mxu0 %v2485_v32  ;;  %1357 = vmatpush1.bf16.msra.mxu1 %v2488_v33  ;;  %v2548_v32 = vld [vmem:[%s3400_s4 + $0x350] ss:$20 sps:$4 sm:$0xff]   ;;  %v235_v33 = vrot.slane %v3032_v56, %v234_v28  ;;  %v2571_v56 = vld [vmem:[%s3400_s4 + $0x2e0] ss:$20 sps:$4 sm:$0xff]  }
 0x1e3   :  { %1276 = vmatprep.subr.bf16.mxu0 %v2493_v34  ;;  %1358 = vmatprep.subr.bf16.mxu1 %v2496_v35  ;;  %v2553_v34 = vld [vmem:[%s3400_s4 + $0x374] ss:$20 sps:$4 sm:$0xff]   ;;  %v2556_v35 = vld [vmem:[%s3400_s4 + $0x37c] ss:$20 sps:$4 sm:$0xff]  }
 0x1e6   :  { %1277 = vmatpush1.bf16.msra.mxu0 %v2491_v36  ;;  %1359 = vmatpush1.bf16.msra.mxu1 %v2494_v37  ;;  %v2551_v36 = vld [vmem:[%s3400_s4 + $0x370] ss:$20 sps:$4 sm:$0xff]   ;;  %v2554_v37 = vld [vmem:[%s3400_s4 + $0x378] ss:$20 sps:$4 sm:$0xff]  }
 0x1e7   :  { %1278 = vmatprep.subr.bf16.mxu0 %v2499_v38  ;;  %1360 = vmatprep.subr.bf16.mxu1 %v2502_v39  ;;  %v2559_v39 = vld [vmem:[%s3400_s4 + $0x39c] ss:$20 sps:$4 sm:$0xff]  }
 0x1ea   :  { %1279 = vmatpush1.bf16.msra.mxu0 %v2497_v41  ;;  %1361 = vmatpush1.bf16.msra.mxu1 %v2500_v42  ;;  %v2562_v41 = vld [vmem:[%s3400_s4 + $0x3a4] ss:$20 sps:$4 sm:$0xff]  }
 0x1eb   :  { %1280 = vmatprep.subr.bf16.mxu0 %v2505_v43  ;;  %1362 = vmatprep.subr.bf16.mxu1 %v2508_v44  ;;  %v2557_v42 = vld [vmem:[%s3400_s4 + $0x398] ss:$20 sps:$4 sm:$0xff]   ;;  %v2560_v43 = vld [vmem:[%s3400_s4 + $0x3a0] ss:$20 sps:$4 sm:$0xff]  }
 0x1ee   :  { %1281 = vmatpush1.bf16.msra.mxu0 %v2503_v45  ;;  %1363 = vmatpush1.bf16.msra.mxu1 %v2506_v46  ;;  %v2563_v45 = vld [vmem:[%s3400_s4 + $0x150] ss:$20 sps:$4 sm:$0xff]  }
 0x1ef   :  { %1282 = vmatprep.subr.bf16.mxu0 %v2511_v47  ;;  %1364 = vmatprep.subr.bf16.mxu1 %v2514_v48  ;;  %v2564_v46 = vld [vmem:[%s3400_s4 + $0x10] ss:$20 sps:$4 sm:$0xff]  }
 0x1f0   :  { %v2565_v48 = vld [vmem:[%s3400_s4 + $0x290] ss:$20 sps:$4 sm:$0xff]  }
 0x1f2   :  { %1283 = vmatpush1.bf16.msra.mxu0 %v2509_v49  ;;  %1365 = vmatpush1.bf16.msra.mxu1 %v2512_v50  ;;  %v2566_v49 = vld [vmem:[%s3400_s4 + $0x178] ss:$20 sps:$4 sm:$0xff]  }
 0x1f3   :  { %1293 = vmatprep.subr.bf16.mxu0 %v2517_v51  ;;  %1375 = vmatprep.subr.bf16.mxu1 %v2520_v52  ;;  %v2567_v50 = vld [vmem:[%s3400_s4 + $0x38] ss:$20 sps:$4 sm:$0xff]   ;;  %v2569_v52 = vld [vmem:[%s3400_s4 + $0x1a0] ss:$20 sps:$4 sm:$0xff]  }
 0x1f4   :  { %v2568_v51 = vld [vmem:[%s3400_s4 + $0x2b8] ss:$20 sps:$4 sm:$0xff]  }
 0x288   :  { %v401_v60 = vpop.f32.mrb[4].mxu0  ;;  %v3041_v61 = vpop.f32.mrb[4].mxu1 }
 0x289   :  { %v402_v62 = vadd.f32 %v401_v60, %v227_v58  ;;  %v403_v63 = vpop.f32.mrb[5].mxu0  ;;  %v2320_v0 = vpop.f32.mrb[5].mxu1  ;;  %v443_v38 = vadd.f32 %v3041_v61, %v235_v33  ;;  %v2572_v58 = vld [vmem:[%s3400_s4 + $0x1c8] ss:$20 sps:$4 sm:$0xff]   ;;  %v2575_v61 = vld [vmem:[%s3400_s4 + $0x1f0] ss:$20 sps:$4 sm:$0xff]  }
 0x28a   :  { %v404_v2 = vadd.f32 %v403_v63, %v231_v59  ;;  %v405_v3 = vpop.f32.mrb[6].mxu0  ;;  %v445_v4 = vpop.f32.mrb[6].mxu1  ;;  %v2573_v59 = vld [vmem:[%s3400_s4 + $0x88] ss:$20 sps:$4 sm:$0xff]   ;;  %v2577_v63 = vld [vmem:[%s3400_s4 + $0x330] ss:$20 sps:$4 sm:$0xff]  }
 0x28b   :  { %v448_v5 = vmax.f32 %v402_v62, 0.0  ;;  %v406_v6 = vpop.f32.mrb[7].mxu0  ;;  %v2321_v7 = vpop.f32.mrb[7].mxu1  ;;  %v450_v44 = vmax.f32 %v443_v38, 0.0  ;;  %v2574_v60 = vld [vmem:[%s3400_s4 + $0x308] ss:$20 sps:$4 sm:$0xff]  }
 0x28c   :  { %v449_v8 = vmax.f32 %v404_v2, 0.0  ;;  %v2576_v62 = vld [vmem:[%s3400_s4 + $0xb0] ss:$20 sps:$4 sm:$0xff]   ;;  %v2578_v0 = vld [vmem:[%s3400_s4 + $0x218] ss:$20 sps:$4 sm:$0xff]  }
 0x28d   :  { %v3051_v12 = vpack.c.bf16 %v448_v5, %v448_v5  ;;  %v3154_v47 = vpack.c.bf16 %v450_v44, %v450_v44  ;;  %v2579_v2 = vld [vmem:[%s3400_s4 + $0xd8] ss:$20 sps:$4 sm:$0xff]   ;;  %v2581_v4 = vld [vmem:[%s3400_s4 + $0x240] ss:$20 sps:$4 sm:$0xff]   ;;  %v2584_v7 = vld [vmem:[%s3400_s4 + $0x268] ss:$20 sps:$4 sm:$0xff]  }
 0x28e   :  { %v3043_v9 = vpack.c.bf16 %v449_v8, %v449_v8  ;;  %v2580_v3 = vld [vmem:[%s3400_s4 + $0x358] ss:$20 sps:$4 sm:$0xff]   ;;  %v2582_v5 = vld [vmem:[%s3400_s4 + $0x100] ss:$20 sps:$4 sm:$0xff]   ;;  %v2585_v8 = vld [vmem:[%s3400_s4 + $0x128] ss:$20 sps:$4 sm:$0xff]  }
 0x28f   :  { %v2583_v6 = vld [vmem:[%s3400_s4 + $0x380] ss:$20 sps:$4 sm:$0xff]   ;;  %v2610_v33 = vld [vmem:[%s3401_s5 + $0xa8] sm:$0xff]   ;;  %v2615_v38 = vld [vmem:[%s3401_s5 + $0x78] sm:$0xff]  }
 0x290   :  { %1284 = vmatprep.mubr.bf16.mxu0 %v3043_v9  ;;  %1366 = vmatprep.mubr.bf16.mxu1 %v3043_v9  ;;  %v2011_v44 = vld [vmem:[%s3402_s6 + $0x2] ss:$8 sm:$0x10] }
 0x291   :  { %1285 = vmatmul.mubr.bf16.vlgmr.msra.gmra.mrb[8].mxu0 %v3051_v12  ;;  %1367 = vmatmul.mubr.bf16.vlgmr.msra.gmra.mrb[8].mxu1 %v3051_v12 }
 0x292   :  { %1294 = vmatpush1.bf16.msra.mxu0 %v2515_v10  ;;  %1376 = vmatpush1.bf16.msra.mxu1 %v2518_v11  ;;  %v2587_v10 = vld [vmem:[%s3401_s5 + $0x40] sm:$0xff]  }
 0x293   :  { %1295 = vmatprep.subr.bf16.mxu0 %v2523_v13  ;;  %1377 = vmatprep.subr.bf16.mxu1 %v2526_v14  ;;  %v2588_v11 = vld [vmem:[%s3401_s5 + $0xc0] sm:$0xff]  }
 0x294   :  { %1325 = vmatprep.mubr.bf16.mxu0 %v2657_v40  ;;  %1407 = vmatprep.mubr.bf16.mxu1 %v2657_v40  ;;  %v2538_v40 = vld [vmem:[%s3400_s4 + $0x304] ss:$20 sps:$4 sm:$0xff]  }
 0x295   :  { %v2589_v13 = vld [vmem:[%s3401_s5] sm:$0xff]  }
 0x296   :  { %1296 = vmatpush1.bf16.msra.mxu0 %v2521_v15  ;;  %1378 = vmatpush1.bf16.msra.mxu1 %v2524_v16  ;;  %v2590_v14 = vld [vmem:[%s3401_s5 + $0x80] sm:$0xff]   ;;  %v2591_v15 = vld [vmem:[%s3401_s5 + $0x48] sm:$0xff]  }
 0x297   :  { %1297 = vmatprep.subr.bf16.mxu0 %v2529_v17  ;;  %1379 = vmatprep.subr.bf16.mxu1 %v2532_v18  ;;  %v2592_v16 = vld [vmem:[%s3401_s5 + $0xc8] sm:$0xff]  }
 0x298   :  { %v2593_v17 = vld [vmem:[%s3401_s5 + $0x8] sm:$0xff]  }
 0x299   :  { %v2594_v18 = vld [vmem:[%s3401_s5 + $0x88] sm:$0xff]  }
 0x29a   :  { %1298 = vmatpush1.bf16.msra.mxu0 %v2527_v19  ;;  %1380 = vmatpush1.bf16.msra.mxu1 %v2530_v20  ;;  %v2595_v19 = vld [vmem:[%s3401_s5 + $0x50] sm:$0xff]  }
 0x29b   :  { %1299 = vmatprep.subr.bf16.mxu0 %v2535_v21  ;;  %1381 = vmatprep.subr.bf16.mxu1 %v2538_v40  ;;  %v2597_v20 = vld [vmem:[%s3401_s5 + $0x10] sm:$0xff]   ;;  %v2599_v40 = vld [vmem:[%s3401_s5 + $0x58] sm:$0xff]  }
 0x29c   :  { %v2598_v21 = vld [vmem:[%s3401_s5 + $0x90] sm:$0xff]  }
 0x29e   :  { %1300 = vmatpush1.bf16.msra.mxu0 %v2533_v22  ;;  %1382 = vmatpush1.bf16.msra.mxu1 %v2536_v23  ;;  %v2600_v22 = vld [vmem:[%s3401_s5 + $0xd8] sm:$0xff]  }
 0x29f   :  { %1301 = vmatprep.subr.bf16.mxu0 %v2541_v24  ;;  %1383 = vmatprep.subr.bf16.mxu1 %v2544_v25  ;;  %v2601_v23 = vld [vmem:[%s3401_s5 + $0x18] sm:$0xff]   ;;  %v2603_v25 = vld [vmem:[%s3401_s5 + $0x60] sm:$0xff]  }
 0x2a0   :  { %v2602_v24 = vld [vmem:[%s3401_s5 + $0x98] sm:$0xff]  }
 0x2a2   :  { %1302 = vmatpush1.bf16.msra.mxu0 %v2539_v26  ;;  %1384 = vmatpush1.bf16.msra.mxu1 %v2542_v27  ;;  %v2604_v26 = vld [vmem:[%s3401_s5 + $0xe0] sm:$0xff]  }
 0x2a3   :  { %1303 = vmatprep.subr.bf16.mxu0 %v2547_v29  ;;  %1385 = vmatprep.subr.bf16.mxu1 %v2550_v30  ;;  %v2605_v27 = vld [vmem:[%s3401_s5 + $0x20] sm:$0xff]   ;;  %v2607_v30 = vld [vmem:[%s3401_s5 + $0x68] sm:$0xff]  }
 0x2a4   :  { %v2606_v29 = vld [vmem:[%s3401_s5 + $0xa0] sm:$0xff]  }
 0x2a6   :  { %1304 = vmatpush1.bf16.msra.mxu0 %v2545_v31  ;;  %1386 = vmatpush1.bf16.msra.mxu1 %v2548_v32  ;;  %v2608_v31 = vld [vmem:[%s3401_s5 + $0xe8] sm:$0xff]  }
 0x2a7   :  { %1305 = vmatprep.subr.bf16.mxu0 %v2553_v34  ;;  %1387 = vmatprep.subr.bf16.mxu1 %v2556_v35  ;;  %v2609_v32 = vld [vmem:[%s3401_s5 + $0x28] sm:$0xff]   ;;  %v2611_v34 = vld [vmem:[%s3401_s5 + $0x70] sm:$0xff]  }
 0x2a8   :  { %v2612_v35 = vld [vmem:[%s3401_s5 + $0xf0] sm:$0xff]  }
 0x2aa   :  { %1306 = vmatpush1.bf16.msra.mxu0 %v2551_v36  ;;  %1388 = vmatpush1.bf16.msra.mxu1 %v2554_v37  ;;  %v2613_v36 = vld [vmem:[%s3401_s5 + $0x30] sm:$0xff]  }
 0x2ab   :  { %1307 = vmatprep.subr.bf16.mxu0 %v2559_v39  ;;  %1389 = vmatprep.subr.bf16.mxu1 %v2562_v41  ;;  %v2614_v37 = vld [vmem:[%s3401_s5 + $0xb0] sm:$0xff]   ;;  %v2616_v39 = vld [vmem:[%s3401_s5 + $0xf8] sm:$0xff]  }
 0x2ac   :  { %v2617_v41 = vld [vmem:[%s3401_s5 + $0x38] sm:$0xff]  }
 0x2ae   :  { %1308 = vmatpush1.bf16.msra.mxu0 %v2557_v42  ;;  %1390 = vmatpush1.bf16.msra.mxu1 %v2560_v43  ;;  %v2618_v42 = vld [vmem:[%s3401_s5 + $0xb8] sm:$0xff]  }
 0x2af   :  { %2192 = vmatprep.subr.bf16.mxu0 %v2563_v45  ;;  %2322 = vmatprep.subr.bf16.mxu1 %v2655_v1  ;;  %v2010_v43 = vld [vmem:[%s3402_s6 + $0x2] ss:$8 sm:$0xf] }
 0x2b0   :  { %v601_v45 = vor.u32 %v2011_v44, %v2010_v43 }
 0x2b1   :  { %1326 = vmatmul.mubr.bf16.vlgmr.msra.gmra.mrb[8].mxu0 %v3154_v47  ;;  %1408 = vmatmul.mubr.bf16.vlgmr.msra.gmra.mrb[8].mxu1 %v3154_v47 }
 0x2b2   :  { %2193 = vmatpush3.bf16.msra.mxu0 %v2564_v46  ;;  %1448 = vmatprep.mubr.bf16.mxu0 %v3043_v9  ;;  %v2586_v9 = vld [vmem:[%s3400_s4 + $0x3a8] ss:$20 sps:$4 sm:$0xff]   ;;  %v617_v46 = vsub.s32 3, %v3026_v54 }
 0x2b3   :  { %2323 = vmatpush3.bf16.msra.mxu1 %v2565_v48  ;;  %2194 = vmatprep.subr.bf16.mxu0 %v2566_v49  ;;  %v614_v48 = vrot.slane %v601_v45, %v234_v28  ;;  %v610_v49 = vrot.slane %v601_v45, %v230_v57  ;;  %v2619_v57 = vld [vmem:[%s3401_s5 + $0x100] sm:$0xff]  }
 0x2b4   :  { %2324 = vmatprep.subr.bf16.mxu1 %v2655_v1  ;;  %2338 = vmatprep.mubr.msk.bf16.mxu1 %vm2656_vm0, %v2655_v1 }
 0x2b6   :  { %2195 = vmatpush3.bf16.msra.mxu0 %v2567_v50  ;;  %v618_v50 = vrot.slane %v601_v45, %v617_v46 }
 0x2b7   :  { %2325 = vmatpush3.bf16.msra.mxu1 %v2568_v51  ;;  %2196 = vmatprep.subr.bf16.mxu0 %v2569_v52 }
 0x2b8   :  { %2326 = vmatprep.subr.bf16.mxu1 %v2655_v1 }
 0x2ba   :  { %2197 = vmatpush3.bf16.msra.mxu0 %v2570_v53 }
 0x2bb   :  { %2327 = vmatpush3.bf16.msra.mxu1 %v2571_v56  ;;  %2198 = vmatprep.subr.bf16.mxu0 %v2572_v58 }
 0x2bc   :  { %2328 = vmatprep.subr.bf16.mxu1 %v2655_v1 }
 0x2be   :  { %2199 = vmatpush3.bf16.msra.mxu0 %v2573_v59 }
 0x2bf   :  { %2329 = vmatpush3.bf16.msra.mxu1 %v2574_v60  ;;  %2200 = vmatprep.subr.bf16.mxu0 %v2575_v61 }
 0x2c0   :  { %2330 = vmatprep.subr.bf16.mxu1 %v2655_v1 }
 0x2c2   :  { %2201 = vmatpush3.bf16.msra.mxu0 %v2576_v62 }
 0x2c3   :  { %2331 = vmatpush3.bf16.msra.mxu1 %v2577_v63  ;;  %2202 = vmatprep.subr.bf16.mxu0 %v2578_v0 }
 0x2c4   :  { %2332 = vmatprep.subr.bf16.mxu1 %v2655_v1 }
 0x2c6   :  { %2203 = vmatpush3.bf16.msra.mxu0 %v2579_v2 }
 0x2c7   :  { %2333 = vmatpush3.bf16.msra.mxu1 %v2580_v3  ;;  %2204 = vmatprep.subr.bf16.mxu0 %v2581_v4 }
 0x2c8   :  { %2334 = vmatprep.subr.bf16.mxu1 %v2655_v1 }
 0x2ca   :  { %2205 = vmatpush3.bf16.msra.mxu0 %v2582_v5 }
 0x2cb   :  { %2335 = vmatpush3.bf16.msra.mxu1 %v2583_v6  ;;  %2206 = vmatprep.subr.bf16.mxu0 %v2584_v7 }
 0x2cc   :  { %2336 = vmatprep.subr.bf16.mxu1 %v2655_v1 }
 0x2ce   :  { %2207 = vmatpush3.bf16.msra.mxu0 %v2585_v8 }
 0x2cf   :  { %2337 = vmatpush3.bf16.msra.mxu1 %v2586_v9  ;;  %2223 = vmatprep.subr.bf16.mxu0 %v2587_v10  ;;  %v2620_v9 = vld [vmem:[%s3401_s5 + $0x108] sm:$0xff]   ;;  %v2621_v10 = vld [vmem:[%s3401_s5 + $0x110] sm:$0xff]  }
 0x2d0   :  { %2245 = vmatprep.subr.bf16.mxu1 %v2588_v11  ;;  %v2622_v11 = vld [vmem:[%s3401_s5 + $0x118] sm:$0xff]  }
 0x2d1   :  { %1449 = vmatmul.mubr.bf16.vlgmr.msra.gmra.mrb[12].mxu0 %v3051_v12  ;;  %v2596_v12 = vld [vmem:[%s3401_s5 + $0xd0] sm:$0xff]  }
 0x2d2   :  { %2339 = vmatmul.mubr.bf16.vlgmr.msra.gmra.mrb[12].mxu1 %v3154_v47  ;;  %2224 = vmatpush3.bf16.msra.mxu0 %v2589_v13  ;;  %v606_v47 = vrot.slane %v601_v45, %v226_v55  ;;  %v2623_v13 = vld [vmem:[%s3401_s5 + $0x120] sm:$0xff]  }
 0x2d3   :  { %2246 = vmatpush3.bf16.msra.mxu1 %v2590_v14  ;;  %2225 = vmatprep.subr.bf16.mxu0 %v2591_v15  ;;  %v2624_v14 = vld [vmem:[%s3401_s5 + $0x128] sm:$0xff]   ;;  %v621_v15 = vsub.s32 4, %v3026_v54 }
 0x2d4   :  { %2247 = vmatprep.subr.bf16.mxu1 %v2592_v16  ;;  %v2625_v16 = vld [vmem:[%s3401_s5 + $0x130] sm:$0xff]  }
 0x2d6   :  { %2226 = vmatpush3.bf16.msra.mxu0 %v2593_v17 }
 0x2d7   :  { %2248 = vmatpush3.bf16.msra.mxu1 %v2594_v18  ;;  %2227 = vmatprep.subr.bf16.mxu0 %v2595_v19  ;;  %v622_v18 = vrot.slane %v601_v45, %v621_v15 }
 0x2d8   :  { %2249 = vmatprep.subr.bf16.mxu1 %v2596_v12 }
 0x2da   :  { %2228 = vmatpush3.bf16.msra.mxu0 %v2597_v20 }
 0x2db   :  { %2250 = vmatpush3.bf16.msra.mxu1 %v2598_v21  ;;  %2229 = vmatprep.subr.bf16.mxu0 %v2599_v40 }
 0x2dc   :  { %2251 = vmatprep.subr.bf16.mxu1 %v2600_v22  ;;  %v2626_v22 = vld [vmem:[%s3401_s5 + $0x138] sm:$0xff]   ;;  %s2658_s5 = smov [#allocation2]  }
 0x2de   :  { %2230 = vmatpush3.bf16.msra.mxu0 %v2601_v23 }
 0x2df   :  { %2252 = vmatpush3.bf16.msra.mxu1 %v2602_v24  ;;  %2231 = vmatprep.subr.bf16.mxu0 %v2603_v25 }
 0x2e0   :  { %2253 = vmatprep.subr.bf16.mxu1 %v2604_v26 }
 0x2e2   :  { %2232 = vmatpush3.bf16.msra.mxu0 %v2605_v27 }
 0x2e3   :  { %2254 = vmatpush3.bf16.msra.mxu1 %v2606_v29  ;;  %2233 = vmatprep.subr.bf16.mxu0 %v2607_v30 }
 0x2e4   :  { %2255 = vmatprep.subr.bf16.mxu1 %v2608_v31 }
 0x2e6   :  { %2234 = vmatpush3.bf16.msra.mxu0 %v2609_v32  ;;  %v1586_v32 = vld [vmem:[%s3402_s6 + $0x3] ss:$0 sm:$0xff]  ;;  %s1967_s6 = sshll.u32 %s2658_s5, 4  ;;  %s1968_s6 = int_to_ptr.vmem [resolvable:$true] %s1967_s6 }
 0x2e7   :  { %2256 = vmatpush3.bf16.msra.mxu1 %v2610_v33  ;;  %2235 = vmatprep.subr.bf16.mxu0 %v2611_v34  ;;  %s2631_s18 = scalar_lea.vmem %s1968_s6, 32  ;;  %p2636_p1 = scmp.lt.s32.totalorder %s1968_s6, %s1968_s6 }
 0x2e8   :  { %2257 = vmatprep.subr.bf16.mxu1 %v2612_v35  ;;  %p2632_p0 = scmp.ne.s32.totalorder %s1968_s6, %s2631_s18  ;;  %p2637_p2 = scmp.lt.s32.totalorder %s2631_s18, %s2631_s18 }
 0x2ea   :  { %2236 = vmatpush3.bf16.msra.mxu0 %v2613_v36  ;;  %p2638_p3 = por %p2637_p2, %p2636_p1 }
 0x2eb   :  { %2258 = vmatpush3.bf16.msra.mxu1 %v2614_v37  ;;  %2237 = vmatprep.subr.bf16.mxu0 %v2615_v38 }
 0x2ec   :  { %2259 = vmatprep.subr.bf16.mxu1 %v2616_v39  ;;  %p2639_p4 = pnand %p2638_p3, %p2632_p0 }
 0x2ee   :  { %2238 = vmatpush3.bf16.msra.mxu0 %v2617_v41 }
 0x2ef   :  { %2260 = vmatpush3.bf16.msra.mxu1 %v2618_v42  ;;  %2342 = vmatprep.subr.bf16.mxu0 %v2655_v1 }
 0x384   :  { %v1327_v51 = vpop.f32.mrb[8].mxu0  ;;  %v1409_v52 = vpop.f32.mrb[8].mxu1 }
 0x385   :  { %v2362_v53 = vadd.f32 %v1327_v51, %v606_v47  ;;  %v2364_v56 = vadd.f32 %v1409_v52, %v614_v48  ;;  %v1329_v58 = vpop.f32.mrb[9].mxu0  ;;  %v1411_v59 = vpop.f32.mrb[9].mxu1 }
 0x386   :  { %v2363_v60 = vadd.f32 %v1329_v58, %v610_v49  ;;  %v2365_v61 = vadd.f32 %v1411_v59, %v618_v50  ;;  %v1331_v62 = vpop.f32.mrb[10].mxu0  ;;  %v1413_v63 = vpop.f32.mrb[10].mxu1 }
 0x387   :  { %v1496_v0 = vmax.f32 %v2362_v53, 0.0  ;;  %v1498_v2 = vmax.f32 %v2364_v56, 0.0  ;;  %v1332_v55 = vpop.f32.mrb[11].mxu0  ;;  %v1414_v3 = vpop.f32.mrb[11].mxu1 }
 0x388   :  { %v1497_v4 = vmax.f32 %v2363_v60, 0.0  ;;  %v1499_v28 = vmax.f32 %v2365_v61, 0.0 }
 0x389   :  { %v1501_v7 = vpack.c.bf16 %v1496_v0, %v1496_v0  ;;  %v1503_v8 = vpack.c.bf16 %v1498_v2, %v1498_v2 }
 0x38a   :  { %v1502_v5 = vpack.c.bf16 %v1497_v4, %v1497_v4  ;;  %v1504_v6 = vpack.c.bf16 %v1499_v28, %v1499_v28 }
 0x38c   :  { %1859 = vmatprep.mubr.bf16.mxu0 %v1502_v5  ;;  %1899 = vmatprep.mubr.bf16.mxu1 %v1504_v6 }
 0x38d   :  { %1860 = vmatmul.mubr.bf16.vlgmr.msra.gmra.mrb[16].mxu0 %v1501_v7  ;;  %1900 = vmatmul.mubr.bf16.vlgmr.msra.gmra.mrb[16].mxu1 %v1503_v8 }
 0x38e   :  { %2343 = vmatpush3.bf16.msra.mxu0 %v2619_v57  ;;  %2358 = vmatprep.mubr.msk.bf16.mxu0 %vm2656_vm0, %v2655_v1 }
 0x38f   :  { %2344 = vmatprep.subr.bf16.mxu0 %v2655_v1 }
 0x392   :  { %2345 = vmatpush3.bf16.msra.mxu0 %v2620_v9 }
 0x393   :  { %2346 = vmatprep.subr.bf16.mxu0 %v2655_v1 }
 0x396   :  { %2347 = vmatpush3.bf16.msra.mxu0 %v2621_v10 }
 0x397   :  { %2348 = vmatprep.subr.bf16.mxu0 %v2655_v1 }
 0x39a   :  { %2349 = vmatpush3.bf16.msra.mxu0 %v2622_v11 }
 0x39b   :  { %2350 = vmatprep.subr.bf16.mxu0 %v2655_v1 }
 0x39e   :  { %2351 = vmatpush3.bf16.msra.mxu0 %v2623_v13 }
 0x39f   :  { %2352 = vmatprep.subr.bf16.mxu0 %v2655_v1 }
 0x3a2   :  { %2353 = vmatpush3.bf16.msra.mxu0 %v2624_v14 }
 0x3a3   :  { %2354 = vmatprep.subr.bf16.mxu0 %v2655_v1 }
 0x3a4   :  { %v2208_v17 = vpop.f32.mrb[12].mxu0 }
 0x3a5   :  { %v1490_v19 = vpop.f32.mrb[12].mxu1  ;;  %v2209_v12 = vpop.f32.mrb[13].mxu0 }
 0x3a6   :  { %v2210_v20 = vadd.f32 %v2209_v12, %v2208_v17  ;;  %v2340_v21 = vpop.f32.mrb[13].mxu1  ;;  %v2211_v40 = vpop.f32.mrb[14].mxu0  ;;  %2355 = vmatpush3.bf16.msra.mxu0 %v2625_v16 }
 0x3a7   :  { %v1493_v54 = vpop.f32.mrb[14].mxu1  ;;  %v2212_v23 = vpop.f32.mrb[15].mxu0  ;;  %2356 = vmatprep.subr.bf16.mxu0 %v2655_v1 }
 0x3a8   :  { %v1451_v24 = vadd.f32 %v2210_v20, %v622_v18  ;;  %v2341_v25 = vpop.f32.mrb[15].mxu1 }
 0x3aa   :  { %v1491_v26 = vadd.f32 %v1490_v19, %v1451_v24  ;;  %2357 = vmatpush3.bf16.msra.mxu0 %v2626_v22 }
 0x3ac   :  { %v1500_v27 = vmax.f32 %v1491_v26, 0.0 }
 0x3ae   :  { %v1505_v29 = vpack.c.bf16 %v1500_v27, %v1500_v27 }
 0x3b0   :  { %2359 = vmatmul.mubr.bf16.vlgmr.msra.gmra.mrb[20].mxu0 %v1505_v29 }
 0x460   :  { %v2239_v30 = vpop.f32.mrb[16].mxu0  ;;  %v2261_v31 = vpop.f32.mrb[16].mxu1 }
 0x461   :  { %v2240_v33 = vpop.f32.mrb[17].mxu0  ;;  %v2262_v34 = vpop.f32.mrb[17].mxu1 }
 0x462   :  { %v2241_v35 = vadd.f32 %v2240_v33, %v2239_v30  ;;  %v2263_v36 = vadd.f32 %v2262_v34, %v2261_v31  ;;  %v2242_v37 = vpop.f32.mrb[18].mxu0  ;;  %v2264_v38 = vpop.f32.mrb[18].mxu1 }
 0x463   :  { %v2243_v1 = vpop.f32.mrb[19].mxu0  ;;  %v2265_v39 = vpop.f32.mrb[19].mxu1 }
 0x464   :  { %v1862_v41 = vadd.f32 %v2241_v35, %v1586_v32 }
 0x466   :  { %v1902_v42 = vadd.f32 %v2263_v36, %v1862_v41 }
 0x483   :  { %v1941_v43 = vpop.f32.mrb[20].mxu0 }
 0x484   :  { %v1942_v44 = vadd.f32 %v1941_v43, %v1902_v42  ;;  %v2360_v45 = vpop.f32.mrb[21].mxu0 }
 0x485   :  { %v1944_v46 = vpop.f32.mrb[22].mxu0 }
 0x486   :  { %v2361_v47 = vpop.f32.mrb[23].mxu0  ;;  %v1948_v48 = vsel %vm1947_vm2, %v1942_v44, -inf }
 0x487   :  { %1949 = vmax.xlane.f32.xlu0 %v1948_v48 }
 0x514   :  { %v1950_v49 = vpop.xlane.xlu0 %1949 }
 0x515   :  { %v1951_v50 = vsub.f32 %v1942_v44, %v1950_v49 }
 0x517   :  { %v1952_v51 = vmul.f32 1.442695, %v1951_v50 }
 0x519   :  { %2627 = vpow2.f32 %v1952_v51 }
 0x523   :  { %v2628_v52 = vpop.eup %2627 }
 0x524   :  { %v1954_v53 = vsel %vm1947_vm2, %v2628_v52, 0.0 }
 0x525   :  { %1955 = vadd.xlane.f32.xlu0 %v1954_v53 }
 0x5b2   :  { %v1956_v56 = vpop.xlane.xlu0 %1955 }
 0x5b3   :  { %2629 = vlog2.f32 %v1956_v56 }
 0x5bd   :  { %v2630_v58 = vpop.eup %2629 }
 0x5be   :  { %v1958_v59 = vmul.f32 0.6931472, %v2630_v58 }
 0x5c0   :  { %v1959_v60 = vsub.f32 %v1951_v50, %v1958_v59 }
 0x5c2   :  { %1960 = vst [vmem:[#allocation2] sm:$0x3] %v1959_v60 }
 0x5c3   :  { %2642 = shalt.err (!%p2639_p4)
}
 0x5c4   :  { %s2643_s3 = scalar_lea.hbm %s3403_s7, 32 }
 0x5c5   :  { %p2644_p5 = scmp.ne.s32.totalorder %s3403_s7, %s2643_s3  ;;  %p2647_p6 = scmp.lt.u32.totalorder %s2643_s3, %s3403_s7 }
 0x5c7   :  { %p2649_p7 = pnand %p2647_p6, %p2644_p5 }
 0x5c9   :  { %2652 = shalt.err (!%p2649_p7)
}
 0x5ca   :  { %1970 = dma.vmem_to_hbm [thread:$0]  %s1968_s6, 32, %s3403_s7, [#allocation3]  }
 0x5cb   :  { %2653 = dma.done.wait [#allocation3], 32  }
 0x5cc   :  { %2654 = vsyncadd [#allocation3], 4294967264 }
 0x5cd   :  { %1974 = vsyncpa [#allocation3], 1 }

</bundles_post_ra>
